<compile_context>
chip_gen: v7x
topology: tpu7x:2x2x1
jax: 0.10.0
libtpu: 0.0.40
codegen_flags: <defaults>
</compile_context>

<pallas_src>
import math
from functools import partial

import jax
import jax.numpy as jnp
from jax import lax
from jax.experimental import pallas as pl
from jax.experimental.pallas import tpu as pltpu

# torch.nn.RMSNorm(eps=None) -> eps = torch.finfo(torch.float32).eps
EPS = 1.1920928955078125e-07

# Lane-aligned chunk of the 4*C MLP hidden dimension processed per inner step.
MLP_CHUNK = 1024


def _rmsnorm(v, w):
    # v: (T, C) f32, w: (1, C) f32
    ms = jnp.mean(v * v, axis=-1, keepdims=True)
    return v * lax.rsqrt(ms + EPS) * w


def block_kernel(x_ref, anw_ref, wqkvT_ref, wprojT_ref, fnw_ref, w1T_ref, w2T_ref,
                 o_ref, k_sc, v_sc, y_sc, *, n_head, tq):
    f32, bf16 = jnp.float32, jnp.bfloat16
    T, C = x_ref.shape                       # x block is the full (T, C) batch row
    hd = C // n_head
    qi = pl.program_id(1)

    anw = anw_ref[...]                       # (1, C) f32
    fnw = fnw_ref[...]

    # ---------------- K / V for the whole row: computed once per batch element ----
    @pl.when(qi == 0)
    def _():
        hf = _rmsnorm(x_ref[...].astype(f32), anw).astype(bf16)            # (T, C)
        k_sc[...] = jnp.dot(hf, wqkvT_ref[:, C:2 * C],
                            preferred_element_type=f32).astype(bf16)
        v_sc[...] = jnp.dot(hf, wqkvT_ref[:, 2 * C:],
                            preferred_element_type=f32).astype(bf16)

    # ---------------- Q for this query tile (1/sqrt(hd) folded into Wq) -----------
    q_lo = pl.multiple_of(qi * tq, tq)
    xq = x_ref[pl.ds(q_lo, tq), :].astype(f32)                              # (tq, C)
    hq = _rmsnorm(xq, anw).astype(bf16)
    q_all = jnp.dot(hq, wqkvT_ref[:, :C],
                    preferred_element_type=f32).astype(bf16)                # (tq, C)

    row = lax.broadcasted_iota(jnp.int32, (tq, tq), 0)
    col = lax.broadcasted_iota(jnp.int32, (tq, tq), 1)
    n_k_tiles = qi + 1          # causal: skip key tiles strictly above the diagonal

    # ---------------- attention: per-head online softmax over key tiles -----------
    # Head loop stays a static Python loop so the per-head lane slices are static
    # (hd is usually not a multiple of 128); the big (tq, tq) temporaries are already
    # live-range-bounded by the inner fori_loop over key tiles.
    # TODO(synk): switch to lax.fori_loop over heads with a head-padded scratch
    #             layout once dynamic lane-offset slicing is required.
    for hidx in range(n_head):
        off = hidx * hd
        qh = q_all[:, off:off + hd]                                         # (tq, hd)

        def kv_step(kt, carry):
            m_i, l_i, acc = carry
            k_lo = pl.multiple_of(kt * tq, tq)
            kh = k_sc[pl.ds(k_lo, tq), off:off + hd]                        # (tq, hd)
            vh = v_sc[pl.ds(k_lo, tq), off:off + hd]
            # q @ k^T without materializing a transpose
            s = lax.dot_general(qh, kh, (((1,), (1,)), ((), ())),
                                preferred_element_type=f32)                 # (tq, tq)
            s = jnp.where((q_lo + row) >= (k_lo + col), s, -1e30)
            m_new = jnp.maximum(m_i, jnp.max(s, axis=-1, keepdims=True))
            # TODO(synk): bf16 exp on v6e/v7x (2x EUP rate); kept f32 for accuracy.
            p = jnp.exp(s - m_new)
            alpha = jnp.exp(m_i - m_new)
            l_new = alpha * l_i + jnp.sum(p, axis=-1, keepdims=True)
            acc_new = alpha * acc + jnp.dot(p.astype(bf16), vh,
                                            preferred_element_type=f32)
            return m_new, l_new, acc_new

        m0 = jnp.full((tq, 1), -jnp.inf, f32)
        l0 = jnp.zeros((tq, 1), f32)
        a0 = jnp.zeros((tq, hd), f32)
        _, l_f, acc_f = lax.fori_loop(0, n_k_tiles, kv_step, (m0, l0, a0))
        # lane-offset store into the head-assembled output scratch (plain vst)
        y_sc[:, off:off + hd] = (acc_f * pl.reciprocal(l_f, approx=True)).astype(bf16)

    # one full-depth (tq, C) @ (C, C) output projection (not per-head hd-deep)
    attn = jnp.dot(y_sc[...], wprojT_ref[...], preferred_element_type=f32)
    x1 = xq + attn                                        # first residual, f32

    # ---------------- MLP sub-block ------------------------------------------------
    h2 = _rmsnorm(x1, fnw).astype(bf16)                   # (tq, C) bf16
    H4 = w1T_ref.shape[1]                                 # 4 * C
    mlp = jnp.zeros((tq, C), f32)
    lo = 0
    while lo < H4:    # static chunk loop; serial accumulation bounds chunk liveness
        width = min(MLP_CHUNK, H4 - lo)
        a = jnp.dot(h2, w1T_ref[:, lo:lo + width],
                    preferred_element_type=f32)           # (tq, width) f32
        a = a * jax.nn.sigmoid(a)                         # SiLU in f32
        mlp = mlp + jnp.dot(a.astype(bf16), w2T_ref[lo:lo + width, :],
                            preferred_element_type=f32)   # (tq, C) f32
        lo += width

    o_ref[...] = (x1 + mlp).astype(o_ref.dtype)           # second residual


def _pick_q_tile(T, max_tile=256):
    """Largest multiple-of-8 divisor of T not exceeding max_tile (fallback: T)."""
    best = None
    d = 8
    while d <= min(max_tile, T):
        if T % d == 0:
            best = d
        d += 8
    return best if best is not None else T


def _vmem_limit_bytes():
    # Leave headroom below physical VMEM (v7x has only 64 MiB per TensorCore).
    try:
        cap = int(pltpu.get_tpu_info().vmem_capacity_bytes)
        return max(32 * 1024 * 1024, (cap * 7) // 8)
    except Exception:
        return 64 * 1024 * 1024


def block_forward(x, params, *, n_head, max_q_tile=256):
    """params follow the PyTorch (out_features, in_features) convention:
       anw (1,C), wqkv (3C,C), wproj (C,C), fnw (1,C), w1 (4C,C), w2 (C,4C)."""
    B, T, C = x.shape
    assert C % n_head == 0
    anw, wqkv, wproj, fnw, w1, w2 = params
    scale = 1.0 / math.sqrt(C // n_head)

    # Pre-transpose + bf16-cast the weights OUTSIDE the kernel (lane-contiguous MXU
    # RHS, half the weight VMEM bytes); fold the 1/sqrt(hd) softmax scale into Wq.
    wqkvT = wqkv.T.astype(jnp.float32)
    wqkvT = wqkvT.at[:, :C].multiply(scale)
    wqkvT = wqkvT.astype(jnp.bfloat16)      # (C, 3C)
    wprojT = wproj.T.astype(jnp.bfloat16)   # (C, C)
    w1T = w1.T.astype(jnp.bfloat16)         # (C, 4C)
    w2T = w2.T.astype(jnp.bfloat16)         # (4C, C)
    anw32 = anw.astype(jnp.float32)
    fnw32 = fnw.astype(jnp.float32)

    tq = _pick_q_tile(T, max_q_tile)
    nq = T // tq
    vmem_limit = _vmem_limit_bytes()

    def build(single_buffer_weights):
        kernel = partial(block_kernel, n_head=n_head, tq=tq)

        def wspec(shape):
            if single_buffer_weights:
                # constant block index -> the default double buffer is pure VMEM waste
                return pl.BlockSpec(shape, lambda b, qi: (0, 0),
                                    pipeline_mode=pl.Buffered(1))
            return pl.BlockSpec(shape, lambda b, qi: (0, 0))

        return pl.pallas_call(
            kernel,
            out_shape=jax.ShapeDtypeStruct((B, T, C), x.dtype),
            grid=(B, nq),
            in_specs=[
                pl.BlockSpec((None, T, C), lambda b, qi: (b, 0, 0)),  # full row of x
                pl.BlockSpec((1, C), lambda b, qi: (0, 0)),           # attention_norm
                wspec((C, 3 * C)),                                    # c_attn (pre-T)
                wspec((C, C)),                                        # c_proj (pre-T)
                pl.BlockSpec((1, C), lambda b, qi: (0, 0)),           # ffn_norm
                wspec((C, 4 * C)),                                    # w1 (pre-T)
                wspec((4 * C, C)),                                    # w2 (pre-T)
            ],
            out_specs=pl.BlockSpec((None, tq, C), lambda b, qi: (b, qi, 0)),
            scratch_shapes=[
                pltpu.VMEM((T, C), jnp.bfloat16),   # K, persistent across q-tiles
                pltpu.VMEM((T, C), jnp.bfloat16),   # V, persistent across q-tiles
                pltpu.VMEM((tq, C), jnp.bfloat16),  # per-head assembled attn output
            ],
            compiler_params=pltpu.CompilerParams(
                # batch axis feeds megacore; q-tile axis shares K/V scratch -> arbitrary
                dimension_semantics=("parallel", "arbitrary"),
                vmem_limit_bytes=vmem_limit,
            ),
        )

    args = (x, anw32, wqkvT, wprojT, fnw32, w1T, w2T)
    try:
        return build(True)(*args)
    except Exception:
        # pipeline_mode=pl.Buffered(1) unsupported in this JAX build -> plain specs
        return build(False)(*args)


# ---------------- pure-JAX reference (f32, matches the PyTorch module) ----------------
def block_reference(x, params, *, n_head):
    anw, wqkv, wproj, fnw, w1, w2 = params
    B, T, C = x.shape
    hd = C // n_head

    def rmsnorm(v, w):
        return v * lax.rsqrt(jnp.mean(v * v, -1, keepdims=True) + EPS) * w

    h = rmsnorm(x, anw[0])
    qkv = h @ wqkv.T
    q, k, v = jnp.split(qkv, 3, axis=-1)
    q = q.reshape(B, T, n_head, hd).transpose(0, 2, 1, 3)
    k = k.reshape(B, T, n_head, hd).transpose(0, 2, 1, 3)
    v = v.reshape(B, T, n_head, hd).transpose(0, 2, 1, 3)
    s = jnp.einsum("bhqd,bhkd->bhqk", q, k) / math.sqrt(hd)
    mask = jnp.tril(jnp.ones((T, T), dtype=bool))
    s = jnp.where(mask, s, -1e30)
    p = jax.nn.softmax(s, axis=-1)
    y = jnp.einsum("bhqk,bhkd->bhqd", p, v).transpose(0, 2, 1, 3).reshape(B, T, C)
    x = x + y @ wproj.T

    h2 = rmsnorm(x, fnw[0])
    a = h2 @ w1.T
    a = a * jax.nn.sigmoid(a)
    return x + a @ w2.T


if __name__ == "__main__":
    def make_inputs(B, T, C, key):
        kx, k1, k2, k3, k4 = jax.random.split(key, 5)
        x = jax.random.normal(kx, (B, T, C), dtype=jnp.float32)
        init = lambda k, s: (0.02 * jax.random.normal(k, s)).astype(jnp.float32)
        params = (
            jnp.ones((1, C), jnp.float32),          # attention_norm.weight
            init(k1, (3 * C, C)),                   # c_attn.weight
            init(k2, (C, C)),                       # c_proj.weight
            jnp.ones((1, C), jnp.float32),          # ffn_norm.weight
            init(k3, (4 * C, C)),                   # w1.weight
            init(k4, (C, 4 * C)),                   # w2.weight
        )
        return x, params

    key = jax.random.PRNGKey(0)
    k_a, k_b = jax.random.split(key, 2)

    # Primary small config: batch=2, seq=8, n_embd=32, n_head=4, dropout=0 (eval)
    x, params = make_inputs(2, 8, 32, k_a)
    out = jax.block_until_ready(block_forward(x, params, n_head=4))
    ref = block_reference(x, params, n_head=4)
    # bf16 MXU inputs (f32 accumulation) + approx reciprocal -> loose tolerance
    assert jnp.allclose(out, ref, atol=2e-2, rtol=2e-2), "mismatch (single q-tile)"

    # Exercise the multi-q-tile / online-softmax / causal-tile-skip path.
    x2, params2 = make_inputs(2, 32, 32, k_b)
    out2 = jax.block_until_ready(block_forward(x2, params2, n_head=4, max_q_tile=8))
    ref2 = block_reference(x2, params2, n_head=4)
    assert jnp.allclose(out2, ref2, atol=2e-2, rtol=2e-2), "mismatch (multi q-tile)"

    print("KERNEL_OK")
</pallas_src>

<mosaic_0001>
module attributes {stable_mosaic.version = 11 : i64} {
  func.func @block_kernel(%arg0: i32, %arg1: i32, %arg2: memref<1x8x32xf32, #tpu.memory_space<vmem>>, %arg3: memref<1x32xf32, #tpu.memory_space<vmem>>, %arg4: memref<32x96xbf16, #tpu.memory_space<vmem>>, %arg5: memref<32x32xbf16, #tpu.memory_space<vmem>>, %arg6: memref<1x32xf32, #tpu.memory_space<vmem>>, %arg7: memref<32x128xbf16, #tpu.memory_space<vmem>>, %arg8: memref<128x32xbf16, #tpu.memory_space<vmem>>, %arg9: memref<1x8x32xf32, #tpu.memory_space<vmem>>, %arg10: memref<8x32xbf16, #tpu.memory_space<vmem>>, %arg11: memref<8x32xbf16, #tpu.memory_space<vmem>>, %arg12: memref<8x32xbf16, #tpu.memory_space<vmem>>) attributes {dimension_semantics = [#tpu.dimension_semantics<parallel>, #tpu.dimension_semantics<arbitrary>], iteration_bounds = array<i64: 2, 1>, scalar_prefetch = 0 : i64, scratch_operands = 3 : i64, tpu.core_type = #tpu.core_type<tc>, window_params = [{transform_indices = @transform_0, window_bounds = array<i64: 1, 8, 32>}, {pipeline_mode = #tpu.pipeline_mode<synchronous>, transform_indices = @transform_1, window_bounds = array<i64: 1, 32>}, {pipeline_mode = #tpu.pipeline_mode<synchronous>, transform_indices = @transform_2, window_bounds = array<i64: 32, 96>}, {pipeline_mode = #tpu.pipeline_mode<synchronous>, transform_indices = @transform_3, window_bounds = array<i64: 32, 32>}, {pipeline_mode = #tpu.pipeline_mode<synchronous>, transform_indices = @transform_4, window_bounds = array<i64: 1, 32>}, {pipeline_mode = #tpu.pipeline_mode<synchronous>, transform_indices = @transform_5, window_bounds = array<i64: 32, 128>}, {pipeline_mode = #tpu.pipeline_mode<synchronous>, transform_indices = @transform_6, window_bounds = array<i64: 128, 32>}, {transform_indices = @transform_7, window_bounds = array<i64: 1, 8, 32>}]} {
    %c0 = arith.constant 0 : index
    %c0_0 = arith.constant 0 : index
    %0 = vector.load %arg3[%c0, %c0_0] : memref<1x32xf32, #tpu.memory_space<vmem>>, vector<1x32xf32>
    %c0_1 = arith.constant 0 : index
    %c0_2 = arith.constant 0 : index
    %1 = vector.load %arg6[%c0_1, %c0_2] : memref<1x32xf32, #tpu.memory_space<vmem>>, vector<1x32xf32>
    %c0_i32 = arith.constant 0 : i32
    %2 = arith.cmpi eq, %arg1, %c0_i32 : i32
    %3 = arith.extui %2 : i1 to i32
    %c0_i32_3 = arith.constant 0 : i32
    %4 = arith.cmpi ne, %3, %c0_i32_3 : i32
    scf.if %4 {
      %c0_55 = arith.constant 0 : index
      %c0_56 = arith.constant 0 : index
      %c0_57 = arith.constant 0 : index
      %111 = vector.load %arg2[%c0_55, %c0_56, %c0_57] : memref<1x8x32xf32, #tpu.memory_space<vmem>>, vector<1x8x32xf32>
      %112 = vector.shape_cast %111 : vector<1x8x32xf32> to vector<8x32xf32>
      %113 = arith.mulf %112, %112 : vector<8x32xf32>
      %cst_58 = arith.constant dense<0.000000e+00> : vector<8xf32>
      %114 = vector.multi_reduction <add>, %113, %cst_58 [1] : vector<8x32xf32> to vector<8xf32>
      %115 = vector.shape_cast %114 : vector<8xf32> to vector<8x1xf32>
      %cst_59 = arith.constant 3.200000e+01 : f32
      %116 = vector.broadcast %cst_59 : f32 to vector<8x1xf32>
      %117 = arith.divf %115, %116 : vector<8x1xf32>
      %cst_60 = arith.constant 1.1920929E-7 : f32
      %118 = vector.broadcast %cst_60 : f32 to vector<8x1xf32>
      %119 = arith.addf %117, %118 : vector<8x1xf32>
      %120 = math.rsqrt %119 : vector<8x1xf32>
      %121 = vector.broadcast %120 : vector<8x1xf32> to vector<8x32xf32>
      %122 = arith.mulf %112, %121 : vector<8x32xf32>
      %123 = vector.broadcast %0 : vector<1x32xf32> to vector<8x32xf32>
      %124 = arith.mulf %122, %123 : vector<8x32xf32>
      %125 = arith.truncf %124 : vector<8x32xf32> to vector<8x32xbf16>
      %c0_61 = arith.constant 0 : index
      %c32 = arith.constant 32 : index
      %126 = vector.load %arg4[%c0_61, %c32] : memref<32x96xbf16, #tpu.memory_space<vmem>>, vector<32x32xbf16>
      %cst_62 = arith.constant dense<0.000000e+00> : vector<8x32xf32>
      %127 = tpu.matmul %125, %126, %cst_62 {dimension_numbers = #tpu.dot_dimension_numbers<[1], [0], [0], [1], [0, 0, 1, 1], [], []>} : vector<8x32xbf16>, vector<32x32xbf16>, vector<8x32xf32> -> vector<8x32xf32>
      %128 = arith.truncf %127 : vector<8x32xf32> to vector<8x32xbf16>
      %c0_63 = arith.constant 0 : index
      %c0_64 = arith.constant 0 : index
      %129 = vector.load %arg10[%c0_63, %c0_64] : memref<8x32xbf16, #tpu.memory_space<vmem>>, vector<8x32xbf16>
      tpu.vector_store %arg10[%c0_63, %c0_64], %128 {strides = array<i32>} : memref<8x32xbf16, #tpu.memory_space<vmem>>, vector<8x32xbf16>,
      %c0_65 = arith.constant 0 : index
      %c64 = arith.constant 64 : index
      %130 = vector.load %arg4[%c0_65, %c64] : memref<32x96xbf16, #tpu.memory_space<vmem>>, vector<32x32xbf16>
      %cst_66 = arith.constant dense<0.000000e+00> : vector<8x32xf32>
      %131 = tpu.matmul %125, %130, %cst_66 {dimension_numbers = #tpu.dot_dimension_numbers<[1], [0], [0], [1], [0, 0, 1, 1], [], []>} : vector<8x32xbf16>, vector<32x32xbf16>, vector<8x32xf32> -> vector<8x32xf32>
      %132 = arith.truncf %131 : vector<8x32xf32> to vector<8x32xbf16>
      %c0_67 = arith.constant 0 : index
      %c0_68 = arith.constant 0 : index
      %133 = vector.load %arg11[%c0_67, %c0_68] : memref<8x32xbf16, #tpu.memory_space<vmem>>, vector<8x32xbf16>
      tpu.vector_store %arg11[%c0_67, %c0_68], %132 {strides = array<i32>} : memref<8x32xbf16, #tpu.memory_space<vmem>>, vector<8x32xbf16>,
    } else {
    }
    %c8_i32 = arith.constant 8 : i32
    %5 = arith.muli %arg1, %c8_i32 : i32
    %6 = tpu.assume_multiple %5, 8 : i32
    %c0_4 = arith.constant 0 : index
    %7 = arith.index_cast %6 : i32 to index
    %c0_5 = arith.constant 0 : index
    %8 = vector.load %arg2[%c0_4, %7, %c0_5] : memref<1x8x32xf32, #tpu.memory_space<vmem>>, vector<1x8x32xf32>
    %9 = vector.shape_cast %8 : vector<1x8x32xf32> to vector<8x32xf32>
    %10 = arith.mulf %9, %9 : vector<8x32xf32>
    %cst = arith.constant dense<0.000000e+00> : vector<8xf32>
    %11 = vector.multi_reduction <add>, %10, %cst [1] : vector<8x32xf32> to vector<8xf32>
    %12 = vector.shape_cast %11 : vector<8xf32> to vector<8x1xf32>
    %cst_6 = arith.constant 3.200000e+01 : f32
    %13 = vector.broadcast %cst_6 : f32 to vector<8x1xf32>
    %14 = arith.divf %12, %13 : vector<8x1xf32>
    %cst_7 = arith.constant 1.1920929E-7 : f32
    %15 = vector.broadcast %cst_7 : f32 to vector<8x1xf32>
    %16 = arith.addf %14, %15 : vector<8x1xf32>
    %17 = math.rsqrt %16 : vector<8x1xf32>
    %18 = vector.broadcast %17 : vector<8x1xf32> to vector<8x32xf32>
    %19 = arith.mulf %9, %18 : vector<8x32xf32>
    %20 = vector.broadcast %0 : vector<1x32xf32> to vector<8x32xf32>
    %21 = arith.mulf %19, %20 : vector<8x32xf32>
    %22 = arith.truncf %21 : vector<8x32xf32> to vector<8x32xbf16>
    %c0_8 = arith.constant 0 : index
    %c0_9 = arith.constant 0 : index
    %23 = vector.load %arg4[%c0_8, %c0_9] : memref<32x96xbf16, #tpu.memory_space<vmem>>, vector<32x32xbf16>
    %cst_10 = arith.constant dense<0.000000e+00> : vector<8x32xf32>
    %24 = tpu.matmul %22, %23, %cst_10 {dimension_numbers = #tpu.dot_dimension_numbers<[1], [0], [0], [1], [0, 0, 1, 1], [], []>} : vector<8x32xbf16>, vector<32x32xbf16>, vector<8x32xf32> -> vector<8x32xf32>
    %25 = arith.truncf %24 : vector<8x32xf32> to vector<8x32xbf16>
    %26 = tpu.iota {dimensions = array<i32: 0>} : vector<8x8xi32>
    %27 = tpu.iota {dimensions = array<i32: 1>} : vector<8x8xi32>
    %c1_i32 = arith.constant 1 : i32
    %28 = arith.addi %arg1, %c1_i32 : i32
    %29 = vector.extract_strided_slice %25 {offsets = [0, 0], sizes = [8, 8], strides = [1, 1]} : vector<8x32xbf16> to vector<8x8xbf16>
    %cst_11 = arith.constant 0xFF800000 : f32
    %30 = vector.broadcast %cst_11 : f32 to vector<8x1xf32>
    %cst_12 = arith.constant 0.000000e+00 : f32
    %31 = vector.broadcast %cst_12 : f32 to vector<8x1xf32>
    %cst_13 = arith.constant 0.000000e+00 : f32
    %32 = vector.broadcast %cst_13 : f32 to vector<8x8xf32>
    %c0_i32_14 = arith.constant 0 : i32
    %33 = arith.subi %28, %c0_i32_14 : i32
    %34 = arith.addi %c0_i32_14, %33 : i32
    %c1_i32_15 = arith.constant 1 : i32
    %35:3 = scf.for %arg13 = %c0_i32_14 to %34 step %c1_i32_15 iter_args(%arg14 = %30, %arg15 = %31, %arg16 = %32) -> (vector<8x1xf32>, vector<8x1xf32>, vector<8x8xf32>)  : i32 {
      %c8_i32_55 = arith.constant 8 : i32
      %111 = arith.muli %arg13, %c8_i32_55 : i32
      %112 = tpu.assume_multiple %111, 8 : i32
      %113 = arith.index_cast %112 : i32 to index
      %c0_56 = arith.constant 0 : index
      %114 = vector.load %arg10[%113, %c0_56] : memref<8x32xbf16, #tpu.memory_space<vmem>>, vector<8x8xbf16>
      %115 = arith.index_cast %112 : i32 to index
      %c0_57 = arith.constant 0 : index
      %116 = vector.load %arg11[%115, %c0_57] : memref<8x32xbf16, #tpu.memory_space<vmem>>, vector<8x8xbf16>
      %cst_58 = arith.constant dense<0.000000e+00> : vector<8x8xf32>
      %117 = tpu.matmul %29, %114, %cst_58 {dimension_numbers = #tpu.dot_dimension_numbers<[1], [1], [0], [0], [0, 0, 1, 0], [], []>} : vector<8x8xbf16>, vector<8x8xbf16>, vector<8x8xf32> -> vector<8x8xf32>
      %118 = vector.broadcast %6 : i32 to vector<8x8xi32>
      %119 = arith.addi %118, %26 : vector<8x8xi32>
      %120 = vector.broadcast %112 : i32 to vector<8x8xi32>
      %121 = arith.addi %120, %27 : vector<8x8xi32>
      %122 = arith.cmpi sge, %119, %121 : vector<8x8xi32>
      %cst_59 = arith.constant -1.000000e+30 : f32
      %123 = vector.broadcast %cst_59 : f32 to vector<8x8xf32>
      %124 = arith.select %122, %117, %123 : vector<8x8xi1>, vector<8x8xf32>
      %cst_60 = arith.constant dense<0xFF800000> : vector<8xf32>
      %125 = vector.multi_reduction <maximumf>, %124, %cst_60 [1] : vector<8x8xf32> to vector<8xf32>
      %126 = vector.shape_cast %125 : vector<8xf32> to vector<8x1xf32>
      %127 = arith.maximumf %arg14, %126 : vector<8x1xf32>
      %128 = vector.broadcast %127 : vector<8x1xf32> to vector<8x8xf32>
      %129 = arith.subf %124, %128 : vector<8x8xf32>
      %130 = math.exp %129 : vector<8x8xf32>
      %131 = arith.subf %arg14, %127 : vector<8x1xf32>
      %132 = math.exp %131 : vector<8x1xf32>
      %133 = arith.mulf %132, %arg15 : vector<8x1xf32>
      %cst_61 = arith.constant dense<0.000000e+00> : vector<8xf32>
      %134 = vector.multi_reduction <add>, %130, %cst_61 [1] : vector<8x8xf32> to vector<8xf32>
      %135 = vector.shape_cast %134 : vector<8xf32> to vector<8x1xf32>
      %136 = arith.addf %133, %135 : vector<8x1xf32>
      %137 = vector.broadcast %132 : vector<8x1xf32> to vector<8x8xf32>
      %138 = arith.mulf %137, %arg16 : vector<8x8xf32>
      %139 = arith.truncf %130 : vector<8x8xf32> to vector<8x8xbf16>
      %cst_62 = arith.constant dense<0.000000e+00> : vector<8x8xf32>
      %140 = tpu.matmul %139, %116, %cst_62 {dimension_numbers = #tpu.dot_dimension_numbers<[1], [0], [0], [1], [0, 0, 1, 1], [], []>} : vector<8x8xbf16>, vector<8x8xbf16>, vector<8x8xf32> -> vector<8x8xf32>
      %141 = arith.addf %138, %140 : vector<8x8xf32>
      scf.yield %127, %136, %141 : vector<8x1xf32>, vector<8x1xf32>, vector<8x8xf32>
    }
    %36 = tpu.reciprocal %35#1 {approx = true} : vector<8x1xf32> -> vector<8x1xf32>
    %37 = vector.broadcast %36 : vector<8x1xf32> to vector<8x8xf32>
    %38 = arith.mulf %35#2, %37 : vector<8x8xf32>
    %39 = arith.truncf %38 : vector<8x8xf32> to vector<8x8xbf16>
    %c0_16 = arith.constant 0 : index
    %c0_17 = arith.constant 0 : index
    %40 = vector.load %arg12[%c0_16, %c0_17] : memref<8x32xbf16, #tpu.memory_space<vmem>>, vector<8x8xbf16>
    tpu.vector_store %arg12[%c0_16, %c0_17], %39 {strides = array<i32>} : memref<8x32xbf16, #tpu.memory_space<vmem>>, vector<8x8xbf16>,
    %41 = vector.extract_strided_slice %25 {offsets = [0, 8], sizes = [8, 8], strides = [1, 1]} : vector<8x32xbf16> to vector<8x8xbf16>
    %cst_18 = arith.constant 0xFF800000 : f32
    %42 = vector.broadcast %cst_18 : f32 to vector<8x1xf32>
    %cst_19 = arith.constant 0.000000e+00 : f32
    %43 = vector.broadcast %cst_19 : f32 to vector<8x1xf32>
    %cst_20 = arith.constant 0.000000e+00 : f32
    %44 = vector.broadcast %cst_20 : f32 to vector<8x8xf32>
    %c0_i32_21 = arith.constant 0 : i32
    %45 = arith.subi %28, %c0_i32_21 : i32
    %46 = arith.addi %c0_i32_21, %45 : i32
    %c1_i32_22 = arith.constant 1 : i32
    %47:3 = scf.for %arg13 = %c0_i32_21 to %46 step %c1_i32_22 iter_args(%arg14 = %42, %arg15 = %43, %arg16 = %44) -> (vector<8x1xf32>, vector<8x1xf32>, vector<8x8xf32>)  : i32 {
      %c8_i32_55 = arith.constant 8 : i32
      %111 = arith.muli %arg13, %c8_i32_55 : i32
      %112 = tpu.assume_multiple %111, 8 : i32
      %113 = arith.index_cast %112 : i32 to index
      %c8_56 = arith.constant 8 : index
      %114 = vector.load %arg10[%113, %c8_56] : memref<8x32xbf16, #tpu.memory_space<vmem>>, vector<8x8xbf16>
      %115 = arith.index_cast %112 : i32 to index
      %c8_57 = arith.constant 8 : index
      %116 = vector.load %arg11[%115, %c8_57] : memref<8x32xbf16, #tpu.memory_space<vmem>>, vector<8x8xbf16>
      %cst_58 = arith.constant dense<0.000000e+00> : vector<8x8xf32>
      %117 = tpu.matmul %41, %114, %cst_58 {dimension_numbers = #tpu.dot_dimension_numbers<[1], [1], [0], [0], [0, 0, 1, 0], [], []>} : vector<8x8xbf16>, vector<8x8xbf16>, vector<8x8xf32> -> vector<8x8xf32>
      %118 = vector.broadcast %6 : i32 to vector<8x8xi32>
      %119 = arith.addi %118, %26 : vector<8x8xi32>
      %120 = vector.broadcast %112 : i32 to vector<8x8xi32>
      %121 = arith.addi %120, %27 : vector<8x8xi32>
      %122 = arith.cmpi sge, %119, %121 : vector<8x8xi32>
      %cst_59 = arith.constant -1.000000e+30 : f32
      %123 = vector.broadcast %cst_59 : f32 to vector<8x8xf32>
      %124 = arith.select %122, %117, %123 : vector<8x8xi1>, vector<8x8xf32>
      %cst_60 = arith.constant dense<0xFF800000> : vector<8xf32>
      %125 = vector.multi_reduction <maximumf>, %124, %cst_60 [1] : vector<8x8xf32> to vector<8xf32>
      %126 = vector.shape_cast %125 : vector<8xf32> to vector<8x1xf32>
      %127 = arith.maximumf %arg14, %126 : vector<8x1xf32>
      %128 = vector.broadcast %127 : vector<8x1xf32> to vector<8x8xf32>
      %129 = arith.subf %124, %128 : vector<8x8xf32>
      %130 = math.exp %129 : vector<8x8xf32>
      %131 = arith.subf %arg14, %127 : vector<8x1xf32>
      %132 = math.exp %131 : vector<8x1xf32>
      %133 = arith.mulf %132, %arg15 : vector<8x1xf32>
      %cst_61 = arith.constant dense<0.000000e+00> : vector<8xf32>
      %134 = vector.multi_reduction <add>, %130, %cst_61 [1] : vector<8x8xf32> to vector<8xf32>
      %135 = vector.shape_cast %134 : vector<8xf32> to vector<8x1xf32>
      %136 = arith.addf %133, %135 : vector<8x1xf32>
      %137 = vector.broadcast %132 : vector<8x1xf32> to vector<8x8xf32>
      %138 = arith.mulf %137, %arg16 : vector<8x8xf32>
      %139 = arith.truncf %130 : vector<8x8xf32> to vector<8x8xbf16>
      %cst_62 = arith.constant dense<0.000000e+00> : vector<8x8xf32>
      %140 = tpu.matmul %139, %116, %cst_62 {dimension_numbers = #tpu.dot_dimension_numbers<[1], [0], [0], [1], [0, 0, 1, 1], [], []>} : vector<8x8xbf16>, vector<8x8xbf16>, vector<8x8xf32> -> vector<8x8xf32>
      %141 = arith.addf %138, %140 : vector<8x8xf32>
      scf.yield %127, %136, %141 : vector<8x1xf32>, vector<8x1xf32>, vector<8x8xf32>
    }
    %48 = tpu.reciprocal %47#1 {approx = true} : vector<8x1xf32> -> vector<8x1xf32>
    %49 = vector.broadcast %48 : vector<8x1xf32> to vector<8x8xf32>
    %50 = arith.mulf %47#2, %49 : vector<8x8xf32>
    %51 = arith.truncf %50 : vector<8x8xf32> to vector<8x8xbf16>
    %c0_23 = arith.constant 0 : index
    %c8 = arith.constant 8 : index
    %52 = vector.load %arg12[%c0_23, %c8] : memref<8x32xbf16, #tpu.memory_space<vmem>>, vector<8x8xbf16>
    tpu.vector_store %arg12[%c0_23, %c8], %51 {strides = array<i32>} : memref<8x32xbf16, #tpu.memory_space<vmem>>, vector<8x8xbf16>,
    %53 = vector.extract_strided_slice %25 {offsets = [0, 16], sizes = [8, 8], strides = [1, 1]} : vector<8x32xbf16> to vector<8x8xbf16>
    %cst_24 = arith.constant 0xFF800000 : f32
    %54 = vector.broadcast %cst_24 : f32 to vector<8x1xf32>
    %cst_25 = arith.constant 0.000000e+00 : f32
    %55 = vector.broadcast %cst_25 : f32 to vector<8x1xf32>
    %cst_26 = arith.constant 0.000000e+00 : f32
    %56 = vector.broadcast %cst_26 : f32 to vector<8x8xf32>
    %c0_i32_27 = arith.constant 0 : i32
    %57 = arith.subi %28, %c0_i32_27 : i32
    %58 = arith.addi %c0_i32_27, %57 : i32
    %c1_i32_28 = arith.constant 1 : i32
    %59:3 = scf.for %arg13 = %c0_i32_27 to %58 step %c1_i32_28 iter_args(%arg14 = %54, %arg15 = %55, %arg16 = %56) -> (vector<8x1xf32>, vector<8x1xf32>, vector<8x8xf32>)  : i32 {
      %c8_i32_55 = arith.constant 8 : i32
      %111 = arith.muli %arg13, %c8_i32_55 : i32
      %112 = tpu.assume_multiple %111, 8 : i32
      %113 = arith.index_cast %112 : i32 to index
      %c16_56 = arith.constant 16 : index
      %114 = vector.load %arg10[%113, %c16_56] : memref<8x32xbf16, #tpu.memory_space<vmem>>, vector<8x8xbf16>
      %115 = arith.index_cast %112 : i32 to index
      %c16_57 = arith.constant 16 : index
      %116 = vector.load %arg11[%115, %c16_57] : memref<8x32xbf16, #tpu.memory_space<vmem>>, vector<8x8xbf16>
      %cst_58 = arith.constant dense<0.000000e+00> : vector<8x8xf32>
      %117 = tpu.matmul %53, %114, %cst_58 {dimension_numbers = #tpu.dot_dimension_numbers<[1], [1], [0], [0], [0, 0, 1, 0], [], []>} : vector<8x8xbf16>, vector<8x8xbf16>, vector<8x8xf32> -> vector<8x8xf32>
      %118 = vector.broadcast %6 : i32 to vector<8x8xi32>
      %119 = arith.addi %118, %26 : vector<8x8xi32>
      %120 = vector.broadcast %112 : i32 to vector<8x8xi32>
      %121 = arith.addi %120, %27 : vector<8x8xi32>
      %122 = arith.cmpi sge, %119, %121 : vector<8x8xi32>
      %cst_59 = arith.constant -1.000000e+30 : f32
      %123 = vector.broadcast %cst_59 : f32 to vector<8x8xf32>
      %124 = arith.select %122, %117, %123 : vector<8x8xi1>, vector<8x8xf32>
      %cst_60 = arith.constant dense<0xFF800000> : vector<8xf32>
      %125 = vector.multi_reduction <maximumf>, %124, %cst_60 [1] : vector<8x8xf32> to vector<8xf32>
      %126 = vector.shape_cast %125 : vector<8xf32> to vector<8x1xf32>
      %127 = arith.maximumf %arg14, %126 : vector<8x1xf32>
      %128 = vector.broadcast %127 : vector<8x1xf32> to vector<8x8xf32>
      %129 = arith.subf %124, %128 : vector<8x8xf32>
      %130 = math.exp %129 : vector<8x8xf32>
      %131 = arith.subf %arg14, %127 : vector<8x1xf32>
      %132 = math.exp %131 : vector<8x1xf32>
      %133 = arith.mulf %132, %arg15 : vector<8x1xf32>
      %cst_61 = arith.constant dense<0.000000e+00> : vector<8xf32>
      %134 = vector.multi_reduction <add>, %130, %cst_61 [1] : vector<8x8xf32> to vector<8xf32>
      %135 = vector.shape_cast %134 : vector<8xf32> to vector<8x1xf32>
      %136 = arith.addf %133, %135 : vector<8x1xf32>
      %137 = vector.broadcast %132 : vector<8x1xf32> to vector<8x8xf32>
      %138 = arith.mulf %137, %arg16 : vector<8x8xf32>
      %139 = arith.truncf %130 : vector<8x8xf32> to vector<8x8xbf16>
      %cst_62 = arith.constant dense<0.000000e+00> : vector<8x8xf32>
      %140 = tpu.matmul %139, %116, %cst_62 {dimension_numbers = #tpu.dot_dimension_numbers<[1], [0], [0], [1], [0, 0, 1, 1], [], []>} : vector<8x8xbf16>, vector<8x8xbf16>, vector<8x8xf32> -> vector<8x8xf32>
      %141 = arith.addf %138, %140 : vector<8x8xf32>
      scf.yield %127, %136, %141 : vector<8x1xf32>, vector<8x1xf32>, vector<8x8xf32>
    }
    %60 = tpu.reciprocal %59#1 {approx = true} : vector<8x1xf32> -> vector<8x1xf32>
    %61 = vector.broadcast %60 : vector<8x1xf32> to vector<8x8xf32>
    %62 = arith.mulf %59#2, %61 : vector<8x8xf32>
    %63 = arith.truncf %62 : vector<8x8xf32> to vector<8x8xbf16>
    %c0_29 = arith.constant 0 : index
    %c16 = arith.constant 16 : index
    %64 = vector.load %arg12[%c0_29, %c16] : memref<8x32xbf16, #tpu.memory_space<vmem>>, vector<8x8xbf16>
    tpu.vector_store %arg12[%c0_29, %c16], %63 {strides = array<i32>} : memref<8x32xbf16, #tpu.memory_space<vmem>>, vector<8x8xbf16>,
    %65 = vector.extract_strided_slice %25 {offsets = [0, 24], sizes = [8, 8], strides = [1, 1]} : vector<8x32xbf16> to vector<8x8xbf16>
    %cst_30 = arith.constant 0xFF800000 : f32
    %66 = vector.broadcast %cst_30 : f32 to vector<8x1xf32>
    %cst_31 = arith.constant 0.000000e+00 : f32
    %67 = vector.broadcast %cst_31 : f32 to vector<8x1xf32>
    %cst_32 = arith.constant 0.000000e+00 : f32
    %68 = vector.broadcast %cst_32 : f32 to vector<8x8xf32>
    %c0_i32_33 = arith.constant 0 : i32
    %69 = arith.subi %28, %c0_i32_33 : i32
    %70 = arith.addi %c0_i32_33, %69 : i32
    %c1_i32_34 = arith.constant 1 : i32
    %71:3 = scf.for %arg13 = %c0_i32_33 to %70 step %c1_i32_34 iter_args(%arg14 = %66, %arg15 = %67, %arg16 = %68) -> (vector<8x1xf32>, vector<8x1xf32>, vector<8x8xf32>)  : i32 {
      %c8_i32_55 = arith.constant 8 : i32
      %111 = arith.muli %arg13, %c8_i32_55 : i32
      %112 = tpu.assume_multiple %111, 8 : i32
      %113 = arith.index_cast %112 : i32 to index
      %c24_56 = arith.constant 24 : index
      %114 = vector.load %arg10[%113, %c24_56] : memref<8x32xbf16, #tpu.memory_space<vmem>>, vector<8x8xbf16>
      %115 = arith.index_cast %112 : i32 to index
      %c24_57 = arith.constant 24 : index
      %116 = vector.load %arg11[%115, %c24_57] : memref<8x32xbf16, #tpu.memory_space<vmem>>, vector<8x8xbf16>
      %cst_58 = arith.constant dense<0.000000e+00> : vector<8x8xf32>
      %117 = tpu.matmul %65, %114, %cst_58 {dimension_numbers = #tpu.dot_dimension_numbers<[1], [1], [0], [0], [0, 0, 1, 0], [], []>} : vector<8x8xbf16>, vector<8x8xbf16>, vector<8x8xf32> -> vector<8x8xf32>
      %118 = vector.broadcast %6 : i32 to vector<8x8xi32>
      %119 = arith.addi %118, %26 : vector<8x8xi32>
      %120 = vector.broadcast %112 : i32 to vector<8x8xi32>
      %121 = arith.addi %120, %27 : vector<8x8xi32>
      %122 = arith.cmpi sge, %119, %121 : vector<8x8xi32>
      %cst_59 = arith.constant -1.000000e+30 : f32
      %123 = vector.broadcast %cst_59 : f32 to vector<8x8xf32>
      %124 = arith.select %122, %117, %123 : vector<8x8xi1>, vector<8x8xf32>
      %cst_60 = arith.constant dense<0xFF800000> : vector<8xf32>
      %125 = vector.multi_reduction <maximumf>, %124, %cst_60 [1] : vector<8x8xf32> to vector<8xf32>
      %126 = vector.shape_cast %125 : vector<8xf32> to vector<8x1xf32>
      %127 = arith.maximumf %arg14, %126 : vector<8x1xf32>
      %128 = vector.broadcast %127 : vector<8x1xf32> to vector<8x8xf32>
      %129 = arith.subf %124, %128 : vector<8x8xf32>
      %130 = math.exp %129 : vector<8x8xf32>
      %131 = arith.subf %arg14, %127 : vector<8x1xf32>
      %132 = math.exp %131 : vector<8x1xf32>
      %133 = arith.mulf %132, %arg15 : vector<8x1xf32>
      %cst_61 = arith.constant dense<0.000000e+00> : vector<8xf32>
      %134 = vector.multi_reduction <add>, %130, %cst_61 [1] : vector<8x8xf32> to vector<8xf32>
      %135 = vector.shape_cast %134 : vector<8xf32> to vector<8x1xf32>
      %136 = arith.addf %133, %135 : vector<8x1xf32>
      %137 = vector.broadcast %132 : vector<8x1xf32> to vector<8x8xf32>
      %138 = arith.mulf %137, %arg16 : vector<8x8xf32>
      %139 = arith.truncf %130 : vector<8x8xf32> to vector<8x8xbf16>
      %cst_62 = arith.constant dense<0.000000e+00> : vector<8x8xf32>
      %140 = tpu.matmul %139, %116, %cst_62 {dimension_numbers = #tpu.dot_dimension_numbers<[1], [0], [0], [1], [0, 0, 1, 1], [], []>} : vector<8x8xbf16>, vector<8x8xbf16>, vector<8x8xf32> -> vector<8x8xf32>
      %141 = arith.addf %138, %140 : vector<8x8xf32>
      scf.yield %127, %136, %141 : vector<8x1xf32>, vector<8x1xf32>, vector<8x8xf32>
    }
    %72 = tpu.reciprocal %71#1 {approx = true} : vector<8x1xf32> -> vector<8x1xf32>
    %73 = vector.broadcast %72 : vector<8x1xf32> to vector<8x8xf32>
    %74 = arith.mulf %71#2, %73 : vector<8x8xf32>
    %75 = arith.truncf %74 : vector<8x8xf32> to vector<8x8xbf16>
    %c0_35 = arith.constant 0 : index
    %c24 = arith.constant 24 : index
    %76 = vector.load %arg12[%c0_35, %c24] : memref<8x32xbf16, #tpu.memory_space<vmem>>, vector<8x8xbf16>
    tpu.vector_store %arg12[%c0_35, %c24], %75 {strides = array<i32>} : memref<8x32xbf16, #tpu.memory_space<vmem>>, vector<8x8xbf16>,
    %c0_36 = arith.constant 0 : index
    %c0_37 = arith.constant 0 : index
    %77 = vector.load %arg12[%c0_36, %c0_37] : memref<8x32xbf16, #tpu.memory_space<vmem>>, vector<8x32xbf16>
    %c0_38 = arith.constant 0 : index
    %c0_39 = arith.constant 0 : index
    %78 = vector.load %arg5[%c0_38, %c0_39] : memref<32x32xbf16, #tpu.memory_space<vmem>>, vector<32x32xbf16>
    %cst_40 = arith.constant dense<0.000000e+00> : vector<8x32xf32>
    %79 = tpu.matmul %77, %78, %cst_40 {dimension_numbers = #tpu.dot_dimension_numbers<[1], [0], [0], [1], [0, 0, 1, 1], [], []>} : vector<8x32xbf16>, vector<32x32xbf16>, vector<8x32xf32> -> vector<8x32xf32>
    %80 = arith.addf %9, %79 : vector<8x32xf32>
    %81 = arith.mulf %80, %80 : vector<8x32xf32>
    %cst_41 = arith.constant dense<0.000000e+00> : vector<8xf32>
    %82 = vector.multi_reduction <add>, %81, %cst_41 [1] : vector<8x32xf32> to vector<8xf32>
    %83 = vector.shape_cast %82 : vector<8xf32> to vector<8x1xf32>
    %cst_42 = arith.constant 3.200000e+01 : f32
    %84 = vector.broadcast %cst_42 : f32 to vector<8x1xf32>
    %85 = arith.divf %83, %84 : vector<8x1xf32>
    %cst_43 = arith.constant 1.1920929E-7 : f32
    %86 = vector.broadcast %cst_43 : f32 to vector<8x1xf32>
    %87 = arith.addf %85, %86 : vector<8x1xf32>
    %88 = math.rsqrt %87 : vector<8x1xf32>
    %89 = vector.broadcast %88 : vector<8x1xf32> to vector<8x32xf32>
    %90 = arith.mulf %80, %89 : vector<8x32xf32>
    %91 = vector.broadcast %1 : vector<1x32xf32> to vector<8x32xf32>
    %92 = arith.mulf %90, %91 : vector<8x32xf32>
    %93 = arith.truncf %92 : vector<8x32xf32> to vector<8x32xbf16>
    %cst_44 = arith.constant 0.000000e+00 : f32
    %94 = vector.broadcast %cst_44 : f32 to vector<8x32xf32>
    %c0_45 = arith.constant 0 : index
    %c0_46 = arith.constant 0 : index
    %95 = vector.load %arg7[%c0_45, %c0_46] : memref<32x128xbf16, #tpu.memory_space<vmem>>, vector<32x128xbf16>
    %cst_47 = arith.constant dense<0.000000e+00> : vector<8x128xf32>
    %96 = tpu.matmul %93, %95, %cst_47 {dimension_numbers = #tpu.dot_dimension_numbers<[1], [0], [0], [1], [0, 0, 1, 1], [], []>} : vector<8x32xbf16>, vector<32x128xbf16>, vector<8x128xf32> -> vector<8x128xf32>
    %97 = arith.negf %96 : vector<8x128xf32>
    %98 = math.exp %97 : vector<8x128xf32>
    %cst_48 = arith.constant 1.000000e+00 : f32
    %99 = vector.broadcast %cst_48 : f32 to vector<8x128xf32>
    %100 = arith.addf %99, %98 : vector<8x128xf32>
    %101 = arith.divf %99, %100 : vector<8x128xf32>
    %102 = arith.mulf %96, %101 : vector<8x128xf32>
    %103 = arith.truncf %102 : vector<8x128xf32> to vector<8x128xbf16>
    %c0_49 = arith.constant 0 : index
    %c0_50 = arith.constant 0 : index
    %104 = vector.load %arg8[%c0_49, %c0_50] : memref<128x32xbf16, #tpu.memory_space<vmem>>, vector<128x32xbf16>
    %cst_51 = arith.constant dense<0.000000e+00> : vector<8x32xf32>
    %105 = tpu.matmul %103, %104, %cst_51 {dimension_numbers = #tpu.dot_dimension_numbers<[1], [0], [0], [1], [0, 0, 1, 1], [], []>} : vector<8x128xbf16>, vector<128x32xbf16>, vector<8x32xf32> -> vector<8x32xf32>
    %106 = arith.addf %94, %105 : vector<8x32xf32>
    %107 = arith.addf %80, %106 : vector<8x32xf32>
    %c0_52 = arith.constant 0 : index
    %c0_53 = arith.constant 0 : index
    %c0_54 = arith.constant 0 : index
    %108 = vector.load %arg9[%c0_52, %c0_53, %c0_54] : memref<1x8x32xf32, #tpu.memory_space<vmem>>, vector<1x8x32xf32>
    %109 = vector.shape_cast %108 : vector<1x8x32xf32> to vector<8x32xf32>
    %110 = vector.shape_cast %107 : vector<8x32xf32> to vector<1x8x32xf32>
    tpu.vector_store %arg9[%c0_52, %c0_53, %c0_54], %110 {strides = array<i32>} : memref<1x8x32xf32, #tpu.memory_space<vmem>>, vector<1x8x32xf32>,
    return
  }
  func.func @transform_0(%arg0: i32, %arg1: i32) -> (i32, i32, i32) {
    %c0_i32 = arith.constant 0 : i32
    %c0_i32_0 = arith.constant 0 : i32
    %c0_i32_1 = arith.constant 0 : i32
    return %arg0, %c0_i32, %c0_i32_0 : i32, i32, i32
  }
  func.func @transform_1(%arg0: i32, %arg1: i32) -> (i32, i32) {
    %c0_i32 = arith.constant 0 : i32
    %c0_i32_0 = arith.constant 0 : i32
    %c0_i32_1 = arith.constant 0 : i32
    return %c0_i32, %c0_i32_0 : i32, i32
  }
  func.func @transform_2(%arg0: i32, %arg1: i32) -> (i32, i32) {
    %c0_i32 = arith.constant 0 : i32
    %c0_i32_0 = arith.constant 0 : i32
    %c0_i32_1 = arith.constant 0 : i32
    return %c0_i32, %c0_i32_0 : i32, i32
  }
  func.func @transform_3(%arg0: i32, %arg1: i32) -> (i32, i32) {
    %c0_i32 = arith.constant 0 : i32
    %c0_i32_0 = arith.constant 0 : i32
    %c0_i32_1 = arith.constant 0 : i32
    return %c0_i32, %c0_i32_0 : i32, i32
  }
  func.func @transform_4(%arg0: i32, %arg1: i32) -> (i32, i32) {
    %c0_i32 = arith.constant 0 : i32
    %c0_i32_0 = arith.constant 0 : i32
    %c0_i32_1 = arith.constant 0 : i32
    return %c0_i32, %c0_i32_0 : i32, i32
  }
  func.func @transform_5(%arg0: i32, %arg1: i32) -> (i32, i32) {
    %c0_i32 = arith.constant 0 : i32
    %c0_i32_0 = arith.constant 0 : i32
    %c0_i32_1 = arith.constant 0 : i32
    return %c0_i32, %c0_i32_0 : i32, i32
  }
  func.func @transform_6(%arg0: i32, %arg1: i32) -> (i32, i32) {
    %c0_i32 = arith.constant 0 : i32
    %c0_i32_0 = arith.constant 0 : i32
    %c0_i32_1 = arith.constant 0 : i32
    return %c0_i32, %c0_i32_0 : i32, i32
  }
  func.func @transform_7(%arg0: i32, %arg1: i32) -> (i32, i32, i32) {
    %c0_i32 = arith.constant 0 : i32
    %c0_i32_0 = arith.constant 0 : i32
    return %arg0, %arg1, %c0_i32 : i32, i32, i32
  }
}

module attributes {stable_mosaic.version = 11 : i64} {
  func.func @block_kernel(%arg0: i32, %arg1: i32, %arg2: memref<1x8x32xf32, #tpu.memory_space<vmem>>, %arg3: memref<1x32xf32, #tpu.memory_space<vmem>>, %arg4: memref<32x96xbf16, #tpu.memory_space<vmem>>, %arg5: memref<32x32xbf16, #tpu.memory_space<vmem>>, %arg6: memref<1x32xf32, #tpu.memory_space<vmem>>, %arg7: memref<32x128xbf16, #tpu.memory_space<vmem>>, %arg8: memref<128x32xbf16, #tpu.memory_space<vmem>>, %arg9: memref<1x8x32xf32, #tpu.memory_space<vmem>>, %arg10: memref<8x32xbf16, #tpu.memory_space<vmem>>, %arg11: memref<8x32xbf16, #tpu.memory_space<vmem>>, %arg12: memref<8x32xbf16, #tpu.memory_space<vmem>>) attributes {dimension_semantics = [#tpu.dimension_semantics<parallel>, #tpu.dimension_semantics<arbitrary>], iteration_bounds = array<i64: 2, 1>, scalar_prefetch = 0 : i64, scratch_operands = 3 : i64, tpu.core_type = #tpu.core_type<tc>, window_params = [{transform_indices = @transform_0, window_bounds = array<i64: 1, 8, 32>}, {pipeline_mode = #tpu.pipeline_mode<synchronous>, transform_indices = @transform_1, window_bounds = array<i64: 1, 32>}, {pipeline_mode = #tpu.pipeline_mode<synchronous>, transform_indices = @transform_2, window_bounds = array<i64: 32, 96>}, {pipeline_mode = #tpu.pipeline_mode<synchronous>, transform_indices = @transform_3, window_bounds = array<i64: 32, 32>}, {pipeline_mode = #tpu.pipeline_mode<synchronous>, transform_indices = @transform_4, window_bounds = array<i64: 1, 32>}, {pipeline_mode = #tpu.pipeline_mode<synchronous>, transform_indices = @transform_5, window_bounds = array<i64: 32, 128>}, {pipeline_mode = #tpu.pipeline_mode<synchronous>, transform_indices = @transform_6, window_bounds = array<i64: 128, 32>}, {transform_indices = @transform_7, window_bounds = array<i64: 1, 8, 32>}]} {
    %c0 = arith.constant 0 : index
    %c0_0 = arith.constant 0 : index
    %0 = vector.load %arg3[%c0, %c0_0] : memref<1x32xf32, #tpu.memory_space<vmem>>, vector<1x32xf32>
    %c0_1 = arith.constant 0 : index
    %c0_2 = arith.constant 0 : index
    %1 = vector.load %arg6[%c0_1, %c0_2] : memref<1x32xf32, #tpu.memory_space<vmem>>, vector<1x32xf32>
    %c0_i32 = arith.constant 0 : i32
    %2 = arith.cmpi eq, %arg1, %c0_i32 : i32
    %3 = arith.extui %2 : i1 to i32
    %c0_i32_3 = arith.constant 0 : i32
    %4 = arith.cmpi ne, %3, %c0_i32_3 : i32
    scf.if %4 {
      %c0_55 = arith.constant 0 : index
      %c0_56 = arith.constant 0 : index
      %c0_57 = arith.constant 0 : index
      %111 = vector.load %arg2[%c0_55, %c0_56, %c0_57] : memref<1x8x32xf32, #tpu.memory_space<vmem>>, vector<1x8x32xf32>
      %112 = vector.shape_cast %111 : vector<1x8x32xf32> to vector<8x32xf32>
      %113 = arith.mulf %112, %112 : vector<8x32xf32>
      %cst_58 = arith.constant dense<0.000000e+00> : vector<8xf32>
      %114 = vector.multi_reduction <add>, %113, %cst_58 [1] : vector<8x32xf32> to vector<8xf32>
      %115 = vector.shape_cast %114 : vector<8xf32> to vector<8x1xf32>
      %cst_59 = arith.constant 3.200000e+01 : f32
      %116 = vector.broadcast %cst_59 : f32 to vector<8x1xf32>
      %117 = arith.divf %115, %116 : vector<8x1xf32>
      %cst_60 = arith.constant 1.1920929E-7 : f32
      %118 = vector.broadcast %cst_60 : f32 to vector<8x1xf32>
      %119 = arith.addf %117, %118 : vector<8x1xf32>
      %120 = math.rsqrt %119 : vector<8x1xf32>
      %121 = vector.broadcast %120 : vector<8x1xf32> to vector<8x32xf32>
      %122 = arith.mulf %112, %121 : vector<8x32xf32>
      %123 = vector.broadcast %0 : vector<1x32xf32> to vector<8x32xf32>
      %124 = arith.mulf %122, %123 : vector<8x32xf32>
      %125 = arith.truncf %124 : vector<8x32xf32> to vector<8x32xbf16>
      %c0_61 = arith.constant 0 : index
      %c32 = arith.constant 32 : index
      %126 = vector.load %arg4[%c0_61, %c32] : memref<32x96xbf16, #tpu.memory_space<vmem>>, vector<32x32xbf16>
      %cst_62 = arith.constant dense<0.000000e+00> : vector<8x32xf32>
      %127 = tpu.matmul %125, %126, %cst_62 {dimension_numbers = #tpu.dot_dimension_numbers<[1], [0], [0], [1], [0, 0, 1, 1], [], []>} : vector<8x32xbf16>, vector<32x32xbf16>, vector<8x32xf32> -> vector<8x32xf32>
      %128 = arith.truncf %127 : vector<8x32xf32> to vector<8x32xbf16>
      %c0_63 = arith.constant 0 : index
      %c0_64 = arith.constant 0 : index
      %129 = vector.load %arg10[%c0_63, %c0_64] : memref<8x32xbf16, #tpu.memory_space<vmem>>, vector<8x32xbf16>
      tpu.vector_store %arg10[%c0_63, %c0_64], %128 {strides = array<i32>} : memref<8x32xbf16, #tpu.memory_space<vmem>>, vector<8x32xbf16>,
      %c0_65 = arith.constant 0 : index
      %c64 = arith.constant 64 : index
      %130 = vector.load %arg4[%c0_65, %c64] : memref<32x96xbf16, #tpu.memory_space<vmem>>, vector<32x32xbf16>
      %cst_66 = arith.constant dense<0.000000e+00> : vector<8x32xf32>
      %131 = tpu.matmul %125, %130, %cst_66 {dimension_numbers = #tpu.dot_dimension_numbers<[1], [0], [0], [1], [0, 0, 1, 1], [], []>} : vector<8x32xbf16>, vector<32x32xbf16>, vector<8x32xf32> -> vector<8x32xf32>
      %132 = arith.truncf %131 : vector<8x32xf32> to vector<8x32xbf16>
      %c0_67 = arith.constant 0 : index
      %c0_68 = arith.constant 0 : index
      %133 = vector.load %arg11[%c0_67, %c0_68] : memref<8x32xbf16, #tpu.memory_space<vmem>>, vector<8x32xbf16>
      tpu.vector_store %arg11[%c0_67, %c0_68], %132 {strides = array<i32>} : memref<8x32xbf16, #tpu.memory_space<vmem>>, vector<8x32xbf16>,
    } else {
    }
    %c8_i32 = arith.constant 8 : i32
    %5 = arith.muli %arg1, %c8_i32 : i32
    %6 = tpu.assume_multiple %5, 8 : i32
    %c0_4 = arith.constant 0 : index
    %7 = arith.index_cast %6 : i32 to index
    %c0_5 = arith.constant 0 : index
    %8 = vector.load %arg2[%c0_4, %7, %c0_5] : memref<1x8x32xf32, #tpu.memory_space<vmem>>, vector<1x8x32xf32>
    %9 = vector.shape_cast %8 : vector<1x8x32xf32> to vector<8x32xf32>
    %10 = arith.mulf %9, %9 : vector<8x32xf32>
    %cst = arith.constant dense<0.000000e+00> : vector<8xf32>
    %11 = vector.multi_reduction <add>, %10, %cst [1] : vector<8x32xf32> to vector<8xf32>
    %12 = vector.shape_cast %11 : vector<8xf32> to vector<8x1xf32>
    %cst_6 = arith.constant 3.200000e+01 : f32
    %13 = vector.broadcast %cst_6 : f32 to vector<8x1xf32>
    %14 = arith.divf %12, %13 : vector<8x1xf32>
    %cst_7 = arith.constant 1.1920929E-7 : f32
    %15 = vector.broadcast %cst_7 : f32 to vector<8x1xf32>
    %16 = arith.addf %14, %15 : vector<8x1xf32>
    %17 = math.rsqrt %16 : vector<8x1xf32>
    %18 = vector.broadcast %17 : vector<8x1xf32> to vector<8x32xf32>
    %19 = arith.mulf %9, %18 : vector<8x32xf32>
    %20 = vector.broadcast %0 : vector<1x32xf32> to vector<8x32xf32>
    %21 = arith.mulf %19, %20 : vector<8x32xf32>
    %22 = arith.truncf %21 : vector<8x32xf32> to vector<8x32xbf16>
    %c0_8 = arith.constant 0 : index
    %c0_9 = arith.constant 0 : index
    %23 = vector.load %arg4[%c0_8, %c0_9] : memref<32x96xbf16, #tpu.memory_space<vmem>>, vector<32x32xbf16>
    %cst_10 = arith.constant dense<0.000000e+00> : vector<8x32xf32>
    %24 = tpu.matmul %22, %23, %cst_10 {dimension_numbers = #tpu.dot_dimension_numbers<[1], [0], [0], [1], [0, 0, 1, 1], [], []>} : vector<8x32xbf16>, vector<32x32xbf16>, vector<8x32xf32> -> vector<8x32xf32>
    %25 = arith.truncf %24 : vector<8x32xf32> to vector<8x32xbf16>
    %26 = tpu.iota {dimensions = array<i32: 0>} : vector<8x8xi32>
    %27 = tpu.iota {dimensions = array<i32: 1>} : vector<8x8xi32>
    %c1_i32 = arith.constant 1 : i32
    %28 = arith.addi %arg1, %c1_i32 : i32
    %29 = vector.extract_strided_slice %25 {offsets = [0, 0], sizes = [8, 8], strides = [1, 1]} : vector<8x32xbf16> to vector<8x8xbf16>
    %cst_11 = arith.constant 0xFF800000 : f32
    %30 = vector.broadcast %cst_11 : f32 to vector<8x1xf32>
    %cst_12 = arith.constant 0.000000e+00 : f32
    %31 = vector.broadcast %cst_12 : f32 to vector<8x1xf32>
    %cst_13 = arith.constant 0.000000e+00 : f32
    %32 = vector.broadcast %cst_13 : f32 to vector<8x8xf32>
    %c0_i32_14 = arith.constant 0 : i32
    %33 = arith.subi %28, %c0_i32_14 : i32
    %34 = arith.addi %c0_i32_14, %33 : i32
    %c1_i32_15 = arith.constant 1 : i32
    %35:3 = scf.for %arg13 = %c0_i32_14 to %34 step %c1_i32_15 iter_args(%arg14 = %30, %arg15 = %31, %arg16 = %32) -> (vector<8x1xf32>, vector<8x1xf32>, vector<8x8xf32>)  : i32 {
      %c8_i32_55 = arith.constant 8 : i32
      %111 = arith.muli %arg13, %c8_i32_55 : i32
      %112 = tpu.assume_multiple %111, 8 : i32
      %113 = arith.index_cast %112 : i32 to index
      %c0_56 = arith.constant 0 : index
      %114 = vector.load %arg10[%113, %c0_56] : memref<8x32xbf16, #tpu.memory_space<vmem>>, vector<8x8xbf16>
      %115 = arith.index_cast %112 : i32 to index
      %c0_57 = arith.constant 0 : index
      %116 = vector.load %arg11[%115, %c0_57] : memref<8x32xbf16, #tpu.memory_space<vmem>>, vector<8x8xbf16>
      %cst_58 = arith.constant dense<0.000000e+00> : vector<8x8xf32>
      %117 = tpu.matmul %29, %114, %cst_58 {dimension_numbers = #tpu.dot_dimension_numbers<[1], [1], [0], [0], [0, 0, 1, 0], [], []>} : vector<8x8xbf16>, vector<8x8xbf16>, vector<8x8xf32> -> vector<8x8xf32>
      %118 = vector.broadcast %6 : i32 to vector<8x8xi32>
      %119 = arith.addi %118, %26 : vector<8x8xi32>
      %120 = vector.broadcast %112 : i32 to vector<8x8xi32>
      %121 = arith.addi %120, %27 : vector<8x8xi32>
      %122 = arith.cmpi sge, %119, %121 : vector<8x8xi32>
      %cst_59 = arith.constant -1.000000e+30 : f32
      %123 = vector.broadcast %cst_59 : f32 to vector<8x8xf32>
      %124 = arith.select %122, %117, %123 : vector<8x8xi1>, vector<8x8xf32>
      %cst_60 = arith.constant dense<0xFF800000> : vector<8xf32>
      %125 = vector.multi_reduction <maximumf>, %124, %cst_60 [1] : vector<8x8xf32> to vector<8xf32>
      %126 = vector.shape_cast %125 : vector<8xf32> to vector<8x1xf32>
      %127 = arith.maximumf %arg14, %126 : vector<8x1xf32>
      %128 = vector.broadcast %127 : vector<8x1xf32> to vector<8x8xf32>
      %129 = arith.subf %124, %128 : vector<8x8xf32>
      %130 = math.exp %129 : vector<8x8xf32>
      %131 = arith.subf %arg14, %127 : vector<8x1xf32>
      %132 = math.exp %131 : vector<8x1xf32>
      %133 = arith.mulf %132, %arg15 : vector<8x1xf32>
      %cst_61 = arith.constant dense<0.000000e+00> : vector<8xf32>
      %134 = vector.multi_reduction <add>, %130, %cst_61 [1] : vector<8x8xf32> to vector<8xf32>
      %135 = vector.shape_cast %134 : vector<8xf32> to vector<8x1xf32>
      %136 = arith.addf %133, %135 : vector<8x1xf32>
      %137 = vector.broadcast %132 : vector<8x1xf32> to vector<8x8xf32>
      %138 = arith.mulf %137, %arg16 : vector<8x8xf32>
      %139 = arith.truncf %130 : vector<8x8xf32> to vector<8x8xbf16>
      %cst_62 = arith.constant dense<0.000000e+00> : vector<8x8xf32>
      %140 = tpu.matmul %139, %116, %cst_62 {dimension_numbers = #tpu.dot_dimension_numbers<[1], [0], [0], [1], [0, 0, 1, 1], [], []>} : vector<8x8xbf16>, vector<8x8xbf16>, vector<8x8xf32> -> vector<8x8xf32>
      %141 = arith.addf %138, %140 : vector<8x8xf32>
      scf.yield %127, %136, %141 : vector<8x1xf32>, vector<8x1xf32>, vector<8x8xf32>
    }
    %36 = tpu.reciprocal %35#1 {approx = true} : vector<8x1xf32> -> vector<8x1xf32>
    %37 = vector.broadcast %36 : vector<8x1xf32> to vector<8x8xf32>
    %38 = arith.mulf %35#2, %37 : vector<8x8xf32>
    %39 = arith.truncf %38 : vector<8x8xf32> to vector<8x8xbf16>
    %c0_16 = arith.constant 0 : index
    %c0_17 = arith.constant 0 : index
    %40 = vector.load %arg12[%c0_16, %c0_17] : memref<8x32xbf16, #tpu.memory_space<vmem>>, vector<8x8xbf16>
    tpu.vector_store %arg12[%c0_16, %c0_17], %39 {strides = array<i32>} : memref<8x32xbf16, #tpu.memory_space<vmem>>, vector<8x8xbf16>,
    %41 = vector.extract_strided_slice %25 {offsets = [0, 8], sizes = [8, 8], strides = [1, 1]} : vector<8x32xbf16> to vector<8x8xbf16>
    %cst_18 = arith.constant 0xFF800000 : f32
    %42 = vector.broadcast %cst_18 : f32 to vector<8x1xf32>
    %cst_19 = arith.constant 0.000000e+00 : f32
    %43 = vector.broadcast %cst_19 : f32 to vector<8x1xf32>
    %cst_20 = arith.constant 0.000000e+00 : f32
    %44 = vector.broadcast %cst_20 : f32 to vector<8x8xf32>
    %c0_i32_21 = arith.constant 0 : i32
    %45 = arith.subi %28, %c0_i32_21 : i32
    %46 = arith.addi %c0_i32_21, %45 : i32
    %c1_i32_22 = arith.constant 1 : i32
    %47:3 = scf.for %arg13 = %c0_i32_21 to %46 step %c1_i32_22 iter_args(%arg14 = %42, %arg15 = %43, %arg16 = %44) -> (vector<8x1xf32>, vector<8x1xf32>, vector<8x8xf32>)  : i32 {
      %c8_i32_55 = arith.constant 8 : i32
      %111 = arith.muli %arg13, %c8_i32_55 : i32
      %112 = tpu.assume_multiple %111, 8 : i32
      %113 = arith.index_cast %112 : i32 to index
      %c8_56 = arith.constant 8 : index
      %114 = vector.load %arg10[%113, %c8_56] : memref<8x32xbf16, #tpu.memory_space<vmem>>, vector<8x8xbf16>
      %115 = arith.index_cast %112 : i32 to index
      %c8_57 = arith.constant 8 : index
      %116 = vector.load %arg11[%115, %c8_57] : memref<8x32xbf16, #tpu.memory_space<vmem>>, vector<8x8xbf16>
      %cst_58 = arith.constant dense<0.000000e+00> : vector<8x8xf32>
      %117 = tpu.matmul %41, %114, %cst_58 {dimension_numbers = #tpu.dot_dimension_numbers<[1], [1], [0], [0], [0, 0, 1, 0], [], []>} : vector<8x8xbf16>, vector<8x8xbf16>, vector<8x8xf32> -> vector<8x8xf32>
      %118 = vector.broadcast %6 : i32 to vector<8x8xi32>
      %119 = arith.addi %118, %26 : vector<8x8xi32>
      %120 = vector.broadcast %112 : i32 to vector<8x8xi32>
      %121 = arith.addi %120, %27 : vector<8x8xi32>
      %122 = arith.cmpi sge, %119, %121 : vector<8x8xi32>
      %cst_59 = arith.constant -1.000000e+30 : f32
      %123 = vector.broadcast %cst_59 : f32 to vector<8x8xf32>
      %124 = arith.select %122, %117, %123 : vector<8x8xi1>, vector<8x8xf32>
      %cst_60 = arith.constant dense<0xFF800000> : vector<8xf32>
      %125 = vector.multi_reduction <maximumf>, %124, %cst_60 [1] : vector<8x8xf32> to vector<8xf32>
      %126 = vector.shape_cast %125 : vector<8xf32> to vector<8x1xf32>
      %127 = arith.maximumf %arg14, %126 : vector<8x1xf32>
      %128 = vector.broadcast %127 : vector<8x1xf32> to vector<8x8xf32>
      %129 = arith.subf %124, %128 : vector<8x8xf32>
      %130 = math.exp %129 : vector<8x8xf32>
      %131 = arith.subf %arg14, %127 : vector<8x1xf32>
      %132 = math.exp %131 : vector<8x1xf32>
      %133 = arith.mulf %132, %arg15 : vector<8x1xf32>
      %cst_61 = arith.constant dense<0.000000e+00> : vector<8xf32>
      %134 = vector.multi_reduction <add>, %130, %cst_61 [1] : vector<8x8xf32> to vector<8xf32>
      %135 = vector.shape_cast %134 : vector<8xf32> to vector<8x1xf32>
      %136 = arith.addf %133, %135 : vector<8x1xf32>
      %137 = vector.broadcast %132 : vector<8x1xf32> to vector<8x8xf32>
      %138 = arith.mulf %137, %arg16 : vector<8x8xf32>
      %139 = arith.truncf %130 : vector<8x8xf32> to vector<8x8xbf16>
      %cst_62 = arith.constant dense<0.000000e+00> : vector<8x8xf32>
      %140 = tpu.matmul %139, %116, %cst_62 {dimension_numbers = #tpu.dot_dimension_numbers<[1], [0], [0], [1], [0, 0, 1, 1], [], []>} : vector<8x8xbf16>, vector<8x8xbf16>, vector<8x8xf32> -> vector<8x8xf32>
      %141 = arith.addf %138, %140 : vector<8x8xf32>
      scf.yield %127, %136, %141 : vector<8x1xf32>, vector<8x1xf32>, vector<8x8xf32>
    }
    %48 = tpu.reciprocal %47#1 {approx = true} : vector<8x1xf32> -> vector<8x1xf32>
    %49 = vector.broadcast %48 : vector<8x1xf32> to vector<8x8xf32>
    %50 = arith.mulf %47#2, %49 : vector<8x8xf32>
    %51 = arith.truncf %50 : vector<8x8xf32> to vector<8x8xbf16>
    %c0_23 = arith.constant 0 : index
    %c8 = arith.constant 8 : index
    %52 = vector.load %arg12[%c0_23, %c8] : memref<8x32xbf16, #tpu.memory_space<vmem>>, vector<8x8xbf16>
    tpu.vector_store %arg12[%c0_23, %c8], %51 {strides = array<i32>} : memref<8x32xbf16, #tpu.memory_space<vmem>>, vector<8x8xbf16>,
    %53 = vector.extract_strided_slice %25 {offsets = [0, 16], sizes = [8, 8], strides = [1, 1]} : vector<8x32xbf16> to vector<8x8xbf16>
    %cst_24 = arith.constant 0xFF800000 : f32
    %54 = vector.broadcast %cst_24 : f32 to vector<8x1xf32>
    %cst_25 = arith.constant 0.000000e+00 : f32
    %55 = vector.broadcast %cst_25 : f32 to vector<8x1xf32>
    %cst_26 = arith.constant 0.000000e+00 : f32
    %56 = vector.broadcast %cst_26 : f32 to vector<8x8xf32>
    %c0_i32_27 = arith.constant 0 : i32
    %57 = arith.subi %28, %c0_i32_27 : i32
    %58 = arith.addi %c0_i32_27, %57 : i32
    %c1_i32_28 = arith.constant 1 : i32
    %59:3 = scf.for %arg13 = %c0_i32_27 to %58 step %c1_i32_28 iter_args(%arg14 = %54, %arg15 = %55, %arg16 = %56) -> (vector<8x1xf32>, vector<8x1xf32>, vector<8x8xf32>)  : i32 {
      %c8_i32_55 = arith.constant 8 : i32
      %111 = arith.muli %arg13, %c8_i32_55 : i32
      %112 = tpu.assume_multiple %111, 8 : i32
      %113 = arith.index_cast %112 : i32 to index
      %c16_56 = arith.constant 16 : index
      %114 = vector.load %arg10[%113, %c16_56] : memref<8x32xbf16, #tpu.memory_space<vmem>>, vector<8x8xbf16>
      %115 = arith.index_cast %112 : i32 to index
      %c16_57 = arith.constant 16 : index
      %116 = vector.load %arg11[%115, %c16_57] : memref<8x32xbf16, #tpu.memory_space<vmem>>, vector<8x8xbf16>
      %cst_58 = arith.constant dense<0.000000e+00> : vector<8x8xf32>
      %117 = tpu.matmul %53, %114, %cst_58 {dimension_numbers = #tpu.dot_dimension_numbers<[1], [1], [0], [0], [0, 0, 1, 0], [], []>} : vector<8x8xbf16>, vector<8x8xbf16>, vector<8x8xf32> -> vector<8x8xf32>
      %118 = vector.broadcast %6 : i32 to vector<8x8xi32>
      %119 = arith.addi %118, %26 : vector<8x8xi32>
      %120 = vector.broadcast %112 : i32 to vector<8x8xi32>
      %121 = arith.addi %120, %27 : vector<8x8xi32>
      %122 = arith.cmpi sge, %119, %121 : vector<8x8xi32>
      %cst_59 = arith.constant -1.000000e+30 : f32
      %123 = vector.broadcast %cst_59 : f32 to vector<8x8xf32>
      %124 = arith.select %122, %117, %123 : vector<8x8xi1>, vector<8x8xf32>
      %cst_60 = arith.constant dense<0xFF800000> : vector<8xf32>
      %125 = vector.multi_reduction <maximumf>, %124, %cst_60 [1] : vector<8x8xf32> to vector<8xf32>
      %126 = vector.shape_cast %125 : vector<8xf32> to vector<8x1xf32>
      %127 = arith.maximumf %arg14, %126 : vector<8x1xf32>
      %128 = vector.broadcast %127 : vector<8x1xf32> to vector<8x8xf32>
      %129 = arith.subf %124, %128 : vector<8x8xf32>
      %130 = math.exp %129 : vector<8x8xf32>
      %131 = arith.subf %arg14, %127 : vector<8x1xf32>
      %132 = math.exp %131 : vector<8x1xf32>
      %133 = arith.mulf %132, %arg15 : vector<8x1xf32>
      %cst_61 = arith.constant dense<0.000000e+00> : vector<8xf32>
      %134 = vector.multi_reduction <add>, %130, %cst_61 [1] : vector<8x8xf32> to vector<8xf32>
      %135 = vector.shape_cast %134 : vector<8xf32> to vector<8x1xf32>
      %136 = arith.addf %133, %135 : vector<8x1xf32>
      %137 = vector.broadcast %132 : vector<8x1xf32> to vector<8x8xf32>
      %138 = arith.mulf %137, %arg16 : vector<8x8xf32>
      %139 = arith.truncf %130 : vector<8x8xf32> to vector<8x8xbf16>
      %cst_62 = arith.constant dense<0.000000e+00> : vector<8x8xf32>
      %140 = tpu.matmul %139, %116, %cst_62 {dimension_numbers = #tpu.dot_dimension_numbers<[1], [0], [0], [1], [0, 0, 1, 1], [], []>} : vector<8x8xbf16>, vector<8x8xbf16>, vector<8x8xf32> -> vector<8x8xf32>
      %141 = arith.addf %138, %140 : vector<8x8xf32>
      scf.yield %127, %136, %141 : vector<8x1xf32>, vector<8x1xf32>, vector<8x8xf32>
    }
    %60 = tpu.reciprocal %59#1 {approx = true} : vector<8x1xf32> -> vector<8x1xf32>
    %61 = vector.broadcast %60 : vector<8x1xf32> to vector<8x8xf32>
    %62 = arith.mulf %59#2, %61 : vector<8x8xf32>
    %63 = arith.truncf %62 : vector<8x8xf32> to vector<8x8xbf16>
    %c0_29 = arith.constant 0 : index
    %c16 = arith.constant 16 : index
    %64 = vector.load %arg12[%c0_29, %c16] : memref<8x32xbf16, #tpu.memory_space<vmem>>, vector<8x8xbf16>
    tpu.vector_store %arg12[%c0_29, %c16], %63 {strides = array<i32>} : memref<8x32xbf16, #tpu.memory_space<vmem>>, vector<8x8xbf16>,
    %65 = vector.extract_strided_slice %25 {offsets = [0, 24], sizes = [8, 8], strides = [1, 1]} : vector<8x32xbf16> to vector<8x8xbf16>
    %cst_30 = arith.constant 0xFF800000 : f32
    %66 = vector.broadcast %cst_30 : f32 to vector<8x1xf32>
    %cst_31 = arith.constant 0.000000e+00 : f32
    %67 = vector.broadcast %cst_31 : f32 to vector<8x1xf32>
    %cst_32 = arith.constant 0.000000e+00 : f32
    %68 = vector.broadcast %cst_32 : f32 to vector<8x8xf32>
    %c0_i32_33 = arith.constant 0 : i32
    %69 = arith.subi %28, %c0_i32_33 : i32
    %70 = arith.addi %c0_i32_33, %69 : i32
    %c1_i32_34 = arith.constant 1 : i32
    %71:3 = scf.for %arg13 = %c0_i32_33 to %70 step %c1_i32_34 iter_args(%arg14 = %66, %arg15 = %67, %arg16 = %68) -> (vector<8x1xf32>, vector<8x1xf32>, vector<8x8xf32>)  : i32 {
      %c8_i32_55 = arith.constant 8 : i32
      %111 = arith.muli %arg13, %c8_i32_55 : i32
      %112 = tpu.assume_multiple %111, 8 : i32
      %113 = arith.index_cast %112 : i32 to index
      %c24_56 = arith.constant 24 : index
      %114 = vector.load %arg10[%113, %c24_56] : memref<8x32xbf16, #tpu.memory_space<vmem>>, vector<8x8xbf16>
      %115 = arith.index_cast %112 : i32 to index
      %c24_57 = arith.constant 24 : index
      %116 = vector.load %arg11[%115, %c24_57] : memref<8x32xbf16, #tpu.memory_space<vmem>>, vector<8x8xbf16>
      %cst_58 = arith.constant dense<0.000000e+00> : vector<8x8xf32>
      %117 = tpu.matmul %65, %114, %cst_58 {dimension_numbers = #tpu.dot_dimension_numbers<[1], [1], [0], [0], [0, 0, 1, 0], [], []>} : vector<8x8xbf16>, vector<8x8xbf16>, vector<8x8xf32> -> vector<8x8xf32>
      %118 = vector.broadcast %6 : i32 to vector<8x8xi32>
      %119 = arith.addi %118, %26 : vector<8x8xi32>
      %120 = vector.broadcast %112 : i32 to vector<8x8xi32>
      %121 = arith.addi %120, %27 : vector<8x8xi32>
      %122 = arith.cmpi sge, %119, %121 : vector<8x8xi32>
      %cst_59 = arith.constant -1.000000e+30 : f32
      %123 = vector.broadcast %cst_59 : f32 to vector<8x8xf32>
      %124 = arith.select %122, %117, %123 : vector<8x8xi1>, vector<8x8xf32>
      %cst_60 = arith.constant dense<0xFF800000> : vector<8xf32>
      %125 = vector.multi_reduction <maximumf>, %124, %cst_60 [1] : vector<8x8xf32> to vector<8xf32>
      %126 = vector.shape_cast %125 : vector<8xf32> to vector<8x1xf32>
      %127 = arith.maximumf %arg14, %126 : vector<8x1xf32>
      %128 = vector.broadcast %127 : vector<8x1xf32> to vector<8x8xf32>
      %129 = arith.subf %124, %128 : vector<8x8xf32>
      %130 = math.exp %129 : vector<8x8xf32>
      %131 = arith.subf %arg14, %127 : vector<8x1xf32>
      %132 = math.exp %131 : vector<8x1xf32>
      %133 = arith.mulf %132, %arg15 : vector<8x1xf32>
      %cst_61 = arith.constant dense<0.000000e+00> : vector<8xf32>
      %134 = vector.multi_reduction <add>, %130, %cst_61 [1] : vector<8x8xf32> to vector<8xf32>
      %135 = vector.shape_cast %134 : vector<8xf32> to vector<8x1xf32>
      %136 = arith.addf %133, %135 : vector<8x1xf32>
      %137 = vector.broadcast %132 : vector<8x1xf32> to vector<8x8xf32>
      %138 = arith.mulf %137, %arg16 : vector<8x8xf32>
      %139 = arith.truncf %130 : vector<8x8xf32> to vector<8x8xbf16>
      %cst_62 = arith.constant dense<0.000000e+00> : vector<8x8xf32>
      %140 = tpu.matmul %139, %116, %cst_62 {dimension_numbers = #tpu.dot_dimension_numbers<[1], [0], [0], [1], [0, 0, 1, 1], [], []>} : vector<8x8xbf16>, vector<8x8xbf16>, vector<8x8xf32> -> vector<8x8xf32>
      %141 = arith.addf %138, %140 : vector<8x8xf32>
      scf.yield %127, %136, %141 : vector<8x1xf32>, vector<8x1xf32>, vector<8x8xf32>
    }
    %72 = tpu.reciprocal %71#1 {approx = true} : vector<8x1xf32> -> vector<8x1xf32>
    %73 = vector.broadcast %72 : vector<8x1xf32> to vector<8x8xf32>
    %74 = arith.mulf %71#2, %73 : vector<8x8xf32>
    %75 = arith.truncf %74 : vector<8x8xf32> to vector<8x8xbf16>
    %c0_35 = arith.constant 0 : index
    %c24 = arith.constant 24 : index
    %76 = vector.load %arg12[%c0_35, %c24] : memref<8x32xbf16, #tpu.memory_space<vmem>>, vector<8x8xbf16>
    tpu.vector_store %arg12[%c0_35, %c24], %75 {strides = array<i32>} : memref<8x32xbf16, #tpu.memory_space<vmem>>, vector<8x8xbf16>,
    %c0_36 = arith.constant 0 : index
    %c0_37 = arith.constant 0 : index
    %77 = vector.load %arg12[%c0_36, %c0_37] : memref<8x32xbf16, #tpu.memory_space<vmem>>, vector<8x32xbf16>
    %c0_38 = arith.constant 0 : index
    %c0_39 = arith.constant 0 : index
    %78 = vector.load %arg5[%c0_38, %c0_39] : memref<32x32xbf16, #tpu.memory_space<vmem>>, vector<32x32xbf16>
    %cst_40 = arith.constant dense<0.000000e+00> : vector<8x32xf32>
    %79 = tpu.matmul %77, %78, %cst_40 {dimension_numbers = #tpu.dot_dimension_numbers<[1], [0], [0], [1], [0, 0, 1, 1], [], []>} : vector<8x32xbf16>, vector<32x32xbf16>, vector<8x32xf32> -> vector<8x32xf32>
    %80 = arith.addf %9, %79 : vector<8x32xf32>
    %81 = arith.mulf %80, %80 : vector<8x32xf32>
    %cst_41 = arith.constant dense<0.000000e+00> : vector<8xf32>
    %82 = vector.multi_reduction <add>, %81, %cst_41 [1] : vector<8x32xf32> to vector<8xf32>
    %83 = vector.shape_cast %82 : vector<8xf32> to vector<8x1xf32>
    %cst_42 = arith.constant 3.200000e+01 : f32
    %84 = vector.broadcast %cst_42 : f32 to vector<8x1xf32>
    %85 = arith.divf %83, %84 : vector<8x1xf32>
    %cst_43 = arith.constant 1.1920929E-7 : f32
    %86 = vector.broadcast %cst_43 : f32 to vector<8x1xf32>
    %87 = arith.addf %85, %86 : vector<8x1xf32>
    %88 = math.rsqrt %87 : vector<8x1xf32>
    %89 = vector.broadcast %88 : vector<8x1xf32> to vector<8x32xf32>
    %90 = arith.mulf %80, %89 : vector<8x32xf32>
    %91 = vector.broadcast %1 : vector<1x32xf32> to vector<8x32xf32>
    %92 = arith.mulf %90, %91 : vector<8x32xf32>
    %93 = arith.truncf %92 : vector<8x32xf32> to vector<8x32xbf16>
    %cst_44 = arith.constant 0.000000e+00 : f32
    %94 = vector.broadcast %cst_44 : f32 to vector<8x32xf32>
    %c0_45 = arith.constant 0 : index
    %c0_46 = arith.constant 0 : index
    %95 = vector.load %arg7[%c0_45, %c0_46] : memref<32x128xbf16, #tpu.memory_space<vmem>>, vector<32x128xbf16>
    %cst_47 = arith.constant dense<0.000000e+00> : vector<8x128xf32>
    %96 = tpu.matmul %93, %95, %cst_47 {dimension_numbers = #tpu.dot_dimension_numbers<[1], [0], [0], [1], [0, 0, 1, 1], [], []>} : vector<8x32xbf16>, vector<32x128xbf16>, vector<8x128xf32> -> vector<8x128xf32>
    %97 = arith.negf %96 : vector<8x128xf32>
    %98 = math.exp %97 : vector<8x128xf32>
    %cst_48 = arith.constant 1.000000e+00 : f32
    %99 = vector.broadcast %cst_48 : f32 to vector<8x128xf32>
    %100 = arith.addf %99, %98 : vector<8x128xf32>
    %101 = arith.divf %99, %100 : vector<8x128xf32>
    %102 = arith.mulf %96, %101 : vector<8x128xf32>
    %103 = arith.truncf %102 : vector<8x128xf32> to vector<8x128xbf16>
    %c0_49 = arith.constant 0 : index
    %c0_50 = arith.constant 0 : index
    %104 = vector.load %arg8[%c0_49, %c0_50] : memref<128x32xbf16, #tpu.memory_space<vmem>>, vector<128x32xbf16>
    %cst_51 = arith.constant dense<0.000000e+00> : vector<8x32xf32>
    %105 = tpu.matmul %103, %104, %cst_51 {dimension_numbers = #tpu.dot_dimension_numbers<[1], [0], [0], [1], [0, 0, 1, 1], [], []>} : vector<8x128xbf16>, vector<128x32xbf16>, vector<8x32xf32> -> vector<8x32xf32>
    %106 = arith.addf %94, %105 : vector<8x32xf32>
    %107 = arith.addf %80, %106 : vector<8x32xf32>
    %c0_52 = arith.constant 0 : index
    %c0_53 = arith.constant 0 : index
    %c0_54 = arith.constant 0 : index
    %108 = vector.load %arg9[%c0_52, %c0_53, %c0_54] : memref<1x8x32xf32, #tpu.memory_space<vmem>>, vector<1x8x32xf32>
    %109 = vector.shape_cast %108 : vector<1x8x32xf32> to vector<8x32xf32>
    %110 = vector.shape_cast %107 : vector<8x32xf32> to vector<1x8x32xf32>
    tpu.vector_store %arg9[%c0_52, %c0_53, %c0_54], %110 {strides = array<i32>} : memref<1x8x32xf32, #tpu.memory_space<vmem>>, vector<1x8x32xf32>,
    return
  }
  func.func @transform_0(%arg0: i32, %arg1: i32) -> (i32, i32, i32) {
    %c0_i32 = arith.constant 0 : i32
    %c0_i32_0 = arith.constant 0 : i32
    %c0_i32_1 = arith.constant 0 : i32
    return %arg0, %c0_i32, %c0_i32_0 : i32, i32, i32
  }
  func.func @transform_1(%arg0: i32, %arg1: i32) -> (i32, i32) {
    %c0_i32 = arith.constant 0 : i32
    %c0_i32_0 = arith.constant 0 : i32
    %c0_i32_1 = arith.constant 0 : i32
    return %c0_i32, %c0_i32_0 : i32, i32
  }
  func.func @transform_2(%arg0: i32, %arg1: i32) -> (i32, i32) {
    %c0_i32 = arith.constant 0 : i32
    %c0_i32_0 = arith.constant 0 : i32
    %c0_i32_1 = arith.constant 0 : i32
    return %c0_i32, %c0_i32_0 : i32, i32
  }
  func.func @transform_3(%arg0: i32, %arg1: i32) -> (i32, i32) {
    %c0_i32 = arith.constant 0 : i32
    %c0_i32_0 = arith.constant 0 : i32
    %c0_i32_1 = arith.constant 0 : i32
    return %c0_i32, %c0_i32_0 : i32, i32
  }
  func.func @transform_4(%arg0: i32, %arg1: i32) -> (i32, i32) {
    %c0_i32 = arith.constant 0 : i32
    %c0_i32_0 = arith.constant 0 : i32
    %c0_i32_1 = arith.constant 0 : i32
    return %c0_i32, %c0_i32_0 : i32, i32
  }
  func.func @transform_5(%arg0: i32, %arg1: i32) -> (i32, i32) {
    %c0_i32 = arith.constant 0 : i32
    %c0_i32_0 = arith.constant 0 : i32
    %c0_i32_1 = arith.constant 0 : i32
    return %c0_i32, %c0_i32_0 : i32, i32
  }
  func.func @transform_6(%arg0: i32, %arg1: i32) -> (i32, i32) {
    %c0_i32 = arith.constant 0 : i32
    %c0_i32_0 = arith.constant 0 : i32
    %c0_i32_1 = arith.constant 0 : i32
    return %c0_i32, %c0_i32_0 : i32, i32
  }
  func.func @transform_7(%arg0: i32, %arg1: i32) -> (i32, i32, i32) {
    %c0_i32 = arith.constant 0 : i32
    %c0_i32_0 = arith.constant 0 : i32
    return %arg0, %arg1, %c0_i32 : i32, i32, i32
  }
}

</mosaic_0001>

<bundles_post_ra>
// kernel: tpu_custom_call.1
= control target key start
LH: loop header
LB: loop body
LE: loop exit
PB: predicated region body
PF: predicated region fallthrough
CT: control target
= control target key end

     0   :  { %s3311_s0 = inlined_call_operand.hbm [shape: f32[2,8,32], index: 0, kind: input, shape index: {}]   ;;  %s3312_s1 = inlined_call_operand.hbm [shape: f32[1,32], index: 1, kind: input, shape index: {}]   ;;  %s3313_s2 = inlined_call_operand.hbm [shape: bf16[32,96], index: 2, kind: input, shape index: {}]   ;;  %s3314_s3 = inlined_call_operand.hbm [shape: bf16[32,32], index: 3, kind: input, shape index: {}]   ;;  %s3315_s4 = inlined_call_operand.hbm [shape: f32[1,32], index: 4, kind: input, shape index: {}]   ;;  %s3316_s5 = inlined_call_operand.hbm [shape: bf16[32,128], index: 5, kind: input, shape index: {}]   ;;  %s3317_s6 = inlined_call_operand.hbm [shape: bf16[128,32], index: 6, kind: input, shape index: {}]   ;;  %s3318_s7 = inlined_call_operand.hbm [shape: f32[2,8,32], index: 7, kind: output, shape index: {}]  }
   0x1   :  { %3324 = sst [smem:[#allocation23_spill]] %s3312_s1 }
   0x2   :  { %3325 = sst [smem:[#allocation24_spill]] %s3314_s3 }
   0x3   :  { %12 = vsyncpa [#allocation6], 0 }
   0x4   :  { %14 = vsyncpa [#allocation6 + $0x1], 0 }
   0x5   :  { %15 = vsyncpa [#allocation9], 0 }
   0x6   :  { %16 = vsyncpa [#allocation12], 0 }
   0x7   :  { %17 = vsyncpa [#allocation15], 0 }
   0x8   :  { %18 = vsyncpa [#allocation7], 0 }
   0x9   :  { %20 = vsyncpa [#allocation7 + $0x1], 0  ;;  %s2777_s24 = smov 0   ;;  %s2779_s25 = smov 0  }
   0xa   :  { %s2781_s26 = smov 0   ;;  %s2783_s27 = smov 0  }
   0xb   :  { %s2785_s28 = smov 0   ;;  %s2787_s29 = smov 0  }
   0xc LB: > { %s3322_s30 = sadd.s32 4294967295, %s2643_s29   ;;  %p1729_p0 = scmp.ge.s32.totalorder %s2643_s29, 1  ;;  %s2643_s29 = sphi %s2787_s29, %s26_s29   ;;  %s2639_s28 = sphi %s2785_s28, %s3360_s28   ;;  %s2635_s27 = sphi %s2783_s27, %s3359_s27   ;;  %s2631_s26 = sphi %s2781_s26, %s3358_s26   ;;  %s2627_s25 = sphi %s2779_s25, %s3357_s25   ;;  %s2623_s24 = sphi %s2777_s24, %s3356_s24  }
   0xd   : > { %p2811_p1 = scmp.eq.s32.totalorder %s3322_s30, 0  ;;  %p223_p2 = scmp.lt.s32.totalorder %s2643_s29, 3 }
   0xe   : > { %s2709_s10 = smov [#allocation8]   ;;  %s2710_s13 = smov [#allocation11]  }
   0xf   : > { %s3326_s8 = scalar_select %p2811_p1, 1, 0 }
  0x10   : > { %p2816_p3 = pnand %p1729_p0, %p223_p2  ;;  %s236_s11 = sshll.u32 %s2709_s10, 4  ;;  %s237_s11 = int_to_ptr.vmem [resolvable:$true] %s236_s11 }
  0x11   : > { %s259_s14 = sshll.u32 %s2710_s13, 4  ;;  %s2711_s15 = smov [#allocation14]   ;;  %s2829_s14 = int_to_ptr.vmem [resolvable:$true] %s259_s14 }
  0x12   : > { %s3327_s9 = scalar_select %p2816_p3, 1, 0 }
  0x13   : > { %p1986_p5 = pneg %p2816_p3  ;;  %s2831_s16 = sshll.u32 %s2711_s15, 4  ;;  %s284_s16 = int_to_ptr.vmem [resolvable:$true] %s2831_s16 }
  0x14   : > { %s3329_s1 = sld [smem:[#allocation23_spill]] }
  0x15   : > { %p2825_p6 = pnand %p1986_p5, %p2811_p1 }
  0x17   : > { %p2841_p8 = pneg %p2825_p6 }
  0x1a   : > { %s2287_s19 = scalar_lea.hbm %s3329_s1, 16 }
  0x1b   : > { %p2288_p7 = scmp.ne.s32.totalorder %s3329_s1, %s2287_s19  ;;  %p2294_p11 = scmp.lt.u32.totalorder %s2287_s19, %s3329_s1 }
  0x1d   : > { %p2290_p9 = pnand %p2841_p8, %p2288_p7 }
  0x1f   : > { %p2291_p10 = pneg %p2290_p9 }
  0x21   : > { %p2296_p12 = pnand %p2294_p11, %p2291_p10 }
  0x23   : > { %2299 = shalt.err (!%p2296_p12)
}
  0x24   : > { %s2300_s13 = scalar_lea.vmem %s237_s11, 16  ;;  %s2307_s15 = scalar_lea.vmem %s237_s11, 32 }
  0x25   : > { %p2301_p13 = scmp.ne.s32.totalorder %s237_s11, %s2300_s13  ;;  %p2308_p5 = scmp.lt.s32.totalorder %s237_s11, %s237_s11 }
  0x26   : > { %p2309_p4 = scmp.lt.s32.totalorder %s2307_s15, %s2300_s13 }
  0x27   : > { %p2303_p0 = pnand %p2301_p13, %p2841_p8 }
  0x28   : > { %p2310_p3 = por %p2309_p4, %p2308_p5 }
  0x29   : > { %p2304_p2 = pneg %p2303_p0 }
  0x2b   : > { %p2311_p1 = pnand %p2310_p3, %p2304_p2 }
  0x2d   : > { %2314 = shalt.err (!%p2311_p1)
}
  0x2e   : > { %1989 = dma.hbm_to_vmem [thread:$0]  (!%p2825_p6), %s3329_s1, 16, %s237_s11, [#allocation9]  }
  0x2f   : > { %s3331_s3 = sld [smem:[#allocation24_spill]] }
  0x35   : > { %s2315_s21 = scalar_lea.hbm %s3331_s3, 256 }
  0x36   : > { %p2316_p7 = scmp.ne.s32.totalorder %s3331_s3, %s2315_s21  ;;  %p2322_p1 = scmp.lt.u32.totalorder %s2315_s21, %s3331_s3 }
  0x38   : > { %p2318_p9 = pnand %p2316_p7, %p2841_p8 }
  0x3a   : > { %p2319_p4 = pneg %p2318_p9 }
  0x3c   : > { %p2324_p3 = pnand %p2322_p1, %p2319_p4 }
  0x3e   : > { %2327 = shalt.err (!%p2324_p3)
}
  0x3f   : > { %s2328_s11 = scalar_lea.vmem %s2829_s14, 256  ;;  %p2336_p13 = scmp.lt.s32.totalorder %s2829_s14, %s2829_s14 }
  0x40   : > { %p2329_p10 = scmp.ne.s32.totalorder %s2829_s14, %s2328_s11  ;;  %p2337_p0 = scmp.lt.s32.totalorder %s2328_s11, %s2328_s11 }
  0x42   : > { %p2331_p11 = pnand %p2329_p10, %p2841_p8  ;;  %p2338_p2 = por %p2337_p0, %p2336_p13 }
  0x44   : > { %p2332_p12 = pneg %p2331_p11 }
  0x46   : > { %p2339_p5 = pnand %p2338_p2, %p2332_p12 }
  0x48   : > { %2342 = shalt.err (!%p2339_p5)
}
  0x49   : > { %s2712_s17 = smov 64   ;;  %s2713_s18 = smov 4  }
  0x4a   : > { %1995 = dma.hbm_to_vmem [thread:$0]  (!%p2825_p6), %s3331_s3, 256, %s2829_s14, [#allocation12], %s2712_s17, %s2712_s17, %s2713_s18  }
  0x4b   : > { %s2343_s10 = scalar_lea.hbm %s3316_s5, 256 }
  0x4c   : > { %p2344_p7 = scmp.ne.s32.totalorder %s3316_s5, %s2343_s10  ;;  %p2350_p1 = scmp.lt.u32.totalorder %s2343_s10, %s3316_s5 }
  0x4e   : > { %p2346_p9 = pnand %p2344_p7, %p2841_p8 }
  0x50   : > { %p2347_p4 = pneg %p2346_p9 }
  0x52   : > { %p2352_p3 = pnand %p2350_p1, %p2347_p4 }
  0x54   : > { %2355 = shalt.err (!%p2352_p3)
}
  0x55   : > { %s2356_s19 = scalar_lea.vmem %s284_s16, 256  ;;  %p2364_p13 = scmp.lt.s32.totalorder %s284_s16, %s284_s16 }
  0x56   : > { %p2357_p10 = scmp.ne.s32.totalorder %s284_s16, %s2356_s19  ;;  %p2365_p0 = scmp.lt.s32.totalorder %s2356_s19, %s2356_s19 }
  0x58   : > { %p2359_p11 = pnand %p2357_p10, %p2841_p8  ;;  %p2366_p2 = por %p2365_p0, %p2364_p13 }
  0x5a   : > { %p2360_p12 = pneg %p2359_p11 }
  0x5c   : > { %p2367_p5 = pnand %p2366_p2, %p2360_p12 }
  0x5e   : > { %2370 = shalt.err (!%p2367_p5)
}
  0x5f   : > { %2001 = dma.hbm_to_vmem [thread:$0]  (!%p2825_p6), %s3316_s5, 256, %s284_s16, [#allocation15], %s2712_s17, %s2712_s17, %s2713_s18  }
  0x60   : > { %s2714_s20 = smov [#allocation10]   ;;  %s2715_s23 = smov [#allocation13]  }
  0x61   : > { %s246_s21 = sshll.u32 %s2714_s20, 4  ;;  %s273_s10 = sshll.u32 %s2715_s23, 4  ;;  %s247_s21 = int_to_ptr.vmem [resolvable:$true] %s246_s21  ;;  %s274_s10 = int_to_ptr.vmem [resolvable:$true] %s273_s10 }
  0x62   : > { %s2371_s11 = scalar_lea.hbm %s3313_s2, 256 }
  0x63   : > { %p2372_p7 = scmp.ne.s32.totalorder %s3313_s2, %s2371_s11  ;;  %p2378_p1 = scmp.lt.u32.totalorder %s2371_s11, %s3313_s2 }
  0x65   : > { %p2374_p9 = pnand %p2372_p7, %p2841_p8 }
  0x67   : > { %p2375_p4 = pneg %p2374_p9 }
  0x69   : > { %p2380_p3 = pnand %p2378_p1, %p2375_p4 }
  0x6b   : > { %2383 = shalt.err (!%p2380_p3)
}
  0x6c   : > { %s2384_s16 = scalar_lea.vmem %s247_s21, 256  ;;  %p2392_p13 = scmp.lt.s32.totalorder %s247_s21, %s247_s21 }
  0x6d   : > { %p2385_p10 = scmp.ne.s32.totalorder %s247_s21, %s2384_s16  ;;  %p2393_p0 = scmp.lt.s32.totalorder %s2384_s16, %s2384_s16 }
  0x6f   : > { %p2387_p11 = pnand %p2385_p10, %p2841_p8  ;;  %p2394_p2 = por %p2393_p0, %p2392_p13 }
  0x71   : > { %p2388_p12 = pneg %p2387_p11 }
  0x73   : > { %p2395_p5 = pnand %p2394_p2, %p2388_p12 }
  0x75   : > { %2398 = shalt.err (!%p2395_p5)
}
  0x76   : > { %1992 = dma.hbm_to_vmem [thread:$0]  (!%p2825_p6), %s3313_s2, 256, %s247_s21, [#allocation9], %s2712_s17, %s2712_s17, %s2713_s18  }
  0x77   : > { %s2399_s23 = scalar_lea.hbm %s3315_s4, 16 }
  0x78   : > { %p2400_p7 = scmp.ne.s32.totalorder %s3315_s4, %s2399_s23  ;;  %p2406_p1 = scmp.lt.u32.totalorder %s2399_s23, %s3315_s4 }
  0x7a   : > { %p2402_p9 = pnand %p2400_p7, %p2841_p8 }
  0x7c   : > { %p2403_p4 = pneg %p2402_p9 }
  0x7e   : > { %p2408_p3 = pnand %p2406_p1, %p2403_p4 }
  0x80   : > { %2411 = shalt.err (!%p2408_p3)
}
  0x81   : > { %s2412_s30 = scalar_lea.vmem %s274_s10, 16  ;;  %s2419_s21 = scalar_lea.vmem %s274_s10, 32 }
  0x82   : > { %p2413_p10 = scmp.ne.s32.totalorder %s274_s10, %s2412_s30  ;;  %p2420_p13 = scmp.lt.s32.totalorder %s274_s10, %s274_s10 }
  0x83   : > { %p2421_p0 = scmp.lt.s32.totalorder %s2419_s21, %s2412_s30 }
  0x84   : > { %p2415_p11 = pnand %p2413_p10, %p2841_p8 }
  0x85   : > { %p2422_p2 = por %p2421_p0, %p2420_p13 }
  0x86   : > { %p2416_p12 = pneg %p2415_p11 }
  0x88   : > { %p2423_p5 = pnand %p2422_p2, %p2416_p12 }
  0x8a   : > { %2426 = shalt.err (!%p2423_p5)
}
  0x8b   : > { %1998 = dma.hbm_to_vmem [thread:$0]  (!%p2825_p6), %s3315_s4, 16, %s274_s10, [#allocation12]  }
  0x8c   : > { %s2716_s3 = smov [#allocation16]   ;;  %s2427_s13 = scalar_lea.hbm %s3317_s6, 1024 }
  0x8d   : > { %s296_s14 = sshll.u32 %s2716_s3, 4  ;;  %p2428_p7 = scmp.ne.s32.totalorder %s3317_s6, %s2427_s13  ;;  %s297_s14 = int_to_ptr.vmem [resolvable:$true] %s296_s14 }
  0x8e   : > { %p2434_p1 = scmp.lt.u32.totalorder %s2427_s13, %s3317_s6 }
  0x8f   : > { %p2430_p9 = pnand %p2428_p7, %p2841_p8 }
  0x91   : > { %p2431_p4 = pneg %p2430_p9 }
  0x93   : > { %p2436_p3 = pnand %p2434_p1, %p2431_p4 }
  0x95   : > { %2439 = shalt.err (!%p2436_p3)
}
  0x96   : > { %s2440_s10 = scalar_lea.vmem %s297_s14, 1024  ;;  %p2448_p13 = scmp.lt.s32.totalorder %s297_s14, %s297_s14 }
  0x97   : > { %p2441_p10 = scmp.ne.s32.totalorder %s297_s14, %s2440_s10  ;;  %p2449_p0 = scmp.lt.s32.totalorder %s2440_s10, %s2440_s10 }
  0x99   : > { %p2443_p11 = pnand %p2441_p10, %p2841_p8  ;;  %p2450_p2 = por %p2449_p0, %p2448_p13 }
  0x9b   : > { %p2444_p12 = pneg %p2443_p11 }
  0x9d   : > { %p2451_p5 = pnand %p2450_p2, %p2444_p12 }
  0x9f   : > { %2454 = shalt.err (!%p2451_p5)
}
  0xa0   : > { %2004 = dma.hbm_to_vmem [thread:$0]  (!%p2825_p6), %s3317_s6, 1024, %s297_s14, [#allocation15], %s2712_s17, %s2712_s17, %s2713_s18  }
  0xa1   : > { %s1728_s12 = sadd.s32 4294967294, %s2643_s29   ;;  %s38_s22 = sadd.s32 1, %s2639_s28 }
  0xa2   : > { %p40_p8 = scmp.ge.s32.totalorder %s38_s22, 2  ;;  %s45_s1 = sadd.s32 1, %s2631_s26 }
  0xa3   : > { %p52_p7 = scmp.ne.s32.totalorder %s2631_s26, %s2627_s25  ;;  %p53_p9 = scmp.eq.s32.totalorder %s2643_s29, 0 }
  0xa4   : > { %s3362_s22 = smov (%p40_p8, %s38_s22), 0  ;;  %p58_p1 = scmp.ne.s32.totalorder %s2627_s25, %s2623_s24 }
  0xa5   : > { %p2973_p4 = por %p53_p9, %p52_p7  ;;  %s42_s17 = ssub.s32 %s2639_s28, %s3362_s22 }
  0xa6   : > { %s3333_s18 = sadd.s32 4294967295, %s2643_s29   ;;  %p43_p3 = scmp.eq.s32.totalorder %s42_s17, 0 }
  0xa7   : > { %p210_p6 = scmp.eq.s32.totalorder %s3333_s18, 1  ;;  %p3334_p10 = scmp.ne.s32.totalorder %s3326_s8, 0 }
  0xa8   : > { %p216_p13 = scmp.eq.s32.totalorder %s1728_s12, 1  ;;  %p2019_p2 = scmp.lt.s32.totalorder %s2643_s29, 2 }
  0xa9   : > { %p2985_p11 = por %p3334_p10, %p58_p1  ;;  %p2989_p12 = por %p210_p6, %p52_p7 }
  0xaa   : > { %s2994_s23 = scalar_select %p43_p3, %s2631_s26, %s45_s1  }
  0xab   : > { %s3336_s20 = scalar_select %p2989_p12, 1, 0 }
  0xac   : > { %p2996_p0 = por %p216_p13, %p58_p1  ;;  %s310_s15 = sand.u32 1, %s2631_s26  }
  0xad   : > { %s1738_s11 = sshll.u32 %s2639_s28, 7  ;;  %s1737_s19 = sshll.u32 %s310_s15, 3 }
  0xae   : > { %s3337_s13 = scalar_select %p2996_p0, 1, 0 }
  0xaf   : > { %s3006_s21 = scalar_lea.hbm %s3311_s0, %s1738_s11  ;;  %s314_s16 = scalar_lea.vmem [#allocation5], %s1737_s19 }
  0xb0   : > { %s321_s12 = sshll.u32 %s314_s16, 4  ;;  %p3010_p5 = pnand %p2019_p2, %p2973_p4  ;;  %s3014_s12 = int_to_ptr.vmem [resolvable:$true] %s321_s12 }
  0xb1   : > { %s311_s17 = scalar_lea.sflag [#allocation6], %s310_s15  ;;  %s2455_s18 = scalar_lea.hbm %s3006_s21, 128 }
  0xb2   : > { %p2456_p8 = scmp.ne.s32.totalorder %s3006_s21, %s2455_s18  ;;  %p2457_p7 = pneg %p3010_p5 }
  0xb3   : > { %s2460_s3 = scalar_lea.hbm %s3311_s0, 256  ;;  %p2461_p4 = scmp.lt.u32.totalorder %s3006_s21, %s3311_s0 }
  0xb4   : > { %p2458_p9 = pnand %p2457_p7, %p2456_p8  ;;  %p2462_p6 = scmp.lt.u32.totalorder %s2460_s3, %s2455_s18 }
  0xb5   : > { %p2464_p10 = scmp.lt.u32.totalorder %s2455_s18, %s3006_s21 }
  0xb6   : > { %p2459_p1 = pneg %p2458_p9  ;;  %p2463_p3 = por %p2462_p6, %p2461_p4 }
  0xb8   : > { %p2465_p13 = por %p2464_p10, %p2463_p3 }
  0xba   : > { %p2466_p2 = pnand %p2465_p13, %p2459_p1 }
  0xbc   : > { %2469 = shalt.err (!%p2466_p2)
}
  0xbd   : > { %s2470_s15 = scalar_lea.vmem %s3014_s12, 128  ;;  %s2717_s16 = smov [#allocation5]  }
  0xbe   : > { %p2471_p8 = scmp.ne.s32.totalorder %s3014_s12, %s2470_s15  ;;  %s2475_s11 = sshll.u32 %s2717_s16, 4  ;;  %s2476_s11 = int_to_ptr.vmem [resolvable:$false] %s2475_s11 }
  0xbf   : > { %s2477_s19 = scalar_lea.vmem %s2476_s11, 256  ;;  %p2478_p12 = scmp.lt.s32.totalorder %s3014_s12, %s2476_s11 }
  0xc0   : > { %p2473_p9 = pnand %p2471_p8, %p2457_p7  ;;  %p2479_p4 = scmp.lt.s32.totalorder %s2477_s19, %s2470_s15 }
  0xc2   : > { %p2474_p0 = pneg %p2473_p9  ;;  %p2480_p6 = por %p2479_p4, %p2478_p12 }
  0xc4   : > { %p2481_p3 = pnand %p2480_p6, %p2474_p0 }
  0xc6   : > { %2484 = shalt.err (!%p2481_p3)
}
  0xc7   : > { %2008 = dma.hbm_to_vmem [thread:$0]  (!%p3010_p5), %s3006_s21, 128, %s3014_s12, %s311_s17  }
  0xc8   : > { %p3339_p1 = scmp.ne.s32.totalorder %s3327_s9, 0 }
  0xc9   : > { %s3044_s18 = sand.u32 (!%p3339_p1), 1, %s2627_s25  }
  0xca   : > { %330 = sbr.rel (%p3339_p1) target bundleno = 4582 (0x11e6), region = 48  ;;  %s1740_s3 = sshll.u32 (!%p3339_p1), %s3044_s18, 3 }
  0xcb   : > { %s333_s30 = scalar_lea.sflag (!%p3339_p1), [#allocation6], %s3044_s18  ;;  %s336_s10 = scalar_lea.vmem (!%p3339_p1), [#allocation5], %s1740_s3 }
  0xd1   : > { %2602 = dma.done.wait (%p2985_p11), %s333_s30, 128  }
  0xd2   : > { %2604 = vsyncadd (%p2985_p11), %s333_s30, 4294967168  ;;  %p3340_p12 = scmp.ne.s32.totalorder %s3326_s8, 0 }
  0xd4   : > { %2606 = dma.done.wait (%p3340_p12), [#allocation9], 272  }
  0xd5   : > { %2608 = vsyncadd (%p3340_p12), [#allocation9], 4294967024 }
  0xd6   : > { %2610 = dma.done.wait (%p3340_p12), [#allocation12], 272  }
  0xd7   : > { %2612 = vsyncadd (%p3340_p12), [#allocation12], 4294967024 }
  0xd8   : > { %2614 = dma.done.wait (%p3340_p12), [#allocation15], 1280  }
  0xd9   : > { %2616 = vsyncadd (%p3340_p12), [#allocation15], 4294966016  ;;  %vm400_vm0 = vcmask 261120   ;;  %v3066_v0 = vld [vmem:[#allocation13] ss:$0 sm:$0xff]  ;;  %v3068_v1 = vld [vmem:[%s336_s10] sm:$0xff]  ;;  %v410_v8 = vlaneseq }
  0xda   : > { %v399_v2 = vmul.f32 %v3068_v1, %v3068_v1  ;;  %v2229_v3 = vld [vmem:[#allocation10] sm:$0xff]   ;;  %s2718_s9 = smov 96   ;;  %v2230_v5 = vld [vmem:[#allocation10 + $0x8] sm:$0xff]   ;;  %s2719_s8 = smov 64   ;;  %v2720_v9 = vmov 0.0   ;;  %vm2721_vm1 = vmmov 0  }
  0xdb   : > { %431 = vrot.lane.b32.xlu1 %v2229_v3, %s2718_s9  ;;  %v2232_v6 = vld [vmem:[#allocation10 + $0x8] sm:$0xff]   ;;  %v2231_v7 = vld [vmem:[#allocation10] sm:$0xff]   ;;  %1850 = vmatprep.subr.bf16.mxu0 %v2720_v9  ;;  %v3075_v10 = vshrl.u32 %v410_v8, 7  ;;  %v1809_v22 = vld [vmem:[#allocation8] ss:$0 sm:$0xff]  ;;  %v3092_v32 = vand.u32 127, %v410_v8 }
  0xdc   : > { %v401_v4 = vsel %vm400_vm0, %v399_v2, 0.0  ;;  %1858 = vmatprep.subr.bf16.mxu1 %v2720_v9  ;;  %1854 = vmatprep.mubr.msk.bf16.mxu0 %vm2721_vm1, %v2720_v9  ;;  %v2233_v26 = vld [vmem:[#allocation10] sm:$0xff]   ;;  %v2234_v30 = vld [vmem:[#allocation10 + $0x8] sm:$0xff]   ;;  %vm481_vm2 = vcmask 257024   ;;  %s3098_s14 = scalar_lea.vmem [#allocation17], %s1740_s3  ;;  %v3100_v48 = vmov 0.0  }
  0xdd   : > { %402 = vadd.xlane.f32.xlu0 %v401_v4  ;;  %1862 = vmatprep.mubr.msk.bf16.mxu1 %vm2721_vm1, %v2720_v9  ;;  %v3102_v49 = vmov 0.0   ;;  %v3104_v50 = vmov -inf   ;;  %s3106_s21 = smov 0  }
  0xdf   : > { %433 = vrot.lane.b32.xlu1 %v2230_v5, %s2718_s9 }
  0xe1   : > { %551 = vadd.xlane.f32.xlu0 %v401_v4 }
  0xe3   : > { %499 = vrot.lane.b32.xlu1 %v2232_v6, %s2719_s8 }
  0xf7   : > { %497 = vrot.lane.b32.xlu0 %v2231_v7, %s2719_s8 }
 0x14d   : > { %v432_v11 = vpop.permute.xlu1 %431 }
 0x14e   : > { %1851 = vmatpush3.bf16.msra.mxu0 %v432_v11 }
 0x14f   : > { %1852 = vmatprep.subr.bf16.mxu0 %v2720_v9 }
 0x151   : > { %v434_v12 = vpop.permute.xlu1 %433 }
 0x152   : > { %1853 = vmatpush3.bf16.msra.mxu0 %v434_v12 }
 0x153   : > { %1866 = vmatprep.subr.bf16.mxu0 %v2720_v9 }
 0x155   : > { %v500_v20 = vpop.permute.xlu1 %499 }
 0x16a   : > { %v403_v13 = vpop.xlane.xlu0 %402 }
 0x16b   : > { %v405_v14 = vmul.f32 0.03125, %v403_v13 }
 0x16d   : > { %v406_v15 = vadd.f32 1.1920929e-07, %v405_v14 }
 0x16e   : > { %v552_v16 = vpop.xlane.xlu0 %551 }
 0x16f   : > { %2235 = vrsqrt.f32 %v406_v15  ;;  %v554_v17 = vmul.f32 0.03125, %v552_v16 }
 0x171   : > { %v555_v18 = vadd.f32 1.1920929e-07, %v554_v17 }
 0x172   : > { %v498_v19 = vpop.permute.xlu0 %497 }
 0x173   : > { %2237 = vrsqrt.f32 %v555_v18  ;;  %1859 = vmatpush3.bf16.msra.mxu1 %v498_v19 }
 0x174   : > { %1860 = vmatprep.subr.bf16.mxu1 %v2720_v9 }
 0x177   : > { %1861 = vmatpush3.bf16.msra.mxu1 %v500_v20 }
 0x179   : > { %v2236_v21 = vpop.eup %2235 }
 0x17a   : > { %v408_v23 = vmul.f32 %v2236_v21, %v3068_v1 }
 0x17c   : > { %v415_v24 = vmul.f32 %v1809_v22, %v408_v23 }
 0x17d   : > { %v2238_v25 = vpop.eup %2237 }
 0x17e   : > { %v416_v27 = vpack.c.bf16 %v415_v24, %v415_v24  ;;  %v557_v28 = vmul.f32 %v2238_v25, %v3068_v1 }
 0x180   : > { %1855 = vmatmul.mubr.msk.bf16.vlgmr.msra.gmra.mrb[0].mxu0 %vm400_vm0, %v416_v27  ;;  %v564_v29 = vmul.f32 %v1809_v22, %v557_v28  ;;  %1863 = vmatmul.mubr.msk.bf16.vlgmr.msra.gmra.mrb[0].mxu1 %vm400_vm0, %v416_v27 }
 0x181   : > { %1867 = vmatpush3.bf16.msra.mxu0 %v2233_v26  ;;  %1870 = vmatprep.mubr.msk.bf16.mxu0 %vm2721_vm1, %v2720_v9 }
 0x182   : > { %1868 = vmatprep.subr.bf16.mxu0 %v2720_v9  ;;  %v565_v31 = vpack.c.bf16 %v564_v29, %v564_v29 }
 0x185   : > { %1869 = vmatpush3.bf16.msra.mxu0 %v2234_v30 }
 0x188   : > { %1871 = vmatmul.mubr.msk.bf16.vlgmr.msra.gmra.mrb[4].mxu0 %vm400_vm0, %v565_v31 }
 0x253   : > { %v474_v33 = vpop.f32.mrb[0].mxu0  ;;  %v537_v34 = vpop.f32.mrb[0].mxu1 }
 0x254   : > { %v480_v35 = vpack.c.bf16 %v474_v33, %v474_v33  ;;  %v543_v36 = vpack.c.bf16 %v537_v34, %v537_v34  ;;  %v1856_v37 = vpop.f32.mrb[1].mxu0  ;;  %v1864_v38 = vpop.f32.mrb[1].mxu1 }
 0x255   : > { %v477_v39 = vpop.f32.mrb[2].mxu0  ;;  %v540_v40 = vpop.f32.mrb[2].mxu1 }
 0x256   : > { %482 = vst.msk [vmem:[#allocation2] sm:$0xf] %vm481_vm2, %v480_v35  ;;  %544 = vst.msk [vmem:[#allocation3] sm:$0xf] %vm481_vm2, %v543_v36  ;;  %v1857_v41 = vpop.f32.mrb[3].mxu0  ;;  %v1865_v42 = vpop.f32.mrb[3].mxu1 }
 0x25b   : > { %v619_v43 = vpop.f32.mrb[4].mxu0 }
 0x25c   : > { %v3094_v44 = vpack.c.bf16 %v619_v43, %v619_v43  ;;  %v1872_v45 = vpop.f32.mrb[5].mxu0 }
 0x25d   : > { %v622_v46 = vpop.f32.mrb[6].mxu0 }
 0x25e   : > { %v1873_v47 = vpop.f32.mrb[7].mxu0 }
 0x25f LB: >> { %v2722_v51 = vmov 0.0   ;;  %vm2723_vm3 = vmmov 0   ;;  %s1757_s12 = sshll.u32 %s2659_s21, 3  ;;  %vm649_vm4 = vcmask 64512   ;;  %vm722_vm6 = vcmask 1043456   ;;  %s634_s21 = sadd.s32 1, %s2659_s21   ;;  %s2659_s21 = sphi %s3106_s21, %s634_s21   ;;  %v2655_v50 = vphi %v3104_v50, %v3343_v50   ;;  %v2651_v49 = vphi %v3102_v49, %v3342_v49   ;;  %v2647_v48 = vphi %v3100_v48, %v3341_v48  }
 0x260   : >> { %1874 = vmatprep.subr.bf16.mxu0 %v2722_v51  ;;  %1876 = vmatprep.mubr.msk.bf16.mxu0 %vm2723_vm3, %v2722_v51  ;;  %s641_s1 = sshra.s32 %s1757_s12, 3  ;;  %v698_v54 = vstv %s1757_s12  ;;  %p633_p11 = scmp.ge.s32.totalorder %s634_s21, 1 }
 0x261   : >> { %1880 = vmatprep.subr.bf16.mxu1 %v2722_v51  ;;  %1882 = vmatprep.mubr.msk.bf16.mxu1 %vm2723_vm3, %v2722_v51  ;;  %s1758_s17 = sshll.u32 %s641_s1, 2  ;;  %v699_v55 = vadd.s32 %v698_v54, %v3092_v32  ;;  %vm770_vm7 = vcmask (%p633_p11), 60416   ;;  %v3133_v26 = vmov (%p633_p11), 0.0   ;;  %v3135_v27 = vmov (%p633_p11), 0.0   ;;  %s3139_s11 = smov (%p633_p11), 0  }
 0x262   : >> { %s644_s15 = scalar_lea.vmem [#allocation2], %s1758_s17  ;;  %s647_s16 = scalar_lea.vmem [#allocation3], %s1758_s17  ;;  %v3137_v28 = vmov (%p633_p11), -inf  }
 0x263   : >> { %v645_v52 = vld [vmem:[%s644_s15] sm:$0xf]  ;;  %vm700_vm5 = vcmp.ge.s32.totalorder %v3075_v10, %v699_v55 }
 0x264   : >> { %v654_v53 = vsel %vm649_vm4, %v645_v52, 0  ;;  %v648_v62 = vld [vmem:[%s647_s16] sm:$0xf] }
 0x265   : >> { %1875 = vmatpush3.bf16.xpose.msra.mxu0 %v654_v53  ;;  %v724_v63 = vsel %vm722_vm6, %v648_v62, 0 }
 0x266   : >> { %1881 = vmatpush3.bf16.msra.mxu1 %v724_v63 }
 0x26c   : >> { %1877 = vmatmul.mubr.msk.bf16.vlgmr.msra.gmra.mrb[0].mxu0 %vm649_vm4, %v3094_v44 }
 0x33f   : >> { %v690_v56 = vpop.f32.mrb[0].mxu0 }
 0x340   : >> { %v701_v57 = vsel %vm700_vm5, %v690_v56, -1e+30  ;;  %v1878_v58 = vpop.f32.mrb[1].mxu0 }
 0x341   : >> { %v693_v59 = vpop.f32.mrb[2].mxu0  ;;  %v702_v60 = vsel %vm649_vm4, %v701_v57, -inf }
 0x342   : >> { %703 = vmax.xlane.f32.xlu0 %v702_v60  ;;  %v1879_v61 = vpop.f32.mrb[3].mxu0 }
 0x3cf   : >> { %v704_v2 = vpop.xlane.xlu0 %703 }
 0x3d0   : >> { %v705_v3 = vmax.f32 %v2655_v50, %v704_v2  }
 0x3d2   : >> { %v706_v4 = vsub.f32 %v701_v57, %v705_v3  ;;  %v709_v5 = vsub.f32 %v2655_v50, %v705_v3  ;;  %v3343_v50 = vmov %v705_v3 }
 0x3d4   : >> { %v707_v6 = vmul.f32 1.442695, %v706_v4  ;;  %v710_v12 = vmul.f32 1.442695, %v709_v5 }
 0x3d6   : >> { %2239 = vpow2.f32 %v707_v6 }
 0x3d7   : >> { %2241 = vpow2.f32 %v710_v12 }
 0x3e0   : >> { %v2240_v7 = vpop.eup %2239 }
 0x3e1   : >> { %v713_v8 = vsel %vm649_vm4, %v2240_v7, 0.0  ;;  %v718_v11 = vpack.c.bf16 %v2240_v7, %v2240_v7  ;;  %v2242_v13 = vpop.eup %2241 }
 0x3e2   : >> { %714 = vadd.xlane.f32.xlu0 %v713_v8  ;;  %v712_v14 = vmul.f32 %v2651_v49, %v2242_v13  ;;  %v717_v17 = vmul.f32 %v2647_v48, %v2242_v13 }
 0x3e3   : >> { %1883 = vmatmul.mubr.msk.bf16.vlgmr.msra.gmra.mrb[0].mxu1 %vm649_vm4, %v718_v11 }
 0x46f   : >> { %v715_v15 = vpop.xlane.xlu0 %714 }
 0x470   : >> { %v716_v16 = vadd.f32 %v715_v15, %v712_v14  }
 0x472   : >> { %v3342_v49 = vmov %v716_v16  ;;  %2243 = vrcp.f32 (%p633_p11), %v716_v16 }
 0x47c   : > { %v2244_v23 = vpop.eup (%p633_p11), %2243 }
 0x4b3   : > { %636 = sbr.rel (!%p633_p11) target bundleno = 607 (0x25f), region = 158 }
 0x4b6   : >> { %v760_v18 = vpop.f32.mrb[0].mxu1 }
 0x4b7   : >> { %v766_v19 = vadd.f32 %v760_v18, %v717_v17   ;;  %v1884_v20 = vpop.f32.mrb[1].mxu1 }
 0x4b8   : >> { %v763_v21 = vpop.f32.mrb[2].mxu1 }
 0x4b9   : >> { %v1885_v22 = vpop.f32.mrb[3].mxu1  ;;  %v3341_v48 = vmov %v766_v19  ;;  %v768_v24 = vmul.f32 (%p633_p11), %v2244_v23, %v766_v19 }
 0x4bb   : > { %v769_v25 = vpack.c.bf16 %v768_v24, %v768_v24 }
 0x4bd   : > { %771 = vst.msk [vmem:[#allocation4] sm:$0xf] %vm770_vm7, %v769_v25 }
 0x4be LB: >> { %v2724_v29 = vmov 0.0   ;;  %vm2725_vm8 = vmmov 0   ;;  %s1762_s19 = sshll.u32 %s2675_s11, 3  ;;  %s2726_s8 = smov 120   ;;  %s2675_s11 = sphi %s3139_s11, %s775_s11   ;;  %v2671_v28 = vphi %v3137_v28, %v3346_v28   ;;  %v2667_v27 = vphi %v3135_v27, %v3345_v27   ;;  %v2663_v26 = vphi %v3133_v26, %v3344_v26  }
 0x4bf   : >> { %1886 = vmatprep.subr.bf16.mxu0 %v2724_v29  ;;  %1888 = vmatprep.mubr.msk.bf16.mxu0 %vm2725_vm8, %v2724_v29  ;;  %s782_s3 = sshra.s32 %s1762_s19, 3  ;;  %v847_v35 = vstv %s1762_s19  ;;  %s775_s11 = sadd.s32 1, %s2675_s11  }
 0x4c0   : >> { %1892 = vmatprep.subr.bf16.mxu1 %v2724_v29  ;;  %1894 = vmatprep.mubr.msk.bf16.mxu1 %vm2725_vm8, %v2724_v29  ;;  %s1763_s30 = sshll.u32 %s782_s3, 2  ;;  %v848_v36 = vadd.s32 %v847_v35, %v3092_v32  ;;  %p774_p0 = scmp.ge.s32.totalorder %s775_s11, 1 }
 0x4c1   : >> { %s785_s10 = scalar_lea.vmem [#allocation2], %s1763_s30  ;;  %s788_s9 = scalar_lea.vmem [#allocation3], %s1763_s30  ;;  %vm930_vm10 = vcmask (%p774_p0), 126016   ;;  %v3166_v8 = vmov (%p774_p0), 0.0   ;;  %v3168_v11 = vmov (%p774_p0), 0.0   ;;  %v3170_v12 = vmov (%p774_p0), -inf  }
 0x4c2   : >> { %v2245_v30 = vld [vmem:[%s785_s10] ss:$0 sps:$4 sm:$0xff]   ;;  %vm849_vm9 = vcmp.ge.s32.totalorder %v3075_v10, %v848_v36  ;;  %s2727_s21 = smov (%p774_p0), 8   ;;  %s3172_s12 = smov (%p774_p0), 0  }
 0x4c3   : >> { %796 = vrot.lane.b32.xlu0 %v2245_v30, %s2726_s8  ;;  %v2246_v43 = vld [vmem:[%s788_s9] ss:$0 sps:$4 sm:$0xff]  }
 0x4c7   : >> { %791 = vrot.lane.b32.xlu0 %v3094_v44, %s2726_s8 }
 0x535   : >> { %v797_v31 = vpop.permute.xlu0 %796 }
 0x536   : >> { %v803_v33 = vsel %vm649_vm4, %v797_v31, 0 }
 0x537   : >> { %1887 = vmatpush3.bf16.xpose.msra.mxu0 %v803_v33 }
 0x539   : >> { %v792_v34 = vpop.permute.xlu0 %791 }
 0x53e   : >> { %1889 = vmatmul.mubr.msk.bf16.vlgmr.msra.gmra.mrb[0].mxu0 %vm649_vm4, %v792_v34 }
 0x611   : >> { %v839_v37 = vpop.f32.mrb[0].mxu0 }
 0x612   : >> { %v850_v38 = vsel %vm849_vm9, %v839_v37, -1e+30  ;;  %v1890_v39 = vpop.f32.mrb[1].mxu0 }
 0x613   : >> { %v842_v40 = vpop.f32.mrb[2].mxu0  ;;  %v851_v41 = vsel %vm649_vm4, %v850_v38, -inf }
 0x614   : >> { %852 = vmax.xlane.f32.xlu1 %v851_v41  ;;  %v1891_v42 = vpop.f32.mrb[3].mxu0 }
 0x625   : >> { %871 = vrot.lane.b32.xlu1 %v2246_v43, %s2726_s8 }
 0x6a1   : >> { %v853_v45 = vpop.xlane.xlu1 %852 }
 0x6a2   : >> { %v854_v46 = vmax.f32 %v2671_v28, %v853_v45  }
 0x6a4   : >> { %v855_v47 = vsub.f32 %v850_v38, %v854_v46  ;;  %v858_v48 = vsub.f32 %v2671_v28, %v854_v46  ;;  %v3346_v28 = vmov %v854_v46 }
 0x6a5   : >> { %v872_v49 = vpop.permute.xlu1 %871 }
 0x6a6   : >> { %v856_v50 = vmul.f32 1.442695, %v855_v47  ;;  %v878_v51 = vsel %vm722_vm6, %v872_v49, 0  ;;  %v859_v55 = vmul.f32 1.442695, %v858_v48 }
 0x6a7   : >> { %1893 = vmatpush3.bf16.msra.mxu1 %v878_v51 }
 0x6a8   : >> { %2247 = vpow2.f32 %v856_v50 }
 0x6a9   : >> { %2249 = vpow2.f32 %v859_v55 }
 0x6b2   : >> { %v2248_v52 = vpop.eup %2247 }
 0x6b3   : >> { %v862_v53 = vsel %vm649_vm4, %v2248_v52, 0.0  ;;  %v867_v54 = vpack.c.bf16 %v2248_v52, %v2248_v52  ;;  %v2250_v56 = vpop.eup %2249 }
 0x6b4   : >> { %863 = vadd.xlane.f32.xlu0 %v862_v53  ;;  %v861_v57 = vmul.f32 %v2667_v27, %v2250_v56  ;;  %v866_v60 = vmul.f32 %v2663_v26, %v2250_v56 }
 0x6b5   : >> { %1895 = vmatmul.mubr.msk.bf16.vlgmr.msra.gmra.mrb[0].mxu1 %vm649_vm4, %v867_v54 }
 0x741   : >> { %v864_v58 = vpop.xlane.xlu0 %863 }
 0x742   : >> { %v865_v59 = vadd.f32 %v864_v58, %v861_v57  }
 0x744   : >> { %v3345_v27 = vmov %v865_v59  ;;  %2251 = vrcp.f32 (%p774_p0), %v865_v59 }
 0x74e   : > { %v2252_v4 = vpop.eup (%p774_p0), %2251 }
 0x785   : > { %777 = sbr.rel (!%p774_p0) target bundleno = 1214 (0x4be), region = 169 }
 0x788   : >> { %v914_v61 = vpop.f32.mrb[0].mxu1 }
 0x789   : >> { %v920_v62 = vadd.f32 %v914_v61, %v866_v60   ;;  %v1896_v63 = vpop.f32.mrb[1].mxu1 }
 0x78a   : >> { %v917_v2 = vpop.f32.mrb[2].mxu1 }
 0x78b   : >> { %v1897_v3 = vpop.f32.mrb[3].mxu1  ;;  %v3344_v26 = vmov %v920_v62  ;;  %v922_v5 = vmul.f32 (%p774_p0), %v2252_v4, %v920_v62 }
 0x78d   : > { %v1806_v6 = vpack.c.bf16 %v922_v5, %v922_v5 }
 0x78f   : > { %927 = vrot.lane.b32.xlu0 %v1806_v6, %s2727_s21 }
 0x801   : > { %v928_v7 = vpop.permute.xlu0 %927 }
 0x802   : > { %931 = vst.msk [vmem:[#allocation4] sm:$0xf] %vm930_vm10, %v928_v7 }
 0x803 LB: >> { %v2728_v13 = vmov 0.0   ;;  %vm2729_vm11 = vmmov 0   ;;  %s1770_s1 = sshll.u32 %s2691_s12, 3  ;;  %s2730_s19 = smov 112   ;;  %s2691_s12 = sphi %s3172_s12, %s935_s12   ;;  %v2687_v12 = vphi %v3170_v12, %v3349_v12   ;;  %v2683_v11 = vphi %v3168_v11, %v3348_v11   ;;  %v2679_v8 = vphi %v3166_v8, %v3347_v8  }
 0x804   : >> { %1898 = vmatprep.subr.bf16.mxu0 %v2728_v13  ;;  %1900 = vmatprep.mubr.msk.bf16.mxu0 %vm2729_vm11, %v2728_v13  ;;  %s942_s17 = sshra.s32 %s1770_s1, 3  ;;  %v1007_v18 = vstv %s1770_s1  ;;  %s935_s12 = sadd.s32 1, %s2691_s12  }
 0x805   : >> { %1904 = vmatprep.subr.bf16.mxu1 %v2728_v13  ;;  %1906 = vmatprep.mubr.msk.bf16.mxu1 %vm2729_vm11, %v2728_v13  ;;  %s1771_s15 = sshll.u32 %s942_s17, 2  ;;  %v1008_v19 = vadd.s32 %v1007_v18, %v3092_v32  ;;  %p934_p5 = scmp.ge.s32.totalorder %s935_s12, 1 }
 0x806   : >> { %s945_s16 = scalar_lea.vmem [#allocation2], %s1771_s15  ;;  %s948_s11 = scalar_lea.vmem [#allocation3], %s1771_s15  ;;  %vm1090_vm13 = vcmask (%p934_p5), 191616   ;;  %v3199_v54 = vmov (%p934_p5), 0.0   ;;  %v3201_v55 = vmov (%p934_p5), 0.0   ;;  %v3203_v56 = vmov (%p934_p5), -inf  }
 0x807   : >> { %v2253_v14 = vld [vmem:[%s945_s16] ss:$0 sps:$4 sm:$0xff]   ;;  %vm1009_vm12 = vcmp.ge.s32.totalorder %v3075_v10, %v1008_v19  ;;  %s2731_s3 = smov (%p934_p5), 16   ;;  %s3205_s30 = smov (%p934_p5), 0  }
 0x808   : >> { %956 = vrot.lane.b32.xlu0 %v2253_v14, %s2730_s19  ;;  %v2254_v26 = vld [vmem:[%s948_s11] ss:$0 sps:$4 sm:$0xff]  }
 0x80c   : >> { %951 = vrot.lane.b32.xlu0 %v3094_v44, %s2730_s19 }
 0x87a   : >> { %v957_v15 = vpop.permute.xlu0 %956 }
 0x87b   : >> { %v963_v16 = vsel %vm649_vm4, %v957_v15, 0 }
 0x87c   : >> { %1899 = vmatpush3.bf16.xpose.msra.mxu0 %v963_v16 }
 0x87e   : >> { %v952_v17 = vpop.permute.xlu0 %951 }
 0x883   : >> { %1901 = vmatmul.mubr.msk.bf16.vlgmr.msra.gmra.mrb[0].mxu0 %vm649_vm4, %v952_v17 }
 0x956   : >> { %v999_v20 = vpop.f32.mrb[0].mxu0 }
 0x957   : >> { %v1010_v21 = vsel %vm1009_vm12, %v999_v20, -1e+30  ;;  %v1902_v22 = vpop.f32.mrb[1].mxu0 }
 0x958   : >> { %v1002_v23 = vpop.f32.mrb[2].mxu0  ;;  %v1011_v24 = vsel %vm649_vm4, %v1010_v21, -inf }
 0x959   : >> { %1012 = vmax.xlane.f32.xlu1 %v1011_v24  ;;  %v1903_v25 = vpop.f32.mrb[3].mxu0 }
 0x96a   : >> { %1031 = vrot.lane.b32.xlu1 %v2254_v26, %s2730_s19 }
 0x9e6   : >> { %v1013_v27 = vpop.xlane.xlu1 %1012 }
 0x9e7   : >> { %v1014_v28 = vmax.f32 %v2687_v12, %v1013_v27  }
 0x9e9   : >> { %v1015_v29 = vsub.f32 %v1010_v21, %v1014_v28  ;;  %v1018_v30 = vsub.f32 %v2687_v12, %v1014_v28  ;;  %v3349_v12 = vmov %v1014_v28 }
 0x9ea   : >> { %v1032_v31 = vpop.permute.xlu1 %1031 }
 0x9eb   : >> { %v1016_v33 = vmul.f32 1.442695, %v1015_v29  ;;  %v1038_v34 = vsel %vm722_vm6, %v1032_v31, 0  ;;  %v1019_v38 = vmul.f32 1.442695, %v1018_v30 }
 0x9ec   : >> { %1905 = vmatpush3.bf16.msra.mxu1 %v1038_v34 }
 0x9ed   : >> { %2255 = vpow2.f32 %v1016_v33 }
 0x9ee   : >> { %2257 = vpow2.f32 %v1019_v38 }
 0x9f7   : >> { %v2256_v35 = vpop.eup %2255 }
 0x9f8   : >> { %v1022_v36 = vsel %vm649_vm4, %v2256_v35, 0.0  ;;  %v1027_v37 = vpack.c.bf16 %v2256_v35, %v2256_v35  ;;  %v2258_v39 = vpop.eup %2257 }
 0x9f9   : >> { %1023 = vadd.xlane.f32.xlu0 %v1022_v36  ;;  %v1021_v40 = vmul.f32 %v2683_v11, %v2258_v39  ;;  %v1026_v43 = vmul.f32 %v2679_v8, %v2258_v39 }
 0x9fa   : >> { %1907 = vmatmul.mubr.msk.bf16.vlgmr.msra.gmra.mrb[0].mxu1 %vm649_vm4, %v1027_v37 }
 0xa86   : >> { %v1024_v41 = vpop.xlane.xlu0 %1023 }
 0xa87   : >> { %v1025_v42 = vadd.f32 %v1024_v41, %v1021_v40  }
 0xa89   : >> { %v3348_v11 = vmov %v1025_v42  ;;  %2259 = vrcp.f32 (%p934_p5), %v1025_v42 }
 0xa93   : > { %v2260_v50 = vpop.eup (%p934_p5), %2259 }
 0xaca   : > { %937 = sbr.rel (!%p934_p5) target bundleno = 2051 (0x803), region = 180 }
 0xacd   : >> { %v1074_v45 = vpop.f32.mrb[0].mxu1 }
 0xace   : >> { %v1080_v46 = vadd.f32 %v1074_v45, %v1026_v43   ;;  %v1908_v47 = vpop.f32.mrb[1].mxu1 }
 0xacf   : >> { %v1077_v48 = vpop.f32.mrb[2].mxu1 }
 0xad0   : >> { %v1909_v49 = vpop.f32.mrb[3].mxu1  ;;  %v3347_v8 = vmov %v1080_v46  ;;  %v1082_v51 = vmul.f32 (%p934_p5), %v2260_v50, %v1080_v46 }
 0xad2   : > { %v1807_v52 = vpack.c.bf16 %v1082_v51, %v1082_v51 }
 0xad4   : > { %1087 = vrot.lane.b32.xlu0 %v1807_v52, %s2731_s3 }
 0xb46   : > { %v1088_v53 = vpop.permute.xlu0 %1087 }
 0xb47   : > { %1091 = vst.msk [vmem:[#allocation4] sm:$0xf] %vm1090_vm13, %v1088_v53 }
 0xb48 LB: >> { %v2732_v57 = vmov 0.0   ;;  %vm2733_vm14 = vmmov 0   ;;  %s1778_s10 = sshll.u32 %s2707_s30, 3  ;;  %s2734_s1 = smov 104   ;;  %s2707_s30 = sphi %s3205_s30, %s1095_s30   ;;  %v2703_v56 = vphi %v3203_v56, %v3352_v56   ;;  %v2699_v55 = vphi %v3201_v55, %v3351_v55   ;;  %v2695_v54 = vphi %v3199_v54, %v3350_v54  }
 0xb49   : >> { %1910 = vmatprep.subr.bf16.mxu0 %v2732_v57  ;;  %1912 = vmatprep.mubr.msk.bf16.mxu0 %vm2733_vm14, %v2732_v57  ;;  %s1102_s9 = sshra.s32 %s1778_s10, 3  ;;  %v1167_v62 = vstv %s1778_s10  ;;  %s1095_s30 = sadd.s32 1, %s2707_s30  }
 0xb4a   : >> { %1916 = vmatprep.subr.bf16.mxu1 %v2732_v57  ;;  %1918 = vmatprep.mubr.msk.bf16.mxu1 %vm2733_vm14, %v2732_v57  ;;  %s1779_s8 = sshll.u32 %s1102_s9, 2  ;;  %v1168_v63 = vadd.s32 %v1167_v62, %v3092_v32  ;;  %p1094_p7 = scmp.ge.s32.totalorder %s1095_s30, 1 }
 0xb4b   : >> { %s1105_s21 = scalar_lea.vmem [#allocation2], %s1779_s8  ;;  %s1108_s12 = scalar_lea.vmem [#allocation3], %s1779_s8  ;;  %v2267_v33 = vld [vmem:[#allocation11] sm:$0xff] (%p1094_p7)   ;;  %v2268_v34 = vld [vmem:[#allocation11 + $0x8] sm:$0xff] (%p1094_p7)   ;;  %vm1250_vm2 = vcmask (%p1094_p7), 257216   ;;  %v2269_v45 = vld [vmem:[#allocation14] sm:$0xff] (%p1094_p7)  }
 0xb4c   : >> { %v2261_v58 = vld [vmem:[%s1105_s21] ss:$0 sps:$4 sm:$0xff]   ;;  %vm1169_vm15 = vcmp.ge.s32.totalorder %v3075_v10, %v1168_v63  ;;  %s2735_s17 = smov (%p1094_p7), 24   ;;  %v2270_v46 = vld [vmem:[#allocation14 + $0x8] sm:$0xff] (%p1094_p7)   ;;  %v2271_v53 = vld [vmem:[#allocation16] sm:$0xff] (%p1094_p7)   ;;  %s1803_s15 = sshll.u32 (%p1094_p7), %s2635_s27, 7 }
 0xb4d   : >> { %1116 = vrot.lane.b32.xlu0 %v2261_v58, %s2734_s1  ;;  %v2262_v8 = vld [vmem:[%s1108_s12] ss:$0 sps:$4 sm:$0xff]   ;;  %v2276_v57 = vld [vmem:[#allocation16 + $0x28] sm:$0xff] (%p1094_p7)   ;;  %s1517_s16 = sshll.u32 (%p1094_p7), %s3098_s14, 4  ;;  %s3260_s3 = scalar_lea.hbm (%p1094_p7), %s3318_s7, %s1803_s15  ;;  %s3262_s16 = int_to_ptr.vmem [resolvable:$true] %s1517_s16 }
 0xb4e   : > { %v2277_v58 = vld [vmem:[#allocation16 + $0x30] sm:$0xff] (%p1094_p7)   ;;  %s1503_s30 = scalar_lea.sflag (%p1094_p7), [#allocation7], %s3044_s18  ;;  %s2485_s27 = scalar_lea.vmem (%p1094_p7), %s3262_s16, 128 }
 0xb4f   : > { %p2486_p10 = scmp.ne.s32.totalorder (%p1094_p7), %s3262_s16, %s2485_s27  ;;  %p3353_p13 = scmp.ne.s32.totalorder (%p1094_p7), %s3336_s20, 0 }
 0xb50   : > { %s2736_s10 = smov (%p1094_p7), [#allocation17]  }
 0xb51   : >> { %1111 = vrot.lane.b32.xlu0 %v3094_v44, %s2734_s1  ;;  %p2487_p2 = pnand (%p1094_p7), %p2486_p10, %p3353_p13  ;;  %s2489_s9 = sshll.u32 (%p1094_p7), %s2736_s10, 4  ;;  %s2490_s9 = int_to_ptr.vmem [resolvable:$false] %s2489_s9 }
 0xb52   : > { %s2491_s8 = scalar_lea.vmem (%p1094_p7), %s2490_s9, 256  ;;  %p2492_p9 = scmp.lt.s32.totalorder (%p1094_p7), %s3262_s16, %s2490_s9 }
 0xb53   : > { %p2488_p8 = pneg (%p1094_p7), %p2487_p2  ;;  %p2493_p4 = scmp.lt.s32.totalorder (%p1094_p7), %s2491_s8, %s2485_s27 }
 0xb55   : > { %p2494_p6 = por (%p1094_p7), %p2493_p4, %p2492_p9 }
 0xb57   : > { %p2495_p3 = pnand (%p1094_p7), %p2494_p6, %p2488_p8 }
 0xbbf   : >> { %v1117_v59 = vpop.permute.xlu0 %1116 }
 0xbc0   : >> { %v1123_v60 = vsel %vm649_vm4, %v1117_v59, 0  ;;  %v2278_v59 = vld [vmem:[#allocation16 + $0x38] sm:$0xff] (%p1094_p7)  }
 0xbc1   : >> { %1911 = vmatpush3.bf16.xpose.msra.mxu0 %v1123_v60 }
 0xbc2   : > { %1938 = vmatprep.subr.bf16.mxu0 (%p1094_p7), %v2720_v9 }
 0xbc3   : >> { %v1112_v61 = vpop.permute.xlu0 %1111 }
 0xbc8   : >> { %1913 = vmatmul.mubr.msk.bf16.vlgmr.msra.gmra.mrb[0].mxu0 %vm649_vm4, %v1112_v61 }
 0xbc9   : > { %1954 = vmatprep.mubr.msk.bf16.mxu0 (%p1094_p7), %vm2721_vm1, %v2720_v9  ;;  %1939 = vmatpush3.bf16.msra.mxu0 (%p1094_p7), %v2271_v53 }
 0xbca   : > { %1940 = vmatprep.subr.bf16.mxu0 (%p1094_p7), %v2720_v9 }
 0xc9b   : >> { %v1159_v2 = vpop.f32.mrb[0].mxu0 }
 0xc9c   : >> { %v1170_v3 = vsel %vm1169_vm15, %v1159_v2, -1e+30  ;;  %v1914_v4 = vpop.f32.mrb[1].mxu0 }
 0xc9d   : >> { %v1162_v5 = vpop.f32.mrb[2].mxu0  ;;  %v1171_v6 = vsel %vm649_vm4, %v1170_v3, -inf }
 0xc9e   : >> { %1172 = vmax.xlane.f32.xlu1 %v1171_v6  ;;  %v1915_v7 = vpop.f32.mrb[3].mxu0 }
 0xcaf   : >> { %1191 = vrot.lane.b32.xlu1 %v2262_v8, %s2734_s1 }
 0xd2b   : >> { %v1173_v11 = vpop.xlane.xlu1 %1172 }
 0xd2c   : >> { %v1174_v12 = vmax.f32 %v2703_v56, %v1173_v11  }
 0xd2e   : >> { %v1175_v13 = vsub.f32 %v1170_v3, %v1174_v12  ;;  %v1178_v14 = vsub.f32 %v2703_v56, %v1174_v12  ;;  %v3352_v56 = vmov %v1174_v12 }
 0xd2f   : >> { %v1192_v15 = vpop.permute.xlu1 %1191  ;;  %v2274_v56 = vld [vmem:[#allocation16 + $0x18] sm:$0xff] (%p1094_p7)  }
 0xd30   : >> { %v1176_v16 = vmul.f32 1.442695, %v1175_v13  ;;  %v1198_v17 = vsel %vm722_vm6, %v1192_v15, 0  ;;  %v1179_v21 = vmul.f32 1.442695, %v1178_v14 }
 0xd31   : >> { %1917 = vmatpush3.bf16.msra.mxu1 %v1198_v17 }
 0xd32   : >> { %2263 = vpow2.f32 %v1176_v16  ;;  %1922 = vmatprep.subr.bf16.mxu1 (%p1094_p7), %v2720_v9 }
 0xd33   : >> { %2265 = vpow2.f32 %v1179_v21 }
 0xd3c   : >> { %v2264_v18 = vpop.eup %2263 }
 0xd3d   : >> { %v1182_v19 = vsel %vm649_vm4, %v2264_v18, 0.0  ;;  %v1187_v20 = vpack.c.bf16 %v2264_v18, %v2264_v18  ;;  %v2266_v22 = vpop.eup %2265 }
 0xd3e   : >> { %1183 = vadd.xlane.f32.xlu0 %v1182_v19  ;;  %v1181_v23 = vmul.f32 %v2699_v55, %v2266_v22  ;;  %v1186_v26 = vmul.f32 %v2695_v54, %v2266_v22 }
 0xd3f   : >> { %1919 = vmatmul.mubr.msk.bf16.vlgmr.msra.gmra.mrb[0].mxu1 %vm649_vm4, %v1187_v20 }
 0xd40   : > { %1926 = vmatprep.mubr.msk.bf16.mxu1 (%p1094_p7), %vm2721_vm1, %v2720_v9  ;;  %1923 = vmatpush3.bf16.msra.mxu1 (%p1094_p7), %v2267_v33 }
 0xd41   : > { %1924 = vmatprep.subr.bf16.mxu1 (%p1094_p7), %v2720_v9 }
 0xd44   : > { %1925 = vmatpush3.bf16.msra.mxu1 (%p1094_p7), %v2268_v34 }
 0xd45   : > { %1930 = vmatprep.subr.bf16.mxu1 (%p1094_p7), %v2720_v9 }
 0xdcb   : >> { %v1184_v24 = vpop.xlane.xlu0 %1183 }
 0xdcc   : >> { %v1185_v25 = vadd.f32 %v1184_v24, %v1181_v23  }
 0xdce   : >> { %v3351_v55 = vmov %v1185_v25  ;;  %2279 = vrcp.f32 (%p1094_p7), %v1185_v25 }
 0xdcf   : > { %v2273_v55 = vld [vmem:[#allocation16 + $0x10] sm:$0xff] (%p1094_p7)  }
 0xdd8   : > { %v2280_v35 = vpop.eup (%p1094_p7), %2279 }
 0xe0f   : > { %1097 = sbr.rel (!%p1094_p7) target bundleno = 2888 (0xb48), region = 191 }
 0xe12   : >> { %v1234_v27 = vpop.f32.mrb[0].mxu1 }
 0xe13   : >> { %v1240_v28 = vadd.f32 %v1234_v27, %v1186_v26   ;;  %v1920_v29 = vpop.f32.mrb[1].mxu1 }
 0xe14   : >> { %v1237_v30 = vpop.f32.mrb[2].mxu1 }
 0xe15   : >> { %v1921_v31 = vpop.f32.mrb[3].mxu1  ;;  %v3350_v54 = vmov %v1240_v28  ;;  %v1242_v10 = vmul.f32 (%p1094_p7), %v2280_v35, %v1240_v28 }
 0xe16   : > { %v2272_v54 = vld [vmem:[#allocation16 + $0x8] sm:$0xff]  }
 0xe17   : > { %v1808_v32 = vpack.c.bf16 %v1242_v10, %v1242_v10  ;;  %1941 = vmatpush3.bf16.msra.mxu0 %v2272_v54 }
 0xe18   : > { %1942 = vmatprep.subr.bf16.mxu0 %v2720_v9 }
 0xe19   : > { %1247 = vrot.lane.b32.xlu0 %v1808_v32, %s2735_s17 }
 0xe1b   : > { %1943 = vmatpush3.bf16.msra.mxu0 %v2273_v55 }
 0xe1c   : > { %1944 = vmatprep.subr.bf16.mxu0 %v2720_v9 }
 0xe1f   : > { %1945 = vmatpush3.bf16.msra.mxu0 %v2274_v56 }
 0xe20   : > { %1946 = vmatprep.subr.bf16.mxu0 %v2720_v9 }
 0xe8b   : > { %v1248_v44 = vpop.permute.xlu0 %1247 }
 0xe8c   : > { %1251 = vst.msk [vmem:[#allocation4] sm:$0xf] %vm1250_vm2, %v1248_v44 }
 0xe93   : > { %v1252_v36 = vld [vmem:[#allocation4] sm:$0xf] }
 0xe94   : > { %1927 = vmatmul.mubr.msk.bf16.vlgmr.msra.gmra.mrb[0].mxu1 %vm400_vm0, %v1252_v36 }
 0xe95   : > { %1934 = vmatprep.mubr.msk.bf16.mxu1 %vm2721_vm1, %v2720_v9  ;;  %1931 = vmatpush3.bf16.msra.mxu1 %v2269_v45 }
 0xe96   : > { %1932 = vmatprep.subr.bf16.mxu1 %v2720_v9 }
 0xe99   : > { %1933 = vmatpush3.bf16.msra.mxu1 %v2270_v46 }
 0xf67   : > { %v1306_v37 = vpop.f32.mrb[0].mxu1 }
 0xf68   : > { %v1312_v38 = vadd.f32 %v1306_v37, %v3068_v1  ;;  %v1928_v39 = vpop.f32.mrb[1].mxu1 }
 0xf69   : > { %v1309_v40 = vpop.f32.mrb[2].mxu1 }
 0xf6a   : > { %v1929_v41 = vpop.f32.mrb[3].mxu1  ;;  %v1313_v42 = vmul.f32 %v1312_v38, %v1312_v38 }
 0xf6c   : > { %v1314_v43 = vsel %vm400_vm0, %v1313_v42, 0.0 }
 0xf6d   : > { %1315 = vadd.xlane.f32.xlu0 %v1314_v43 }
 0xffa   : > { %v1316_v47 = vpop.xlane.xlu0 %1315 }
 0xffb   : > { %v1317_v48 = vmul.f32 0.03125, %v1316_v47 }
 0xffd   : > { %v1318_v49 = vadd.f32 1.1920929e-07, %v1317_v48 }
 0xfff   : > { %2281 = vrsqrt.f32 %v1318_v49 }
0x1009   : > { %v2282_v50 = vpop.eup %2281 }
0x100a   : > { %v1320_v51 = vmul.f32 %v2282_v50, %v1312_v38 }
0x100c   : > { %v1327_v1 = vmul.f32 %v3066_v0, %v1320_v51  ;;  %v2275_v0 = vld [vmem:[#allocation16 + $0x20] sm:$0xff]  }
0x100d   : > { %1947 = vmatpush3.bf16.msra.mxu0 %v2275_v0 }
0x100e   : > { %v1328_v52 = vpack.c.bf16 %v1327_v1, %v1327_v1  ;;  %1948 = vmatprep.subr.bf16.mxu0 %v2720_v9 }
0x1010   : > { %1935 = vmatmul.mubr.msk.bf16.vlgmr.msra.gmra.mrb[4].mxu1 %vm400_vm0, %v1328_v52 }
0x1011   : > { %1949 = vmatpush3.bf16.msra.mxu0 %v2276_v57 }
0x1012   : > { %1950 = vmatprep.subr.bf16.mxu0 %v2720_v9 }
0x1015   : > { %1951 = vmatpush3.bf16.msra.mxu0 %v2277_v58 }
0x1016   : > { %1952 = vmatprep.subr.bf16.mxu0 %v2720_v9 }
0x1019   : > { %1953 = vmatpush3.bf16.msra.mxu0 %v2278_v59 }
0x10e3   : > { %v1382_v60 = vpop.f32.mrb[4].mxu1 }
0x10e4   : > { %v1793_v61 = vmul.f32 -1.442695, %v1382_v60  ;;  %v1936_v62 = vpop.f32.mrb[5].mxu1 }
0x10e5   : > { %v1385_v63 = vpop.f32.mrb[6].mxu1 }
0x10e6   : > { %2283 = vpow2.f32 %v1793_v61  ;;  %v1937_v2 = vpop.f32.mrb[7].mxu1 }
0x10f0   : > { %v2284_v3 = vpop.eup %2283 }
0x10f1   : > { %v1391_v4 = vadd.f32 1.0, %v2284_v3 }
0x10f3   : > { %2285 = vrcp.f32 %v1391_v4 }
0x10fd   : > { %v2286_v5 = vpop.eup %2285 }
0x10fe   : > { %v1394_v6 = vmul.f32 %v2286_v5, %v1382_v60 }
0x1100   : > { %v1395_v7 = vpack.c.bf16 %v1394_v6, %v1394_v6 }
0x1102   : > { %1955 = vmatmul.mubr.bf16.vlgmr.msra.gmra.mrb[0].mxu0 %v1395_v7 }
0x11d5   : > { %v1494_v9 = vpop.f32.mrb[0].mxu0 }
0x11d6   : > { %v1500_v8 = vadd.f32 %v1494_v9, %v1312_v38  ;;  %v1956_v11 = vpop.f32.mrb[1].mxu0 }
0x11d7   : > { %v1497_v12 = vpop.f32.mrb[2].mxu0 }
0x11d8   : > { %1501 = vst.msk [vmem:[%s3098_s14] sm:$0xff] %vm400_vm0, %v1500_v8  ;;  %v1957_v13 = vpop.f32.mrb[3].mxu0 }
0x11d9   : > { %2498 = shalt.err (!%p2495_p3)
}
0x11da   : > { %s2499_s18 = scalar_lea.hbm %s3260_s3, 128  ;;  %s2503_s12 = scalar_lea.hbm %s3318_s7, 256 }
0x11db   : > { %p2500_p1 = scmp.ne.s32.totalorder %s3260_s3, %s2499_s18  ;;  %p2504_p0 = scmp.lt.u32.totalorder %s3260_s3, %s3318_s7 }
0x11dc   : > { %p2505_p5 = scmp.lt.u32.totalorder %s2503_s12, %s2499_s18  ;;  %p2507_p10 = scmp.lt.u32.totalorder %s2499_s18, %s3260_s3 }
0x11dd   : > { %p2501_p12 = pnand %p2500_p1, %p3353_p13 }
0x11de   : > { %p2506_p7 = por %p2505_p5, %p2504_p0 }
0x11df   : > { %p2502_p11 = pneg %p2501_p12 }
0x11e0   : > { %p2508_p2 = por %p2507_p10, %p2506_p7 }
0x11e2   : > { %p2509_p8 = pnand %p2508_p2, %p2502_p11 }
0x11e4   : > { %2512 = shalt.err (!%p2509_p8)
}
0x11e5   : > { %1984 = dma.vmem_to_hbm [thread:$0]  (%p3353_p13), %s3262_s16, 128, %s3260_s3, %s1503_s30  }
0x11e6 PF: > { %s1529_s15 = sand.u32 1, %s2623_s24   ;;  %p3354_p9 = scmp.ne.s32.totalorder %s3337_s13, 0 }
0x11e7   : > { %p3355_p4 = scmp.ge.s32.totalorder %s2643_s29, 2  ;;  %s1530_s11 = scalar_lea.sflag [#allocation7], %s1529_s15 }
0x11e9   : > { %p2010_p6 = pnand %p3355_p4, %p3354_p9 }
0x11eb   : > { %2618 = dma.done.wait (!%p2010_p6), %s1530_s11, 128  }
0x11ec   : > { %2620 = vsyncadd (!%p2010_p6), %s1530_s11, 4294967168  ;;  %s26_s29 = sadd.s32 1, %s2643_s29   ;;  %s3356_s24 = smov %s2627_s25 }
0x11ed   : > { %p23_p3 = scmp.ge.s32.totalorder %s26_s29, 4   ;;  %s3357_s25 = smov %s2631_s26 }
0x11ee   : > { %s3358_s26 = smov %s2994_s23  ;;  %s3359_s27 = smov %s2639_s28 }
0x11ef   : > { %s3360_s28 = smov %s3362_s22  ;;  %25 = sbr.rel (!%p23_p3) target bundleno = 12 (0xc), region = 202 }
0x11f6   :  { %1535 = vsyncpa [#allocation6], 1 }
0x11f7   :  { %1537 = vsyncpa [#allocation6 + $0x1], 1 }
0x11f8   :  { %1538 = vsyncpa [#allocation9], 1 }
0x11f9   :  { %1539 = vsyncpa [#allocation12], 1 }
0x11fa   :  { %1540 = vsyncpa [#allocation15], 1 }
0x11fb   :  { %1541 = vsyncpa [#allocation7], 1 }
0x11fc   :  { %1543 = vsyncpa [#allocation7 + $0x1], 1 }

// kernel: tpu_custom_call.1
= control target key start
LH: loop header
LB: loop body
LE: loop exit
PB: predicated region body
PF: predicated region fallthrough
CT: control target
= control target key end

     0   :  { %s3311_s0 = inlined_call_operand.hbm [shape: f32[2,8,32], index: 0, kind: input, shape index: {}]   ;;  %s3312_s1 = inlined_call_operand.hbm [shape: f32[1,32], index: 1, kind: input, shape index: {}]   ;;  %s3313_s2 = inlined_call_operand.hbm [shape: bf16[32,96], index: 2, kind: input, shape index: {}]   ;;  %s3314_s3 = inlined_call_operand.hbm [shape: bf16[32,32], index: 3, kind: input, shape index: {}]   ;;  %s3315_s4 = inlined_call_operand.hbm [shape: f32[1,32], index: 4, kind: input, shape index: {}]   ;;  %s3316_s5 = inlined_call_operand.hbm [shape: bf16[32,128], index: 5, kind: input, shape index: {}]   ;;  %s3317_s6 = inlined_call_operand.hbm [shape: bf16[128,32], index: 6, kind: input, shape index: {}]   ;;  %s3318_s7 = inlined_call_operand.hbm [shape: f32[2,8,32], index: 7, kind: output, shape index: {}]  }
   0x1   :  { %3324 = sst [smem:[#allocation23_spill]] %s3312_s1 }
   0x2   :  { %3325 = sst [smem:[#allocation24_spill]] %s3314_s3 }
   0x3   :  { %12 = vsyncpa [#allocation6], 0 }
   0x4   :  { %14 = vsyncpa [#allocation6 + $0x1], 0 }
   0x5   :  { %15 = vsyncpa [#allocation9], 0 }
   0x6   :  { %16 = vsyncpa [#allocation12], 0 }
   0x7   :  { %17 = vsyncpa [#allocation15], 0 }
   0x8   :  { %18 = vsyncpa [#allocation7], 0 }
   0x9   :  { %20 = vsyncpa [#allocation7 + $0x1], 0  ;;  %s2777_s24 = smov 0   ;;  %s2779_s25 = smov 0  }
   0xa   :  { %s2781_s26 = smov 0   ;;  %s2783_s27 = smov 0  }
   0xb   :  { %s2785_s28 = smov 0   ;;  %s2787_s29 = smov 0  }
   0xc LB: > { %s3322_s30 = sadd.s32 4294967295, %s2643_s29   ;;  %p1729_p0 = scmp.ge.s32.totalorder %s2643_s29, 1  ;;  %s2643_s29 = sphi %s2787_s29, %s26_s29   ;;  %s2639_s28 = sphi %s2785_s28, %s3360_s28   ;;  %s2635_s27 = sphi %s2783_s27, %s3359_s27   ;;  %s2631_s26 = sphi %s2781_s26, %s3358_s26   ;;  %s2627_s25 = sphi %s2779_s25, %s3357_s25   ;;  %s2623_s24 = sphi %s2777_s24, %s3356_s24  }
   0xd   : > { %p2811_p1 = scmp.eq.s32.totalorder %s3322_s30, 0  ;;  %p223_p2 = scmp.lt.s32.totalorder %s2643_s29, 3 }
   0xe   : > { %s2709_s10 = smov [#allocation8]   ;;  %s2710_s13 = smov [#allocation11]  }
   0xf   : > { %s3326_s8 = scalar_select %p2811_p1, 1, 0 }
  0x10   : > { %p2816_p3 = pnand %p1729_p0, %p223_p2  ;;  %s236_s11 = sshll.u32 %s2709_s10, 4  ;;  %s237_s11 = int_to_ptr.vmem [resolvable:$true] %s236_s11 }
  0x11   : > { %s259_s14 = sshll.u32 %s2710_s13, 4  ;;  %s2711_s15 = smov [#allocation14]   ;;  %s2829_s14 = int_to_ptr.vmem [resolvable:$true] %s259_s14 }
  0x12   : > { %s3327_s9 = scalar_select %p2816_p3, 1, 0 }
  0x13   : > { %p1986_p5 = pneg %p2816_p3  ;;  %s2831_s16 = sshll.u32 %s2711_s15, 4  ;;  %s284_s16 = int_to_ptr.vmem [resolvable:$true] %s2831_s16 }
  0x14   : > { %s3329_s1 = sld [smem:[#allocation23_spill]] }
  0x15   : > { %p2825_p6 = pnand %p1986_p5, %p2811_p1 }
  0x17   : > { %p2841_p8 = pneg %p2825_p6 }
  0x1a   : > { %s2287_s19 = scalar_lea.hbm %s3329_s1, 16 }
  0x1b   : > { %p2288_p7 = scmp.ne.s32.totalorder %s3329_s1, %s2287_s19  ;;  %p2294_p11 = scmp.lt.u32.totalorder %s2287_s19, %s3329_s1 }
  0x1d   : > { %p2290_p9 = pnand %p2841_p8, %p2288_p7 }
  0x1f   : > { %p2291_p10 = pneg %p2290_p9 }
  0x21   : > { %p2296_p12 = pnand %p2294_p11, %p2291_p10 }
  0x23   : > { %2299 = shalt.err (!%p2296_p12)
}
  0x24   : > { %s2300_s13 = scalar_lea.vmem %s237_s11, 16  ;;  %s2307_s15 = scalar_lea.vmem %s237_s11, 32 }
  0x25   : > { %p2301_p13 = scmp.ne.s32.totalorder %s237_s11, %s2300_s13  ;;  %p2308_p5 = scmp.lt.s32.totalorder %s237_s11, %s237_s11 }
  0x26   : > { %p2309_p4 = scmp.lt.s32.totalorder %s2307_s15, %s2300_s13 }
  0x27   : > { %p2303_p0 = pnand %p2301_p13, %p2841_p8 }
  0x28   : > { %p2310_p3 = por %p2309_p4, %p2308_p5 }
  0x29   : > { %p2304_p2 = pneg %p2303_p0 }
  0x2b   : > { %p2311_p1 = pnand %p2310_p3, %p2304_p2 }
  0x2d   : > { %2314 = shalt.err (!%p2311_p1)
}
  0x2e   : > { %1989 = dma.hbm_to_vmem [thread:$0]  (!%p2825_p6), %s3329_s1, 16, %s237_s11, [#allocation9]  }
  0x2f   : > { %s3331_s3 = sld [smem:[#allocation24_spill]] }
  0x35   : > { %s2315_s21 = scalar_lea.hbm %s3331_s3, 256 }
  0x36   : > { %p2316_p7 = scmp.ne.s32.totalorder %s3331_s3, %s2315_s21  ;;  %p2322_p1 = scmp.lt.u32.totalorder %s2315_s21, %s3331_s3 }
  0x38   : > { %p2318_p9 = pnand %p2316_p7, %p2841_p8 }
  0x3a   : > { %p2319_p4 = pneg %p2318_p9 }
  0x3c   : > { %p2324_p3 = pnand %p2322_p1, %p2319_p4 }
  0x3e   : > { %2327 = shalt.err (!%p2324_p3)
}
  0x3f   : > { %s2328_s11 = scalar_lea.vmem %s2829_s14, 256  ;;  %p2336_p13 = scmp.lt.s32.totalorder %s2829_s14, %s2829_s14 }
  0x40   : > { %p2329_p10 = scmp.ne.s32.totalorder %s2829_s14, %s2328_s11  ;;  %p2337_p0 = scmp.lt.s32.totalorder %s2328_s11, %s2328_s11 }
  0x42   : > { %p2331_p11 = pnand %p2329_p10, %p2841_p8  ;;  %p2338_p2 = por %p2337_p0, %p2336_p13 }
  0x44   : > { %p2332_p12 = pneg %p2331_p11 }
  0x46   : > { %p2339_p5 = pnand %p2338_p2, %p2332_p12 }
  0x48   : > { %2342 = shalt.err (!%p2339_p5)
}
  0x49   : > { %s2712_s17 = smov 64   ;;  %s2713_s18 = smov 4  }
  0x4a   : > { %1995 = dma.hbm_to_vmem [thread:$0]  (!%p2825_p6), %s3331_s3, 256, %s2829_s14, [#allocation12], %s2712_s17, %s2712_s17, %s2713_s18  }
  0x4b   : > { %s2343_s10 = scalar_lea.hbm %s3316_s5, 256 }
  0x4c   : > { %p2344_p7 = scmp.ne.s32.totalorder %s3316_s5, %s2343_s10  ;;  %p2350_p1 = scmp.lt.u32.totalorder %s2343_s10, %s3316_s5 }
  0x4e   : > { %p2346_p9 = pnand %p2344_p7, %p2841_p8 }
  0x50   : > { %p2347_p4 = pneg %p2346_p9 }
  0x52   : > { %p2352_p3 = pnand %p2350_p1, %p2347_p4 }
  0x54   : > { %2355 = shalt.err (!%p2352_p3)
}
  0x55   : > { %s2356_s19 = scalar_lea.vmem %s284_s16, 256  ;;  %p2364_p13 = scmp.lt.s32.totalorder %s284_s16, %s284_s16 }
  0x56   : > { %p2357_p10 = scmp.ne.s32.totalorder %s284_s16, %s2356_s19  ;;  %p2365_p0 = scmp.lt.s32.totalorder %s2356_s19, %s2356_s19 }
  0x58   : > { %p2359_p11 = pnand %p2357_p10, %p2841_p8  ;;  %p2366_p2 = por %p2365_p0, %p2364_p13 }
  0x5a   : > { %p2360_p12 = pneg %p2359_p11 }
  0x5c   : > { %p2367_p5 = pnand %p2366_p2, %p2360_p12 }
  0x5e   : > { %2370 = shalt.err (!%p2367_p5)
}
  0x5f   : > { %2001 = dma.hbm_to_vmem [thread:$0]  (!%p2825_p6), %s3316_s5, 256, %s284_s16, [#allocation15], %s2712_s17, %s2712_s17, %s2713_s18  }
  0x60   : > { %s2714_s20 = smov [#allocation10]   ;;  %s2715_s23 = smov [#allocation13]  }
  0x61   : > { %s246_s21 = sshll.u32 %s2714_s20, 4  ;;  %s273_s10 = sshll.u32 %s2715_s23, 4  ;;  %s247_s21 = int_to_ptr.vmem [resolvable:$true] %s246_s21  ;;  %s274_s10 = int_to_ptr.vmem [resolvable:$true] %s273_s10 }
  0x62   : > { %s2371_s11 = scalar_lea.hbm %s3313_s2, 256 }
  0x63   : > { %p2372_p7 = scmp.ne.s32.totalorder %s3313_s2, %s2371_s11  ;;  %p2378_p1 = scmp.lt.u32.totalorder %s2371_s11, %s3313_s2 }
  0x65   : > { %p2374_p9 = pnand %p2372_p7, %p2841_p8 }
  0x67   : > { %p2375_p4 = pneg %p2374_p9 }
  0x69   : > { %p2380_p3 = pnand %p2378_p1, %p2375_p4 }
  0x6b   : > { %2383 = shalt.err (!%p2380_p3)
}
  0x6c   : > { %s2384_s16 = scalar_lea.vmem %s247_s21, 256  ;;  %p2392_p13 = scmp.lt.s32.totalorder %s247_s21, %s247_s21 }
  0x6d   : > { %p2385_p10 = scmp.ne.s32.totalorder %s247_s21, %s2384_s16  ;;  %p2393_p0 = scmp.lt.s32.totalorder %s2384_s16, %s2384_s16 }
  0x6f   : > { %p2387_p11 = pnand %p2385_p10, %p2841_p8  ;;  %p2394_p2 = por %p2393_p0, %p2392_p13 }
  0x71   : > { %p2388_p12 = pneg %p2387_p11 }
  0x73   : > { %p2395_p5 = pnand %p2394_p2, %p2388_p12 }
  0x75   : > { %2398 = shalt.err (!%p2395_p5)
}
  0x76   : > { %1992 = dma.hbm_to_vmem [thread:$0]  (!%p2825_p6), %s3313_s2, 256, %s247_s21, [#allocation9], %s2712_s17, %s2712_s17, %s2713_s18  }
  0x77   : > { %s2399_s23 = scalar_lea.hbm %s3315_s4, 16 }
  0x78   : > { %p2400_p7 = scmp.ne.s32.totalorder %s3315_s4, %s2399_s23  ;;  %p2406_p1 = scmp.lt.u32.totalorder %s2399_s23, %s3315_s4 }
  0x7a   : > { %p2402_p9 = pnand %p2400_p7, %p2841_p8 }
  0x7c   : > { %p2403_p4 = pneg %p2402_p9 }
  0x7e   : > { %p2408_p3 = pnand %p2406_p1, %p2403_p4 }
  0x80   : > { %2411 = shalt.err (!%p2408_p3)
}
  0x81   : > { %s2412_s30 = scalar_lea.vmem %s274_s10, 16  ;;  %s2419_s21 = scalar_lea.vmem %s274_s10, 32 }
  0x82   : > { %p2413_p10 = scmp.ne.s32.totalorder %s274_s10, %s2412_s30  ;;  %p2420_p13 = scmp.lt.s32.totalorder %s274_s10, %s274_s10 }
  0x83   : > { %p2421_p0 = scmp.lt.s32.totalorder %s2419_s21, %s2412_s30 }
  0x84   : > { %p2415_p11 = pnand %p2413_p10, %p2841_p8 }
  0x85   : > { %p2422_p2 = por %p2421_p0, %p2420_p13 }
  0x86   : > { %p2416_p12 = pneg %p2415_p11 }
  0x88   : > { %p2423_p5 = pnand %p2422_p2, %p2416_p12 }
  0x8a   : > { %2426 = shalt.err (!%p2423_p5)
}
  0x8b   : > { %1998 = dma.hbm_to_vmem [thread:$0]  (!%p2825_p6), %s3315_s4, 16, %s274_s10, [#allocation12]  }
  0x8c   : > { %s2716_s3 = smov [#allocation16]   ;;  %s2427_s13 = scalar_lea.hbm %s3317_s6, 1024 }
  0x8d   : > { %s296_s14 = sshll.u32 %s2716_s3, 4  ;;  %p2428_p7 = scmp.ne.s32.totalorder %s3317_s6, %s2427_s13  ;;  %s297_s14 = int_to_ptr.vmem [resolvable:$true] %s296_s14 }
  0x8e   : > { %p2434_p1 = scmp.lt.u32.totalorder %s2427_s13, %s3317_s6 }
  0x8f   : > { %p2430_p9 = pnand %p2428_p7, %p2841_p8 }
  0x91   : > { %p2431_p4 = pneg %p2430_p9 }
  0x93   : > { %p2436_p3 = pnand %p2434_p1, %p2431_p4 }
  0x95   : > { %2439 = shalt.err (!%p2436_p3)
}
  0x96   : > { %s2440_s10 = scalar_lea.vmem %s297_s14, 1024  ;;  %p2448_p13 = scmp.lt.s32.totalorder %s297_s14, %s297_s14 }
  0x97   : > { %p2441_p10 = scmp.ne.s32.totalorder %s297_s14, %s2440_s10  ;;  %p2449_p0 = scmp.lt.s32.totalorder %s2440_s10, %s2440_s10 }
  0x99   : > { %p2443_p11 = pnand %p2441_p10, %p2841_p8  ;;  %p2450_p2 = por %p2449_p0, %p2448_p13 }
  0x9b   : > { %p2444_p12 = pneg %p2443_p11 }
  0x9d   : > { %p2451_p5 = pnand %p2450_p2, %p2444_p12 }
  0x9f   : > { %2454 = shalt.err (!%p2451_p5)
}
  0xa0   : > { %2004 = dma.hbm_to_vmem [thread:$0]  (!%p2825_p6), %s3317_s6, 1024, %s297_s14, [#allocation15], %s2712_s17, %s2712_s17, %s2713_s18  }
  0xa1   : > { %s1728_s12 = sadd.s32 4294967294, %s2643_s29   ;;  %s38_s22 = sadd.s32 1, %s2639_s28 }
  0xa2   : > { %p40_p8 = scmp.ge.s32.totalorder %s38_s22, 2  ;;  %s45_s1 = sadd.s32 1, %s2631_s26 }
  0xa3   : > { %p52_p7 = scmp.ne.s32.totalorder %s2631_s26, %s2627_s25  ;;  %p53_p9 = scmp.eq.s32.totalorder %s2643_s29, 0 }
  0xa4   : > { %s3362_s22 = smov (%p40_p8, %s38_s22), 0  ;;  %p58_p1 = scmp.ne.s32.totalorder %s2627_s25, %s2623_s24 }
  0xa5   : > { %p2973_p4 = por %p53_p9, %p52_p7  ;;  %s42_s17 = ssub.s32 %s2639_s28, %s3362_s22 }
  0xa6   : > { %s3333_s18 = sadd.s32 4294967295, %s2643_s29   ;;  %p43_p3 = scmp.eq.s32.totalorder %s42_s17, 0 }
  0xa7   : > { %p210_p6 = scmp.eq.s32.totalorder %s3333_s18, 1  ;;  %p3334_p10 = scmp.ne.s32.totalorder %s3326_s8, 0 }
  0xa8   : > { %p216_p13 = scmp.eq.s32.totalorder %s1728_s12, 1  ;;  %p2019_p2 = scmp.lt.s32.totalorder %s2643_s29, 2 }
  0xa9   : > { %p2985_p11 = por %p3334_p10, %p58_p1  ;;  %p2989_p12 = por %p210_p6, %p52_p7 }
  0xaa   : > { %s2994_s23 = scalar_select %p43_p3, %s2631_s26, %s45_s1  }
  0xab   : > { %s3336_s20 = scalar_select %p2989_p12, 1, 0 }
  0xac   : > { %p2996_p0 = por %p216_p13, %p58_p1  ;;  %s310_s15 = sand.u32 1, %s2631_s26  }
  0xad   : > { %s1738_s11 = sshll.u32 %s2639_s28, 7  ;;  %s1737_s19 = sshll.u32 %s310_s15, 3 }
  0xae   : > { %s3337_s13 = scalar_select %p2996_p0, 1, 0 }
  0xaf   : > { %s3006_s21 = scalar_lea.hbm %s3311_s0, %s1738_s11  ;;  %s314_s16 = scalar_lea.vmem [#allocation5], %s1737_s19 }
  0xb0   : > { %s321_s12 = sshll.u32 %s314_s16, 4  ;;  %p3010_p5 = pnand %p2019_p2, %p2973_p4  ;;  %s3014_s12 = int_to_ptr.vmem [resolvable:$true] %s321_s12 }
  0xb1   : > { %s311_s17 = scalar_lea.sflag [#allocation6], %s310_s15  ;;  %s2455_s18 = scalar_lea.hbm %s3006_s21, 128 }
  0xb2   : > { %p2456_p8 = scmp.ne.s32.totalorder %s3006_s21, %s2455_s18  ;;  %p2457_p7 = pneg %p3010_p5 }
  0xb3   : > { %s2460_s3 = scalar_lea.hbm %s3311_s0, 256  ;;  %p2461_p4 = scmp.lt.u32.totalorder %s3006_s21, %s3311_s0 }
  0xb4   : > { %p2458_p9 = pnand %p2457_p7, %p2456_p8  ;;  %p2462_p6 = scmp.lt.u32.totalorder %s2460_s3, %s2455_s18 }
  0xb5   : > { %p2464_p10 = scmp.lt.u32.totalorder %s2455_s18, %s3006_s21 }
  0xb6   : > { %p2459_p1 = pneg %p2458_p9  ;;  %p2463_p3 = por %p2462_p6, %p2461_p4 }
  0xb8   : > { %p2465_p13 = por %p2464_p10, %p2463_p3 }
  0xba   : > { %p2466_p2 = pnand %p2465_p13, %p2459_p1 }
  0xbc   : > { %2469 = shalt.err (!%p2466_p2)
}
  0xbd   : > { %s2470_s15 = scalar_lea.vmem %s3014_s12, 128  ;;  %s2717_s16 = smov [#allocation5]  }
  0xbe   : > { %p2471_p8 = scmp.ne.s32.totalorder %s3014_s12, %s2470_s15  ;;  %s2475_s11 = sshll.u32 %s2717_s16, 4  ;;  %s2476_s11 = int_to_ptr.vmem [resolvable:$false] %s2475_s11 }
  0xbf   : > { %s2477_s19 = scalar_lea.vmem %s2476_s11, 256  ;;  %p2478_p12 = scmp.lt.s32.totalorder %s3014_s12, %s2476_s11 }
  0xc0   : > { %p2473_p9 = pnand %p2471_p8, %p2457_p7  ;;  %p2479_p4 = scmp.lt.s32.totalorder %s2477_s19, %s2470_s15 }
  0xc2   : > { %p2474_p0 = pneg %p2473_p9  ;;  %p2480_p6 = por %p2479_p4, %p2478_p12 }
  0xc4   : > { %p2481_p3 = pnand %p2480_p6, %p2474_p0 }
  0xc6   : > { %2484 = shalt.err (!%p2481_p3)
}
  0xc7   : > { %2008 = dma.hbm_to_vmem [thread:$0]  (!%p3010_p5), %s3006_s21, 128, %s3014_s12, %s311_s17  }
  0xc8   : > { %p3339_p1 = scmp.ne.s32.totalorder %s3327_s9, 0 }
  0xc9   : > { %s3044_s18 = sand.u32 (!%p3339_p1), 1, %s2627_s25  }
  0xca   : > { %330 = sbr.rel (%p3339_p1) target bundleno = 4582 (0x11e6), region = 48  ;;  %s1740_s3 = sshll.u32 (!%p3339_p1), %s3044_s18, 3 }
  0xcb   : > { %s333_s30 = scalar_lea.sflag (!%p3339_p1), [#allocation6], %s3044_s18  ;;  %s336_s10 = scalar_lea.vmem (!%p3339_p1), [#allocation5], %s1740_s3 }
  0xd1   : > { %2602 = dma.done.wait (%p2985_p11), %s333_s30, 128  }
  0xd2   : > { %2604 = vsyncadd (%p2985_p11), %s333_s30, 4294967168  ;;  %p3340_p12 = scmp.ne.s32.totalorder %s3326_s8, 0 }
  0xd4   : > { %2606 = dma.done.wait (%p3340_p12), [#allocation9], 272  }
  0xd5   : > { %2608 = vsyncadd (%p3340_p12), [#allocation9], 4294967024 }
  0xd6   : > { %2610 = dma.done.wait (%p3340_p12), [#allocation12], 272  }
  0xd7   : > { %2612 = vsyncadd (%p3340_p12), [#allocation12], 4294967024 }
  0xd8   : > { %2614 = dma.done.wait (%p3340_p12), [#allocation15], 1280  }
  0xd9   : > { %2616 = vsyncadd (%p3340_p12), [#allocation15], 4294966016  ;;  %vm400_vm0 = vcmask 261120   ;;  %v3066_v0 = vld [vmem:[#allocation13] ss:$0 sm:$0xff]  ;;  %v3068_v1 = vld [vmem:[%s336_s10] sm:$0xff]  ;;  %v410_v8 = vlaneseq }
  0xda   : > { %v399_v2 = vmul.f32 %v3068_v1, %v3068_v1  ;;  %v2229_v3 = vld [vmem:[#allocation10] sm:$0xff]   ;;  %s2718_s9 = smov 96   ;;  %v2230_v5 = vld [vmem:[#allocation10 + $0x8] sm:$0xff]   ;;  %s2719_s8 = smov 64   ;;  %v2720_v9 = vmov 0.0   ;;  %vm2721_vm1 = vmmov 0  }
  0xdb   : > { %431 = vrot.lane.b32.xlu1 %v2229_v3, %s2718_s9  ;;  %v2232_v6 = vld [vmem:[#allocation10 + $0x8] sm:$0xff]   ;;  %v2231_v7 = vld [vmem:[#allocation10] sm:$0xff]   ;;  %1850 = vmatprep.subr.bf16.mxu0 %v2720_v9  ;;  %v3075_v10 = vshrl.u32 %v410_v8, 7  ;;  %v1809_v22 = vld [vmem:[#allocation8] ss:$0 sm:$0xff]  ;;  %v3092_v32 = vand.u32 127, %v410_v8 }
  0xdc   : > { %v401_v4 = vsel %vm400_vm0, %v399_v2, 0.0  ;;  %1858 = vmatprep.subr.bf16.mxu1 %v2720_v9  ;;  %1854 = vmatprep.mubr.msk.bf16.mxu0 %vm2721_vm1, %v2720_v9  ;;  %v2233_v26 = vld [vmem:[#allocation10] sm:$0xff]   ;;  %v2234_v30 = vld [vmem:[#allocation10 + $0x8] sm:$0xff]   ;;  %vm481_vm2 = vcmask 257024   ;;  %s3098_s14 = scalar_lea.vmem [#allocation17], %s1740_s3  ;;  %v3100_v48 = vmov 0.0  }
  0xdd   : > { %402 = vadd.xlane.f32.xlu0 %v401_v4  ;;  %1862 = vmatprep.mubr.msk.bf16.mxu1 %vm2721_vm1, %v2720_v9  ;;  %v3102_v49 = vmov 0.0   ;;  %v3104_v50 = vmov -inf   ;;  %s3106_s21 = smov 0  }
  0xdf   : > { %433 = vrot.lane.b32.xlu1 %v2230_v5, %s2718_s9 }
  0xe1   : > { %551 = vadd.xlane.f32.xlu0 %v401_v4 }
  0xe3   : > { %499 = vrot.lane.b32.xlu1 %v2232_v6, %s2719_s8 }
  0xf7   : > { %497 = vrot.lane.b32.xlu0 %v2231_v7, %s2719_s8 }
 0x14d   : > { %v432_v11 = vpop.permute.xlu1 %431 }
 0x14e   : > { %1851 = vmatpush3.bf16.msra.mxu0 %v432_v11 }
 0x14f   : > { %1852 = vmatprep.subr.bf16.mxu0 %v2720_v9 }
 0x151   : > { %v434_v12 = vpop.permute.xlu1 %433 }
 0x152   : > { %1853 = vmatpush3.bf16.msra.mxu0 %v434_v12 }
 0x153   : > { %1866 = vmatprep.subr.bf16.mxu0 %v2720_v9 }
 0x155   : > { %v500_v20 = vpop.permute.xlu1 %499 }
 0x16a   : > { %v403_v13 = vpop.xlane.xlu0 %402 }
 0x16b   : > { %v405_v14 = vmul.f32 0.03125, %v403_v13 }
 0x16d   : > { %v406_v15 = vadd.f32 1.1920929e-07, %v405_v14 }
 0x16e   : > { %v552_v16 = vpop.xlane.xlu0 %551 }
 0x16f   : > { %2235 = vrsqrt.f32 %v406_v15  ;;  %v554_v17 = vmul.f32 0.03125, %v552_v16 }
 0x171   : > { %v555_v18 = vadd.f32 1.1920929e-07, %v554_v17 }
 0x172   : > { %v498_v19 = vpop.permute.xlu0 %497 }
 0x173   : > { %2237 = vrsqrt.f32 %v555_v18  ;;  %1859 = vmatpush3.bf16.msra.mxu1 %v498_v19 }
 0x174   : > { %1860 = vmatprep.subr.bf16.mxu1 %v2720_v9 }
 0x177   : > { %1861 = vmatpush3.bf16.msra.mxu1 %v500_v20 }
 0x179   : > { %v2236_v21 = vpop.eup %2235 }
 0x17a   : > { %v408_v23 = vmul.f32 %v2236_v21, %v3068_v1 }
 0x17c   : > { %v415_v24 = vmul.f32 %v1809_v22, %v408_v23 }
 0x17d   : > { %v2238_v25 = vpop.eup %2237 }
 0x17e   : > { %v416_v27 = vpack.c.bf16 %v415_v24, %v415_v24  ;;  %v557_v28 = vmul.f32 %v2238_v25, %v3068_v1 }
 0x180   : > { %1855 = vmatmul.mubr.msk.bf16.vlgmr.msra.gmra.mrb[0].mxu0 %vm400_vm0, %v416_v27  ;;  %v564_v29 = vmul.f32 %v1809_v22, %v557_v28  ;;  %1863 = vmatmul.mubr.msk.bf16.vlgmr.msra.gmra.mrb[0].mxu1 %vm400_vm0, %v416_v27 }
 0x181   : > { %1867 = vmatpush3.bf16.msra.mxu0 %v2233_v26  ;;  %1870 = vmatprep.mubr.msk.bf16.mxu0 %vm2721_vm1, %v2720_v9 }
 0x182   : > { %1868 = vmatprep.subr.bf16.mxu0 %v2720_v9  ;;  %v565_v31 = vpack.c.bf16 %v564_v29, %v564_v29 }
 0x185   : > { %1869 = vmatpush3.bf16.msra.mxu0 %v2234_v30 }
 0x188   : > { %1871 = vmatmul.mubr.msk.bf16.vlgmr.msra.gmra.mrb[4].mxu0 %vm400_vm0, %v565_v31 }
 0x253   : > { %v474_v33 = vpop.f32.mrb[0].mxu0  ;;  %v537_v34 = vpop.f32.mrb[0].mxu1 }
 0x254   : > { %v480_v35 = vpack.c.bf16 %v474_v33, %v474_v33  ;;  %v543_v36 = vpack.c.bf16 %v537_v34, %v537_v34  ;;  %v1856_v37 = vpop.f32.mrb[1].mxu0  ;;  %v1864_v38 = vpop.f32.mrb[1].mxu1 }
 0x255   : > { %v477_v39 = vpop.f32.mrb[2].mxu0  ;;  %v540_v40 = vpop.f32.mrb[2].mxu1 }
 0x256   : > { %482 = vst.msk [vmem:[#allocation2] sm:$0xf] %vm481_vm2, %v480_v35  ;;  %544 = vst.msk [vmem:[#allocation3] sm:$0xf] %vm481_vm2, %v543_v36  ;;  %v1857_v41 = vpop.f32.mrb[3].mxu0  ;;  %v1865_v42 = vpop.f32.mrb[3].mxu1 }
 0x25b   : > { %v619_v43 = vpop.f32.mrb[4].mxu0 }
 0x25c   : > { %v3094_v44 = vpack.c.bf16 %v619_v43, %v619_v43  ;;  %v1872_v45 = vpop.f32.mrb[5].mxu0 }
 0x25d   : > { %v622_v46 = vpop.f32.mrb[6].mxu0 }
 0x25e   : > { %v1873_v47 = vpop.f32.mrb[7].mxu0 }
 0x25f LB: >> { %v2722_v51 = vmov 0.0   ;;  %vm2723_vm3 = vmmov 0   ;;  %s1757_s12 = sshll.u32 %s2659_s21, 3  ;;  %vm649_vm4 = vcmask 64512   ;;  %vm722_vm6 = vcmask 1043456   ;;  %s634_s21 = sadd.s32 1, %s2659_s21   ;;  %s2659_s21 = sphi %s3106_s21, %s634_s21   ;;  %v2655_v50 = vphi %v3104_v50, %v3343_v50   ;;  %v2651_v49 = vphi %v3102_v49, %v3342_v49   ;;  %v2647_v48 = vphi %v3100_v48, %v3341_v48  }
 0x260   : >> { %1874 = vmatprep.subr.bf16.mxu0 %v2722_v51  ;;  %1876 = vmatprep.mubr.msk.bf16.mxu0 %vm2723_vm3, %v2722_v51  ;;  %s641_s1 = sshra.s32 %s1757_s12, 3  ;;  %v698_v54 = vstv %s1757_s12  ;;  %p633_p11 = scmp.ge.s32.totalorder %s634_s21, 1 }
 0x261   : >> { %1880 = vmatprep.subr.bf16.mxu1 %v2722_v51  ;;  %1882 = vmatprep.mubr.msk.bf16.mxu1 %vm2723_vm3, %v2722_v51  ;;  %s1758_s17 = sshll.u32 %s641_s1, 2  ;;  %v699_v55 = vadd.s32 %v698_v54, %v3092_v32  ;;  %vm770_vm7 = vcmask (%p633_p11), 60416   ;;  %v3133_v26 = vmov (%p633_p11), 0.0   ;;  %v3135_v27 = vmov (%p633_p11), 0.0   ;;  %s3139_s11 = smov (%p633_p11), 0  }
 0x262   : >> { %s644_s15 = scalar_lea.vmem [#allocation2], %s1758_s17  ;;  %s647_s16 = scalar_lea.vmem [#allocation3], %s1758_s17  ;;  %v3137_v28 = vmov (%p633_p11), -inf  }
 0x263   : >> { %v645_v52 = vld [vmem:[%s644_s15] sm:$0xf]  ;;  %vm700_vm5 = vcmp.ge.s32.totalorder %v3075_v10, %v699_v55 }
 0x264   : >> { %v654_v53 = vsel %vm649_vm4, %v645_v52, 0  ;;  %v648_v62 = vld [vmem:[%s647_s16] sm:$0xf] }
 0x265   : >> { %1875 = vmatpush3.bf16.xpose.msra.mxu0 %v654_v53  ;;  %v724_v63 = vsel %vm722_vm6, %v648_v62, 0 }
 0x266   : >> { %1881 = vmatpush3.bf16.msra.mxu1 %v724_v63 }
 0x26c   : >> { %1877 = vmatmul.mubr.msk.bf16.vlgmr.msra.gmra.mrb[0].mxu0 %vm649_vm4, %v3094_v44 }
 0x33f   : >> { %v690_v56 = vpop.f32.mrb[0].mxu0 }
 0x340   : >> { %v701_v57 = vsel %vm700_vm5, %v690_v56, -1e+30  ;;  %v1878_v58 = vpop.f32.mrb[1].mxu0 }
 0x341   : >> { %v693_v59 = vpop.f32.mrb[2].mxu0  ;;  %v702_v60 = vsel %vm649_vm4, %v701_v57, -inf }
 0x342   : >> { %703 = vmax.xlane.f32.xlu0 %v702_v60  ;;  %v1879_v61 = vpop.f32.mrb[3].mxu0 }
 0x3cf   : >> { %v704_v2 = vpop.xlane.xlu0 %703 }
 0x3d0   : >> { %v705_v3 = vmax.f32 %v2655_v50, %v704_v2  }
 0x3d2   : >> { %v706_v4 = vsub.f32 %v701_v57, %v705_v3  ;;  %v709_v5 = vsub.f32 %v2655_v50, %v705_v3  ;;  %v3343_v50 = vmov %v705_v3 }
 0x3d4   : >> { %v707_v6 = vmul.f32 1.442695, %v706_v4  ;;  %v710_v12 = vmul.f32 1.442695, %v709_v5 }
 0x3d6   : >> { %2239 = vpow2.f32 %v707_v6 }
 0x3d7   : >> { %2241 = vpow2.f32 %v710_v12 }
 0x3e0   : >> { %v2240_v7 = vpop.eup %2239 }
 0x3e1   : >> { %v713_v8 = vsel %vm649_vm4, %v2240_v7, 0.0  ;;  %v718_v11 = vpack.c.bf16 %v2240_v7, %v2240_v7  ;;  %v2242_v13 = vpop.eup %2241 }
 0x3e2   : >> { %714 = vadd.xlane.f32.xlu0 %v713_v8  ;;  %v712_v14 = vmul.f32 %v2651_v49, %v2242_v13  ;;  %v717_v17 = vmul.f32 %v2647_v48, %v2242_v13 }
 0x3e3   : >> { %1883 = vmatmul.mubr.msk.bf16.vlgmr.msra.gmra.mrb[0].mxu1 %vm649_vm4, %v718_v11 }
 0x46f   : >> { %v715_v15 = vpop.xlane.xlu0 %714 }
 0x470   : >> { %v716_v16 = vadd.f32 %v715_v15, %v712_v14  }
 0x472   : >> { %v3342_v49 = vmov %v716_v16  ;;  %2243 = vrcp.f32 (%p633_p11), %v716_v16 }
 0x47c   : > { %v2244_v23 = vpop.eup (%p633_p11), %2243 }
 0x4b3   : > { %636 = sbr.rel (!%p633_p11) target bundleno = 607 (0x25f), region = 158 }
 0x4b6   : >> { %v760_v18 = vpop.f32.mrb[0].mxu1 }
 0x4b7   : >> { %v766_v19 = vadd.f32 %v760_v18, %v717_v17   ;;  %v1884_v20 = vpop.f32.mrb[1].mxu1 }
 0x4b8   : >> { %v763_v21 = vpop.f32.mrb[2].mxu1 }
 0x4b9   : >> { %v1885_v22 = vpop.f32.mrb[3].mxu1  ;;  %v3341_v48 = vmov %v766_v19  ;;  %v768_v24 = vmul.f32 (%p633_p11), %v2244_v23, %v766_v19 }
 0x4bb   : > { %v769_v25 = vpack.c.bf16 %v768_v24, %v768_v24 }
 0x4bd   : > { %771 = vst.msk [vmem:[#allocation4] sm:$0xf] %vm770_vm7, %v769_v25 }
 0x4be LB: >> { %v2724_v29 = vmov 0.0   ;;  %vm2725_vm8 = vmmov 0   ;;  %s1762_s19 = sshll.u32 %s2675_s11, 3  ;;  %s2726_s8 = smov 120   ;;  %s2675_s11 = sphi %s3139_s11, %s775_s11   ;;  %v2671_v28 = vphi %v3137_v28, %v3346_v28   ;;  %v2667_v27 = vphi %v3135_v27, %v3345_v27   ;;  %v2663_v26 = vphi %v3133_v26, %v3344_v26  }
 0x4bf   : >> { %1886 = vmatprep.subr.bf16.mxu0 %v2724_v29  ;;  %1888 = vmatprep.mubr.msk.bf16.mxu0 %vm2725_vm8, %v2724_v29  ;;  %s782_s3 = sshra.s32 %s1762_s19, 3  ;;  %v847_v35 = vstv %s1762_s19  ;;  %s775_s11 = sadd.s32 1, %s2675_s11  }
 0x4c0   : >> { %1892 = vmatprep.subr.bf16.mxu1 %v2724_v29  ;;  %1894 = vmatprep.mubr.msk.bf16.mxu1 %vm2725_vm8, %v2724_v29  ;;  %s1763_s30 = sshll.u32 %s782_s3, 2  ;;  %v848_v36 = vadd.s32 %v847_v35, %v3092_v32  ;;  %p774_p0 = scmp.ge.s32.totalorder %s775_s11, 1 }
 0x4c1   : >> { %s785_s10 = scalar_lea.vmem [#allocation2], %s1763_s30  ;;  %s788_s9 = scalar_lea.vmem [#allocation3], %s1763_s30  ;;  %vm930_vm10 = vcmask (%p774_p0), 126016   ;;  %v3166_v8 = vmov (%p774_p0), 0.0   ;;  %v3168_v11 = vmov (%p774_p0), 0.0   ;;  %v3170_v12 = vmov (%p774_p0), -inf  }
 0x4c2   : >> { %v2245_v30 = vld [vmem:[%s785_s10] ss:$0 sps:$4 sm:$0xff]   ;;  %vm849_vm9 = vcmp.ge.s32.totalorder %v3075_v10, %v848_v36  ;;  %s2727_s21 = smov (%p774_p0), 8   ;;  %s3172_s12 = smov (%p774_p0), 0  }
 0x4c3   : >> { %796 = vrot.lane.b32.xlu0 %v2245_v30, %s2726_s8  ;;  %v2246_v43 = vld [vmem:[%s788_s9] ss:$0 sps:$4 sm:$0xff]  }
 0x4c7   : >> { %791 = vrot.lane.b32.xlu0 %v3094_v44, %s2726_s8 }
 0x535   : >> { %v797_v31 = vpop.permute.xlu0 %796 }
 0x536   : >> { %v803_v33 = vsel %vm649_vm4, %v797_v31, 0 }
 0x537   : >> { %1887 = vmatpush3.bf16.xpose.msra.mxu0 %v803_v33 }
 0x539   : >> { %v792_v34 = vpop.permute.xlu0 %791 }
 0x53e   : >> { %1889 = vmatmul.mubr.msk.bf16.vlgmr.msra.gmra.mrb[0].mxu0 %vm649_vm4, %v792_v34 }
 0x611   : >> { %v839_v37 = vpop.f32.mrb[0].mxu0 }
 0x612   : >> { %v850_v38 = vsel %vm849_vm9, %v839_v37, -1e+30  ;;  %v1890_v39 = vpop.f32.mrb[1].mxu0 }
 0x613   : >> { %v842_v40 = vpop.f32.mrb[2].mxu0  ;;  %v851_v41 = vsel %vm649_vm4, %v850_v38, -inf }
 0x614   : >> { %852 = vmax.xlane.f32.xlu1 %v851_v41  ;;  %v1891_v42 = vpop.f32.mrb[3].mxu0 }
 0x625   : >> { %871 = vrot.lane.b32.xlu1 %v2246_v43, %s2726_s8 }
 0x6a1   : >> { %v853_v45 = vpop.xlane.xlu1 %852 }
 0x6a2   : >> { %v854_v46 = vmax.f32 %v2671_v28, %v853_v45  }
 0x6a4   : >> { %v855_v47 = vsub.f32 %v850_v38, %v854_v46  ;;  %v858_v48 = vsub.f32 %v2671_v28, %v854_v46  ;;  %v3346_v28 = vmov %v854_v46 }
 0x6a5   : >> { %v872_v49 = vpop.permute.xlu1 %871 }
 0x6a6   : >> { %v856_v50 = vmul.f32 1.442695, %v855_v47  ;;  %v878_v51 = vsel %vm722_vm6, %v872_v49, 0  ;;  %v859_v55 = vmul.f32 1.442695, %v858_v48 }
 0x6a7   : >> { %1893 = vmatpush3.bf16.msra.mxu1 %v878_v51 }
 0x6a8   : >> { %2247 = vpow2.f32 %v856_v50 }
 0x6a9   : >> { %2249 = vpow2.f32 %v859_v55 }
 0x6b2   : >> { %v2248_v52 = vpop.eup %2247 }
 0x6b3   : >> { %v862_v53 = vsel %vm649_vm4, %v2248_v52, 0.0  ;;  %v867_v54 = vpack.c.bf16 %v2248_v52, %v2248_v52  ;;  %v2250_v56 = vpop.eup %2249 }
 0x6b4   : >> { %863 = vadd.xlane.f32.xlu0 %v862_v53  ;;  %v861_v57 = vmul.f32 %v2667_v27, %v2250_v56  ;;  %v866_v60 = vmul.f32 %v2663_v26, %v2250_v56 }
 0x6b5   : >> { %1895 = vmatmul.mubr.msk.bf16.vlgmr.msra.gmra.mrb[0].mxu1 %vm649_vm4, %v867_v54 }
 0x741   : >> { %v864_v58 = vpop.xlane.xlu0 %863 }
 0x742   : >> { %v865_v59 = vadd.f32 %v864_v58, %v861_v57  }
 0x744   : >> { %v3345_v27 = vmov %v865_v59  ;;  %2251 = vrcp.f32 (%p774_p0), %v865_v59 }
 0x74e   : > { %v2252_v4 = vpop.eup (%p774_p0), %2251 }
 0x785   : > { %777 = sbr.rel (!%p774_p0) target bundleno = 1214 (0x4be), region = 169 }
 0x788   : >> { %v914_v61 = vpop.f32.mrb[0].mxu1 }
 0x789   : >> { %v920_v62 = vadd.f32 %v914_v61, %v866_v60   ;;  %v1896_v63 = vpop.f32.mrb[1].mxu1 }
 0x78a   : >> { %v917_v2 = vpop.f32.mrb[2].mxu1 }
 0x78b   : >> { %v1897_v3 = vpop.f32.mrb[3].mxu1  ;;  %v3344_v26 = vmov %v920_v62  ;;  %v922_v5 = vmul.f32 (%p774_p0), %v2252_v4, %v920_v62 }
 0x78d   : > { %v1806_v6 = vpack.c.bf16 %v922_v5, %v922_v5 }
 0x78f   : > { %927 = vrot.lane.b32.xlu0 %v1806_v6, %s2727_s21 }
 0x801   : > { %v928_v7 = vpop.permute.xlu0 %927 }
 0x802   : > { %931 = vst.msk [vmem:[#allocation4] sm:$0xf] %vm930_vm10, %v928_v7 }
 0x803 LB: >> { %v2728_v13 = vmov 0.0   ;;  %vm2729_vm11 = vmmov 0   ;;  %s1770_s1 = sshll.u32 %s2691_s12, 3  ;;  %s2730_s19 = smov 112   ;;  %s2691_s12 = sphi %s3172_s12, %s935_s12   ;;  %v2687_v12 = vphi %v3170_v12, %v3349_v12   ;;  %v2683_v11 = vphi %v3168_v11, %v3348_v11   ;;  %v2679_v8 = vphi %v3166_v8, %v3347_v8  }
 0x804   : >> { %1898 = vmatprep.subr.bf16.mxu0 %v2728_v13  ;;  %1900 = vmatprep.mubr.msk.bf16.mxu0 %vm2729_vm11, %v2728_v13  ;;  %s942_s17 = sshra.s32 %s1770_s1, 3  ;;  %v1007_v18 = vstv %s1770_s1  ;;  %s935_s12 = sadd.s32 1, %s2691_s12  }
 0x805   : >> { %1904 = vmatprep.subr.bf16.mxu1 %v2728_v13  ;;  %1906 = vmatprep.mubr.msk.bf16.mxu1 %vm2729_vm11, %v2728_v13  ;;  %s1771_s15 = sshll.u32 %s942_s17, 2  ;;  %v1008_v19 = vadd.s32 %v1007_v18, %v3092_v32  ;;  %p934_p5 = scmp.ge.s32.totalorder %s935_s12, 1 }
 0x806   : >> { %s945_s16 = scalar_lea.vmem [#allocation2], %s1771_s15  ;;  %s948_s11 = scalar_lea.vmem [#allocation3], %s1771_s15  ;;  %vm1090_vm13 = vcmask (%p934_p5), 191616   ;;  %v3199_v54 = vmov (%p934_p5), 0.0   ;;  %v3201_v55 = vmov (%p934_p5), 0.0   ;;  %v3203_v56 = vmov (%p934_p5), -inf  }
 0x807   : >> { %v2253_v14 = vld [vmem:[%s945_s16] ss:$0 sps:$4 sm:$0xff]   ;;  %vm1009_vm12 = vcmp.ge.s32.totalorder %v3075_v10, %v1008_v19  ;;  %s2731_s3 = smov (%p934_p5), 16   ;;  %s3205_s30 = smov (%p934_p5), 0  }
 0x808   : >> { %956 = vrot.lane.b32.xlu0 %v2253_v14, %s2730_s19  ;;  %v2254_v26 = vld [vmem:[%s948_s11] ss:$0 sps:$4 sm:$0xff]  }
 0x80c   : >> { %951 = vrot.lane.b32.xlu0 %v3094_v44, %s2730_s19 }
 0x87a   : >> { %v957_v15 = vpop.permute.xlu0 %956 }
 0x87b   : >> { %v963_v16 = vsel %vm649_vm4, %v957_v15, 0 }
 0x87c   : >> { %1899 = vmatpush3.bf16.xpose.msra.mxu0 %v963_v16 }
 0x87e   : >> { %v952_v17 = vpop.permute.xlu0 %951 }
 0x883   : >> { %1901 = vmatmul.mubr.msk.bf16.vlgmr.msra.gmra.mrb[0].mxu0 %vm649_vm4, %v952_v17 }
 0x956   : >> { %v999_v20 = vpop.f32.mrb[0].mxu0 }
 0x957   : >> { %v1010_v21 = vsel %vm1009_vm12, %v999_v20, -1e+30  ;;  %v1902_v22 = vpop.f32.mrb[1].mxu0 }
 0x958   : >> { %v1002_v23 = vpop.f32.mrb[2].mxu0  ;;  %v1011_v24 = vsel %vm649_vm4, %v1010_v21, -inf }
 0x959   : >> { %1012 = vmax.xlane.f32.xlu1 %v1011_v24  ;;  %v1903_v25 = vpop.f32.mrb[3].mxu0 }
 0x96a   : >> { %1031 = vrot.lane.b32.xlu1 %v2254_v26, %s2730_s19 }
 0x9e6   : >> { %v1013_v27 = vpop.xlane.xlu1 %1012 }
 0x9e7   : >> { %v1014_v28 = vmax.f32 %v2687_v12, %v1013_v27  }
 0x9e9   : >> { %v1015_v29 = vsub.f32 %v1010_v21, %v1014_v28  ;;  %v1018_v30 = vsub.f32 %v2687_v12, %v1014_v28  ;;  %v3349_v12 = vmov %v1014_v28 }
 0x9ea   : >> { %v1032_v31 = vpop.permute.xlu1 %1031 }
 0x9eb   : >> { %v1016_v33 = vmul.f32 1.442695, %v1015_v29  ;;  %v1038_v34 = vsel %vm722_vm6, %v1032_v31, 0  ;;  %v1019_v38 = vmul.f32 1.442695, %v1018_v30 }
 0x9ec   : >> { %1905 = vmatpush3.bf16.msra.mxu1 %v1038_v34 }
 0x9ed   : >> { %2255 = vpow2.f32 %v1016_v33 }
 0x9ee   : >> { %2257 = vpow2.f32 %v1019_v38 }
 0x9f7   : >> { %v2256_v35 = vpop.eup %2255 }
 0x9f8   : >> { %v1022_v36 = vsel %vm649_vm4, %v2256_v35, 0.0  ;;  %v1027_v37 = vpack.c.bf16 %v2256_v35, %v2256_v35  ;;  %v2258_v39 = vpop.eup %2257 }
 0x9f9   : >> { %1023 = vadd.xlane.f32.xlu0 %v1022_v36  ;;  %v1021_v40 = vmul.f32 %v2683_v11, %v2258_v39  ;;  %v1026_v43 = vmul.f32 %v2679_v8, %v2258_v39 }
 0x9fa   : >> { %1907 = vmatmul.mubr.msk.bf16.vlgmr.msra.gmra.mrb[0].mxu1 %vm649_vm4, %v1027_v37 }
 0xa86   : >> { %v1024_v41 = vpop.xlane.xlu0 %1023 }
 0xa87   : >> { %v1025_v42 = vadd.f32 %v1024_v41, %v1021_v40  }
 0xa89   : >> { %v3348_v11 = vmov %v1025_v42  ;;  %2259 = vrcp.f32 (%p934_p5), %v1025_v42 }
 0xa93   : > { %v2260_v50 = vpop.eup (%p934_p5), %2259 }
 0xaca   : > { %937 = sbr.rel (!%p934_p5) target bundleno = 2051 (0x803), region = 180 }
 0xacd   : >> { %v1074_v45 = vpop.f32.mrb[0].mxu1 }
 0xace   : >> { %v1080_v46 = vadd.f32 %v1074_v45, %v1026_v43   ;;  %v1908_v47 = vpop.f32.mrb[1].mxu1 }
 0xacf   : >> { %v1077_v48 = vpop.f32.mrb[2].mxu1 }
 0xad0   : >> { %v1909_v49 = vpop.f32.mrb[3].mxu1  ;;  %v3347_v8 = vmov %v1080_v46  ;;  %v1082_v51 = vmul.f32 (%p934_p5), %v2260_v50, %v1080_v46 }
 0xad2   : > { %v1807_v52 = vpack.c.bf16 %v1082_v51, %v1082_v51 }
 0xad4   : > { %1087 = vrot.lane.b32.xlu0 %v1807_v52, %s2731_s3 }
 0xb46   : > { %v1088_v53 = vpop.permute.xlu0 %1087 }
 0xb47   : > { %1091 = vst.msk [vmem:[#allocation4] sm:$0xf] %vm1090_vm13, %v1088_v53 }
 0xb48 LB: >> { %v2732_v57 = vmov 0.0   ;;  %vm2733_vm14 = vmmov 0   ;;  %s1778_s10 = sshll.u32 %s2707_s30, 3  ;;  %s2734_s1 = smov 104   ;;  %s2707_s30 = sphi %s3205_s30, %s1095_s30   ;;  %v2703_v56 = vphi %v3203_v56, %v3352_v56   ;;  %v2699_v55 = vphi %v3201_v55, %v3351_v55   ;;  %v2695_v54 = vphi %v3199_v54, %v3350_v54  }
 0xb49   : >> { %1910 = vmatprep.subr.bf16.mxu0 %v2732_v57  ;;  %1912 = vmatprep.mubr.msk.bf16.mxu0 %vm2733_vm14, %v2732_v57  ;;  %s1102_s9 = sshra.s32 %s1778_s10, 3  ;;  %v1167_v62 = vstv %s1778_s10  ;;  %s1095_s30 = sadd.s32 1, %s2707_s30  }
 0xb4a   : >> { %1916 = vmatprep.subr.bf16.mxu1 %v2732_v57  ;;  %1918 = vmatprep.mubr.msk.bf16.mxu1 %vm2733_vm14, %v2732_v57  ;;  %s1779_s8 = sshll.u32 %s1102_s9, 2  ;;  %v1168_v63 = vadd.s32 %v1167_v62, %v3092_v32  ;;  %p1094_p7 = scmp.ge.s32.totalorder %s1095_s30, 1 }
 0xb4b   : >> { %s1105_s21 = scalar_lea.vmem [#allocation2], %s1779_s8  ;;  %s1108_s12 = scalar_lea.vmem [#allocation3], %s1779_s8  ;;  %v2267_v33 = vld [vmem:[#allocation11] sm:$0xff] (%p1094_p7)   ;;  %v2268_v34 = vld [vmem:[#allocation11 + $0x8] sm:$0xff] (%p1094_p7)   ;;  %vm1250_vm2 = vcmask (%p1094_p7), 257216   ;;  %v2269_v45 = vld [vmem:[#allocation14] sm:$0xff] (%p1094_p7)  }
 0xb4c   : >> { %v2261_v58 = vld [vmem:[%s1105_s21] ss:$0 sps:$4 sm:$0xff]   ;;  %vm1169_vm15 = vcmp.ge.s32.totalorder %v3075_v10, %v1168_v63  ;;  %s2735_s17 = smov (%p1094_p7), 24   ;;  %v2270_v46 = vld [vmem:[#allocation14 + $0x8] sm:$0xff] (%p1094_p7)   ;;  %v2271_v53 = vld [vmem:[#allocation16] sm:$0xff] (%p1094_p7)   ;;  %s1803_s15 = sshll.u32 (%p1094_p7), %s2635_s27, 7 }
 0xb4d   : >> { %1116 = vrot.lane.b32.xlu0 %v2261_v58, %s2734_s1  ;;  %v2262_v8 = vld [vmem:[%s1108_s12] ss:$0 sps:$4 sm:$0xff]   ;;  %v2276_v57 = vld [vmem:[#allocation16 + $0x28] sm:$0xff] (%p1094_p7)   ;;  %s1517_s16 = sshll.u32 (%p1094_p7), %s3098_s14, 4  ;;  %s3260_s3 = scalar_lea.hbm (%p1094_p7), %s3318_s7, %s1803_s15  ;;  %s3262_s16 = int_to_ptr.vmem [resolvable:$true] %s1517_s16 }
 0xb4e   : > { %v2277_v58 = vld [vmem:[#allocation16 + $0x30] sm:$0xff] (%p1094_p7)   ;;  %s1503_s30 = scalar_lea.sflag (%p1094_p7), [#allocation7], %s3044_s18  ;;  %s2485_s27 = scalar_lea.vmem (%p1094_p7), %s3262_s16, 128 }
 0xb4f   : > { %p2486_p10 = scmp.ne.s32.totalorder (%p1094_p7), %s3262_s16, %s2485_s27  ;;  %p3353_p13 = scmp.ne.s32.totalorder (%p1094_p7), %s3336_s20, 0 }
 0xb50   : > { %s2736_s10 = smov (%p1094_p7), [#allocation17]  }
 0xb51   : >> { %1111 = vrot.lane.b32.xlu0 %v3094_v44, %s2734_s1  ;;  %p2487_p2 = pnand (%p1094_p7), %p2486_p10, %p3353_p13  ;;  %s2489_s9 = sshll.u32 (%p1094_p7), %s2736_s10, 4  ;;  %s2490_s9 = int_to_ptr.vmem [resolvable:$false] %s2489_s9 }
 0xb52   : > { %s2491_s8 = scalar_lea.vmem (%p1094_p7), %s2490_s9, 256  ;;  %p2492_p9 = scmp.lt.s32.totalorder (%p1094_p7), %s3262_s16, %s2490_s9 }
 0xb53   : > { %p2488_p8 = pneg (%p1094_p7), %p2487_p2  ;;  %p2493_p4 = scmp.lt.s32.totalorder (%p1094_p7), %s2491_s8, %s2485_s27 }
 0xb55   : > { %p2494_p6 = por (%p1094_p7), %p2493_p4, %p2492_p9 }
 0xb57   : > { %p2495_p3 = pnand (%p1094_p7), %p2494_p6, %p2488_p8 }
 0xbbf   : >> { %v1117_v59 = vpop.permute.xlu0 %1116 }
 0xbc0   : >> { %v1123_v60 = vsel %vm649_vm4, %v1117_v59, 0  ;;  %v2278_v59 = vld [vmem:[#allocation16 + $0x38] sm:$0xff] (%p1094_p7)  }
 0xbc1   : >> { %1911 = vmatpush3.bf16.xpose.msra.mxu0 %v1123_v60 }
 0xbc2   : > { %1938 = vmatprep.subr.bf16.mxu0 (%p1094_p7), %v2720_v9 }
 0xbc3   : >> { %v1112_v61 = vpop.permute.xlu0 %1111 }
 0xbc8   : >> { %1913 = vmatmul.mubr.msk.bf16.vlgmr.msra.gmra.mrb[0].mxu0 %vm649_vm4, %v1112_v61 }
 0xbc9   : > { %1954 = vmatprep.mubr.msk.bf16.mxu0 (%p1094_p7), %vm2721_vm1, %v2720_v9  ;;  %1939 = vmatpush3.bf16.msra.mxu0 (%p1094_p7), %v2271_v53 }
 0xbca   : > { %1940 = vmatprep.subr.bf16.mxu0 (%p1094_p7), %v2720_v9 }
 0xc9b   : >> { %v1159_v2 = vpop.f32.mrb[0].mxu0 }
 0xc9c   : >> { %v1170_v3 = vsel %vm1169_vm15, %v1159_v2, -1e+30  ;;  %v1914_v4 = vpop.f32.mrb[1].mxu0 }
 0xc9d   : >> { %v1162_v5 = vpop.f32.mrb[2].mxu0  ;;  %v1171_v6 = vsel %vm649_vm4, %v1170_v3, -inf }
 0xc9e   : >> { %1172 = vmax.xlane.f32.xlu1 %v1171_v6  ;;  %v1915_v7 = vpop.f32.mrb[3].mxu0 }
 0xcaf   : >> { %1191 = vrot.lane.b32.xlu1 %v2262_v8, %s2734_s1 }
 0xd2b   : >> { %v1173_v11 = vpop.xlane.xlu1 %1172 }
 0xd2c   : >> { %v1174_v12 = vmax.f32 %v2703_v56, %v1173_v11  }
 0xd2e   : >> { %v1175_v13 = vsub.f32 %v1170_v3, %v1174_v12  ;;  %v1178_v14 = vsub.f32 %v2703_v56, %v1174_v12  ;;  %v3352_v56 = vmov %v1174_v12 }
 0xd2f   : >> { %v1192_v15 = vpop.permute.xlu1 %1191  ;;  %v2274_v56 = vld [vmem:[#allocation16 + $0x18] sm:$0xff] (%p1094_p7)  }
 0xd30   : >> { %v1176_v16 = vmul.f32 1.442695, %v1175_v13  ;;  %v1198_v17 = vsel %vm722_vm6, %v1192_v15, 0  ;;  %v1179_v21 = vmul.f32 1.442695, %v1178_v14 }
 0xd31   : >> { %1917 = vmatpush3.bf16.msra.mxu1 %v1198_v17 }
 0xd32   : >> { %2263 = vpow2.f32 %v1176_v16  ;;  %1922 = vmatprep.subr.bf16.mxu1 (%p1094_p7), %v2720_v9 }
 0xd33   : >> { %2265 = vpow2.f32 %v1179_v21 }
 0xd3c   : >> { %v2264_v18 = vpop.eup %2263 }
 0xd3d   : >> { %v1182_v19 = vsel %vm649_vm4, %v2264_v18, 0.0  ;;  %v1187_v20 = vpack.c.bf16 %v2264_v18, %v2264_v18  ;;  %v2266_v22 = vpop.eup %2265 }
 0xd3e   : >> { %1183 = vadd.xlane.f32.xlu0 %v1182_v19  ;;  %v1181_v23 = vmul.f32 %v2699_v55, %v2266_v22  ;;  %v1186_v26 = vmul.f32 %v2695_v54, %v2266_v22 }
 0xd3f   : >> { %1919 = vmatmul.mubr.msk.bf16.vlgmr.msra.gmra.mrb[0].mxu1 %vm649_vm4, %v1187_v20 }
 0xd40   : > { %1926 = vmatprep.mubr.msk.bf16.mxu1 (%p1094_p7), %vm2721_vm1, %v2720_v9  ;;  %1923 = vmatpush3.bf16.msra.mxu1 (%p1094_p7), %v2267_v33 }
 0xd41   : > { %1924 = vmatprep.subr.bf16.mxu1 (%p1094_p7), %v2720_v9 }
 0xd44   : > { %1925 = vmatpush3.bf16.msra.mxu1 (%p1094_p7), %v2268_v34 }
 0xd45   : > { %1930 = vmatprep.subr.bf16.mxu1 (%p1094_p7), %v2720_v9 }
 0xdcb   : >> { %v1184_v24 = vpop.xlane.xlu0 %1183 }
 0xdcc   : >> { %v1185_v25 = vadd.f32 %v1184_v24, %v1181_v23  }
 0xdce   : >> { %v3351_v55 = vmov %v1185_v25  ;;  %2279 = vrcp.f32 (%p1094_p7), %v1185_v25 }
 0xdcf   : > { %v2273_v55 = vld [vmem:[#allocation16 + $0x10] sm:$0xff] (%p1094_p7)  }
 0xdd8   : > { %v2280_v35 = vpop.eup (%p1094_p7), %2279 }
 0xe0f   : > { %1097 = sbr.rel (!%p1094_p7) target bundleno = 2888 (0xb48), region = 191 }
 0xe12   : >> { %v1234_v27 = vpop.f32.mrb[0].mxu1 }
 0xe13   : >> { %v1240_v28 = vadd.f32 %v1234_v27, %v1186_v26   ;;  %v1920_v29 = vpop.f32.mrb[1].mxu1 }
 0xe14   : >> { %v1237_v30 = vpop.f32.mrb[2].mxu1 }
 0xe15   : >> { %v1921_v31 = vpop.f32.mrb[3].mxu1  ;;  %v3350_v54 = vmov %v1240_v28  ;;  %v1242_v10 = vmul.f32 (%p1094_p7), %v2280_v35, %v1240_v28 }
 0xe16   : > { %v2272_v54 = vld [vmem:[#allocation16 + $0x8] sm:$0xff]  }
 0xe17   : > { %v1808_v32 = vpack.c.bf16 %v1242_v10, %v1242_v10  ;;  %1941 = vmatpush3.bf16.msra.mxu0 %v2272_v54 }
 0xe18   : > { %1942 = vmatprep.subr.bf16.mxu0 %v2720_v9 }
 0xe19   : > { %1247 = vrot.lane.b32.xlu0 %v1808_v32, %s2735_s17 }
 0xe1b   : > { %1943 = vmatpush3.bf16.msra.mxu0 %v2273_v55 }
 0xe1c   : > { %1944 = vmatprep.subr.bf16.mxu0 %v2720_v9 }
 0xe1f   : > { %1945 = vmatpush3.bf16.msra.mxu0 %v2274_v56 }
 0xe20   : > { %1946 = vmatprep.subr.bf16.mxu0 %v2720_v9 }
 0xe8b   : > { %v1248_v44 = vpop.permute.xlu0 %1247 }
 0xe8c   : > { %1251 = vst.msk [vmem:[#allocation4] sm:$0xf] %vm1250_vm2, %v1248_v44 }
 0xe93   : > { %v1252_v36 = vld [vmem:[#allocation4] sm:$0xf] }
 0xe94   : > { %1927 = vmatmul.mubr.msk.bf16.vlgmr.msra.gmra.mrb[0].mxu1 %vm400_vm0, %v1252_v36 }
 0xe95   : > { %1934 = vmatprep.mubr.msk.bf16.mxu1 %vm2721_vm1, %v2720_v9  ;;  %1931 = vmatpush3.bf16.msra.mxu1 %v2269_v45 }
 0xe96   : > { %1932 = vmatprep.subr.bf16.mxu1 %v2720_v9 }
 0xe99   : > { %1933 = vmatpush3.bf16.msra.mxu1 %v2270_v46 }
 0xf67   : > { %v1306_v37 = vpop.f32.mrb[0].mxu1 }
 0xf68   : > { %v1312_v38 = vadd.f32 %v1306_v37, %v3068_v1  ;;  %v1928_v39 = vpop.f32.mrb[1].mxu1 }
 0xf69   : > { %v1309_v40 = vpop.f32.mrb[2].mxu1 }
 0xf6a   : > { %v1929_v41 = vpop.f32.mrb[3].mxu1  ;;  %v1313_v42 = vmul.f32 %v1312_v38, %v1312_v38 }
 0xf6c   : > { %v1314_v43 = vsel %vm400_vm0, %v1313_v42, 0.0 }
 0xf6d   : > { %1315 = vadd.xlane.f32.xlu0 %v1314_v43 }
 0xffa   : > { %v1316_v47 = vpop.xlane.xlu0 %1315 }
 0xffb   : > { %v1317_v48 = vmul.f32 0.03125, %v1316_v47 }
 0xffd   : > { %v1318_v49 = vadd.f32 1.1920929e-07, %v1317_v48 }
 0xfff   : > { %2281 = vrsqrt.f32 %v1318_v49 }
0x1009   : > { %v2282_v50 = vpop.eup %2281 }
0x100a   : > { %v1320_v51 = vmul.f32 %v2282_v50, %v1312_v38 }
0x100c   : > { %v1327_v1 = vmul.f32 %v3066_v0, %v1320_v51  ;;  %v2275_v0 = vld [vmem:[#allocation16 + $0x20] sm:$0xff]  }
0x100d   : > { %1947 = vmatpush3.bf16.msra.mxu0 %v2275_v0 }
0x100e   : > { %v1328_v52 = vpack.c.bf16 %v1327_v1, %v1327_v1  ;;  %1948 = vmatprep.subr.bf16.mxu0 %v2720_v9 }
0x1010   : > { %1935 = vmatmul.mubr.msk.bf16.vlgmr.msra.gmra.mrb[4].mxu1 %vm400_vm0, %v1328_v52 }
0x1011   : > { %1949 = vmatpush3.bf16.msra.mxu0 %v2276_v57 }
0x1012   : > { %1950 = vmatprep.subr.bf16.mxu0 %v2720_v9 }
0x1015   : > { %1951 = vmatpush3.bf16.msra.mxu0 %v2277_v58 }
0x1016   : > { %1952 = vmatprep.subr.bf16.mxu0 %v2720_v9 }
0x1019   : > { %1953 = vmatpush3.bf16.msra.mxu0 %v2278_v59 }
0x10e3   : > { %v1382_v60 = vpop.f32.mrb[4].mxu1 }
0x10e4   : > { %v1793_v61 = vmul.f32 -1.442695, %v1382_v60  ;;  %v1936_v62 = vpop.f32.mrb[5].mxu1 }
0x10e5   : > { %v1385_v63 = vpop.f32.mrb[6].mxu1 }
0x10e6   : > { %2283 = vpow2.f32 %v1793_v61  ;;  %v1937_v2 = vpop.f32.mrb[7].mxu1 }
0x10f0   : > { %v2284_v3 = vpop.eup %2283 }
0x10f1   : > { %v1391_v4 = vadd.f32 1.0, %v2284_v3 }
0x10f3   : > { %2285 = vrcp.f32 %v1391_v4 }
0x10fd   : > { %v2286_v5 = vpop.eup %2285 }
0x10fe   : > { %v1394_v6 = vmul.f32 %v2286_v5, %v1382_v60 }
0x1100   : > { %v1395_v7 = vpack.c.bf16 %v1394_v6, %v1394_v6 }
0x1102   : > { %1955 = vmatmul.mubr.bf16.vlgmr.msra.gmra.mrb[0].mxu0 %v1395_v7 }
0x11d5   : > { %v1494_v9 = vpop.f32.mrb[0].mxu0 }
0x11d6   : > { %v1500_v8 = vadd.f32 %v1494_v9, %v1312_v38  ;;  %v1956_v11 = vpop.f32.mrb[1].mxu0 }
0x11d7   : > { %v1497_v12 = vpop.f32.mrb[2].mxu0 }
0x11d8   : > { %1501 = vst.msk [vmem:[%s3098_s14] sm:$0xff] %vm400_vm0, %v1500_v8  ;;  %v1957_v13 = vpop.f32.mrb[3].mxu0 }
0x11d9   : > { %2498 = shalt.err (!%p2495_p3)
}
0x11da   : > { %s2499_s18 = scalar_lea.hbm %s3260_s3, 128  ;;  %s2503_s12 = scalar_lea.hbm %s3318_s7, 256 }
0x11db   : > { %p2500_p1 = scmp.ne.s32.totalorder %s3260_s3, %s2499_s18  ;;  %p2504_p0 = scmp.lt.u32.totalorder %s3260_s3, %s3318_s7 }
0x11dc   : > { %p2505_p5 = scmp.lt.u32.totalorder %s2503_s12, %s2499_s18  ;;  %p2507_p10 = scmp.lt.u32.totalorder %s2499_s18, %s3260_s3 }
0x11dd   : > { %p2501_p12 = pnand %p2500_p1, %p3353_p13 }
0x11de   : > { %p2506_p7 = por %p2505_p5, %p2504_p0 }
0x11df   : > { %p2502_p11 = pneg %p2501_p12 }
0x11e0   : > { %p2508_p2 = por %p2507_p10, %p2506_p7 }
0x11e2   : > { %p2509_p8 = pnand %p2508_p2, %p2502_p11 }
0x11e4   : > { %2512 = shalt.err (!%p2509_p8)
}
0x11e5   : > { %1984 = dma.vmem_to_hbm [thread:$0]  (%p3353_p13), %s3262_s16, 128, %s3260_s3, %s1503_s30  }
0x11e6 PF: > { %s1529_s15 = sand.u32 1, %s2623_s24   ;;  %p3354_p9 = scmp.ne.s32.totalorder %s3337_s13, 0 }
0x11e7   : > { %p3355_p4 = scmp.ge.s32.totalorder %s2643_s29, 2  ;;  %s1530_s11 = scalar_lea.sflag [#allocation7], %s1529_s15 }
0x11e9   : > { %p2010_p6 = pnand %p3355_p4, %p3354_p9 }
0x11eb   : > { %2618 = dma.done.wait (!%p2010_p6), %s1530_s11, 128  }
0x11ec   : > { %2620 = vsyncadd (!%p2010_p6), %s1530_s11, 4294967168  ;;  %s26_s29 = sadd.s32 1, %s2643_s29   ;;  %s3356_s24 = smov %s2627_s25 }
0x11ed   : > { %p23_p3 = scmp.ge.s32.totalorder %s26_s29, 4   ;;  %s3357_s25 = smov %s2631_s26 }
0x11ee   : > { %s3358_s26 = smov %s2994_s23  ;;  %s3359_s27 = smov %s2639_s28 }
0x11ef   : > { %s3360_s28 = smov %s3362_s22  ;;  %25 = sbr.rel (!%p23_p3) target bundleno = 12 (0xc), region = 202 }
0x11f6   :  { %1535 = vsyncpa [#allocation6], 1 }
0x11f7   :  { %1537 = vsyncpa [#allocation6 + $0x1], 1 }
0x11f8   :  { %1538 = vsyncpa [#allocation9], 1 }
0x11f9   :  { %1539 = vsyncpa [#allocation12], 1 }
0x11fa   :  { %1540 = vsyncpa [#allocation15], 1 }
0x11fb   :  { %1541 = vsyncpa [#allocation7], 1 }
0x11fc   :  { %1543 = vsyncpa [#allocation7 + $0x1], 1 }

</bundles_post_ra>
